<compile_context>
chip_gen: v5e
topology: v5e:2x2
jax: 0.10.0
libtpu: 0.0.40
codegen_flags: <defaults>
</compile_context>

<pallas_src>
import jax
import jax.numpy as jnp
from jax.experimental import pallas as pl
from jax.experimental.pallas import tpu as pltpu


def _relu_conv1x1_kernel(x_ref, w_ref, o_ref):
    # x_ref: [1, C_in, HW] f32   (one batch element, full channel/spatial slab)
    # w_ref: [C_out, C_in] bf16  (original Conv2d weight layout, pre-cast once)
    # o_ref: [1, C_out, HW] f32
    # ReLU in f32 (safe on v5e), cast to bf16 for the MXU, accumulate in f32.
    x = jnp.maximum(x_ref[0], 0.0).astype(jnp.bfloat16)       # [C_in, HW]
    o_ref[0] = jax.lax.dot_general(
        w_ref[...], x,
        dimension_numbers=(((1,), (0,)), ((), ())),            # (M,K) x (K,N)
        preferred_element_type=jnp.float32,
    ).astype(o_ref.dtype)


def prepare_conv_weight(weight):
    """One-off parameter prep: [C_out, C_in, 1, 1] (or [C_out, C_in]) -> bf16 [C_out, C_in].

    Do this once when loading parameters, NOT per forward call.
    """
    w2 = weight.reshape(weight.shape[0], -1)
    return w2.astype(jnp.bfloat16)


def relu_conv1x1(x_nchw, w_bf16):
    """x_nchw: [N, C_in, H, W] f32; w_bf16: pre-prepared bf16 [C_out, C_in]."""
    N, C_in, H, W = x_nchw.shape
    C_out = w_bf16.shape[0]
    HW = H * W

    # NCHW -> [N, C_in, H*W]: pure reshape, no layout transpose / HBM round trip.
    x3 = x_nchw.reshape(N, C_in, HW)

    flops = 2 * N * HW * C_in * C_out
    bytes_accessed = x3.size * x3.dtype.itemsize + w_bf16.size * 2 + N * C_out * HW * 4

    out3 = pl.pallas_call(
        _relu_conv1x1_kernel,
        out_shape=jax.ShapeDtypeStruct((N, C_out, HW), jnp.float32),
        grid_spec=pltpu.PrefetchScalarGridSpec(
            num_scalar_prefetch=0,
            grid=(N,),  # single grid step per batch element; K untiled (fits VMEM)
            in_specs=[
                pl.BlockSpec((1, C_in, HW), lambda n: (n, 0, 0)),
                pl.BlockSpec((C_out, C_in), lambda n: (0, 0)),  # weight block constant across grid
            ],
            out_specs=pl.BlockSpec((1, C_out, HW), lambda n: (n, 0, 0)),
        ),
        compiler_params=pltpu.CompilerParams(
            dimension_semantics=("parallel",)),
        cost_estimate=pl.CostEstimate(
            flops=flops, transcendentals=0, bytes_accessed=bytes_accessed),
    )(x3, w_bf16)

    # [N, C_out, HW] -> [N, C_out, H, W]: pure reshape back to NCHW.
    return out3.reshape(N, C_out, H, W)


if __name__ == "__main__":
    key = jax.random.PRNGKey(0)
    k_x, k_w = jax.random.split(key)

    # Shapes implied by the module: input [1, 1568, 14, 14], weight [128, 1568, 1, 1].
    N, C_in, H, W, C_out = 1, 1568, 14, 14, 128
    x = jax.random.normal(k_x, (N, C_in, H, W), dtype=jnp.float32)
    w = jax.random.normal(k_w, (C_out, C_in, 1, 1), dtype=jnp.float32) * (2.0 / C_in) ** 0.5

    # Parameter prep happens once (outside the per-call path).
    w_bf16 = prepare_conv_weight(w)

    out = relu_conv1x1(x, w_bf16)
    jax.block_until_ready(out)

    # Pure-JAX f32 reference (relaxed tolerance: kernel feeds the MXU bf16
    # inputs with f32 accumulation).
    ref = jnp.einsum("nchw,oc->nohw", jnp.maximum(x, 0.0), w.reshape(C_out, C_in))
    assert out.shape == (N, C_out, H, W), out.shape
    max_err = float(jnp.max(jnp.abs(out - ref)))
    assert jnp.allclose(out, ref, atol=5e-2, rtol=5e-2), f"mismatch vs reference, max_err={max_err}"

    print("KERNEL_OK")
</pallas_src>

<mosaic_0001>
module attributes {stable_mosaic.version = 11 : i64} {
  func.func @_relu_conv1x1_kernel(%arg0: i32, %arg1: memref<1x1568x196xf32, #tpu.memory_space<vmem>>, %arg2: memref<128x1568xbf16, #tpu.memory_space<vmem>>, %arg3: memref<1x128x196xf32, #tpu.memory_space<vmem>>) attributes {dimension_semantics = [#tpu.dimension_semantics<parallel>], iteration_bounds = array<i64: 1>, scalar_prefetch = 0 : i64, scratch_operands = 0 : i64, tpu.core_type = #tpu.core_type<tc>, window_params = [{transform_indices = @transform_0, window_bounds = array<i64: 1, 1568, 196>}, {pipeline_mode = #tpu.pipeline_mode<synchronous>, transform_indices = @transform_1, window_bounds = array<i64: 128, 1568>}, {transform_indices = @transform_2, window_bounds = array<i64: 1, 128, 196>}]} {
    %c0 = arith.constant 0 : index
    %c0_0 = arith.constant 0 : index
    %c0_1 = arith.constant 0 : index
    %0 = vector.load %arg1[%c0, %c0_0, %c0_1] : memref<1x1568x196xf32, #tpu.memory_space<vmem>>, vector<1x1568x196xf32>
    %1 = vector.shape_cast %0 : vector<1x1568x196xf32> to vector<1568x196xf32>
    %cst = arith.constant 0.000000e+00 : f32
    %2 = vector.broadcast %cst : f32 to vector<1568x196xf32>
    %3 = arith.maximumf %1, %2 : vector<1568x196xf32>
    %4 = arith.truncf %3 : vector<1568x196xf32> to vector<1568x196xbf16>
    %c0_2 = arith.constant 0 : index
    %c0_3 = arith.constant 0 : index
    %5 = vector.load %arg2[%c0_2, %c0_3] : memref<128x1568xbf16, #tpu.memory_space<vmem>>, vector<128x1568xbf16>
    %cst_4 = arith.constant dense<0.000000e+00> : vector<128x196xf32>
    %6 = tpu.matmul %5, %4, %cst_4 {dimension_numbers = #tpu.dot_dimension_numbers<[1], [0], [0], [1], [0, 0, 1, 1], [], []>} : vector<128x1568xbf16>, vector<1568x196xbf16>, vector<128x196xf32> -> vector<128x196xf32>
    %c0_5 = arith.constant 0 : index
    %c0_6 = arith.constant 0 : index
    %c0_7 = arith.constant 0 : index
    %7 = vector.load %arg3[%c0_5, %c0_6, %c0_7] : memref<1x128x196xf32, #tpu.memory_space<vmem>>, vector<1x128x196xf32>
    %8 = vector.shape_cast %7 : vector<1x128x196xf32> to vector<128x196xf32>
    %9 = vector.shape_cast %6 : vector<128x196xf32> to vector<1x128x196xf32>
    tpu.vector_store %arg3[%c0_5, %c0_6, %c0_7], %9 {strides = array<i32>} : memref<1x128x196xf32, #tpu.memory_space<vmem>>, vector<1x128x196xf32>,
    return
  }
  func.func @transform_0(%arg0: i32) -> (i32, i32, i32) {
    %c0_i32 = arith.constant 0 : i32
    %c0_i32_0 = arith.constant 0 : i32
    %c0_i32_1 = arith.constant 0 : i32
    return %arg0, %c0_i32, %c0_i32_0 : i32, i32, i32
  }
  func.func @transform_1(%arg0: i32) -> (i32, i32) {
    %c0_i32 = arith.constant 0 : i32
    %c0_i32_0 = arith.constant 0 : i32
    %c0_i32_1 = arith.constant 0 : i32
    return %c0_i32, %c0_i32_0 : i32, i32
  }
  func.func @transform_2(%arg0: i32) -> (i32, i32, i32) {
    %c0_i32 = arith.constant 0 : i32
    %c0_i32_0 = arith.constant 0 : i32
    %c0_i32_1 = arith.constant 0 : i32
    return %arg0, %c0_i32, %c0_i32_0 : i32, i32, i32
  }
}

</mosaic_0001>

<bundles_post_ra>
// kernel: tpu_custom_call.1
= control target key start
LH: loop header
LB: loop body
LE: loop exit
PB: predicated region body
PF: predicated region fallthrough
CT: control target
= control target key end

     0   :  { %vm1624_vm0 = vcmask 261120   ;;  %vm2924_vm1 = vcmask 556032   ;;  %s6162_s0 = inlined_call_operand.vmem [shape: f32[1,1568,196], index: 0, kind: input, shape index: {}]   ;;  %s6163_s1 = inlined_call_operand.vmem [shape: bf16[128,1568], index: 1, kind: input, shape index: {}]   ;;  %s6164_s2 = inlined_call_operand.vmem [shape: f32[1,128,196], index: 2, kind: output, shape index: {}]  }
   0x1   :  { %v40_v0 = vld [vmem:[%s6162_s0 + $0xe0] sm:$0xff]  ;;  %v42_v1 = vld [vmem:[%s6162_s0 + $0xf0] sm:$0xff] }
   0x2   :  { %v72_v2 = vld [vmem:[%s6162_s0 + $0x1e0] sm:$0xff]  ;;  %v432_v3 = vmax.f32 %v40_v0, 0.0  ;;  %v434_v4 = vmax.f32 %v42_v1, 0.0  ;;  %v74_v5 = vld [vmem:[%s6162_s0 + $0x1f0] sm:$0xff] }
   0x3   :  { %v464_v6 = vmax.f32 %v72_v2, 0.0  ;;  %v36_v7 = vld [vmem:[%s6162_s0 + $0xc0] sm:$0xff]  ;;  %v38_v8 = vld [vmem:[%s6162_s0 + $0xd0] sm:$0xff]  ;;  %v466_v9 = vmax.f32 %v74_v5, 0.0 }
   0x4   :  { %v428_v10 = vmax.f32 %v36_v7, 0.0  ;;  %v430_v11 = vmax.f32 %v38_v8, 0.0  ;;  %v68_v12 = vld [vmem:[%s6162_s0 + $0x1c0] sm:$0xff]  ;;  %v70_v13 = vld [vmem:[%s6162_s0 + $0x1d0] sm:$0xff]  ;;  %v810_v15 = vpack.c.bf16 %v434_v4, %v432_v3 }
   0x5   :  { %v32_v14 = vld [vmem:[%s6162_s0 + $0xa0] sm:$0xff]  ;;  %v460_v16 = vmax.f32 %v68_v12, 0.0  ;;  %v462_v17 = vmax.f32 %v70_v13, 0.0  ;;  %v34_v18 = vld [vmem:[%s6162_s0 + $0xb0] sm:$0xff]  ;;  %v826_v21 = vpack.c.bf16 %v466_v9, %v464_v6 }
   0x6   :  { %v64_v19 = vld [vmem:[%s6162_s0 + $0x1a0] sm:$0xff]  ;;  %v66_v20 = vld [vmem:[%s6162_s0 + $0x1b0] sm:$0xff]  ;;  %3496 = vmatpush.bf16.msra.mxu2 %v810_v15  ;;  %1649 = vmatpush.bf16.msra.mxu0 %v810_v15  ;;  %v808_v22 = vpack.c.bf16 %v430_v11, %v428_v10  ;;  %v424_v23 = vmax.f32 %v32_v14, 0.0  ;;  %v426_v24 = vmax.f32 %v34_v18, 0.0 }
   0x7   :  { %3504 = vmatpush.bf16.msra.mxu3 %v826_v21  ;;  %1698 = vmatpush.bf16.msra.mxu1 %v826_v21  ;;  %v824_v25 = vpack.c.bf16 %v462_v17, %v460_v16  ;;  %v456_v26 = vmax.f32 %v64_v19, 0.0  ;;  %v458_v27 = vmax.f32 %v66_v20, 0.0  ;;  %v28_v28 = vld [vmem:[%s6162_s0 + $0x80] sm:$0xff]  ;;  %v30_v29 = vld [vmem:[%s6162_s0 + $0x90] sm:$0xff] }
   0x8   :  { %v60_v30 = vld [vmem:[%s6162_s0 + $0x180] sm:$0xff]  ;;  %v62_v31 = vld [vmem:[%s6162_s0 + $0x190] sm:$0xff]  ;;  %v806_v32 = vpack.c.bf16 %v426_v24, %v424_v23  ;;  %v420_v33 = vmax.f32 %v28_v28, 0.0  ;;  %v422_v34 = vmax.f32 %v30_v29, 0.0 }
   0x9   :  { %v822_v35 = vpack.c.bf16 %v458_v27, %v456_v26  ;;  %v452_v36 = vmax.f32 %v60_v30, 0.0  ;;  %v454_v37 = vmax.f32 %v62_v31, 0.0  ;;  %v24_v38 = vld [vmem:[%s6162_s0 + $0x60] sm:$0xff]  ;;  %v26_v39 = vld [vmem:[%s6162_s0 + $0x70] sm:$0xff] }
   0xa   :  { %3497 = vmatpush.bf16.msra.mxu2 %v808_v22  ;;  %1650 = vmatpush.bf16.msra.mxu0 %v808_v22  ;;  %v56_v40 = vld [vmem:[%s6162_s0 + $0x160] sm:$0xff]  ;;  %v58_v41 = vld [vmem:[%s6162_s0 + $0x170] sm:$0xff]  ;;  %v804_v42 = vpack.c.bf16 %v422_v34, %v420_v33  ;;  %v416_v43 = vmax.f32 %v24_v38, 0.0  ;;  %v418_v44 = vmax.f32 %v26_v39, 0.0  ;;  %v2964_v39 = vld [vmem:[%s6163_s1 + $0x34] sm:$0xf0] }
   0xb   :  { %3505 = vmatpush.bf16.msra.mxu3 %v824_v25  ;;  %1699 = vmatpush.bf16.msra.mxu1 %v824_v25  ;;  %v820_v45 = vpack.c.bf16 %v454_v37, %v452_v36  ;;  %v448_v46 = vmax.f32 %v56_v40, 0.0  ;;  %v450_v47 = vmax.f32 %v58_v41, 0.0  ;;  %v20_v48 = vld [vmem:[%s6162_s0 + $0x40] sm:$0xff]  ;;  %v22_v49 = vld [vmem:[%s6162_s0 + $0x50] sm:$0xff]  ;;  %v3172_v25 = vld [vmem:[%s6163_s1 + $0x1d4] sm:$0xf0] }
   0xc   :  { %v52_v50 = vld [vmem:[%s6162_s0 + $0x140] sm:$0xff]  ;;  %v54_v51 = vld [vmem:[%s6162_s0 + $0x150] sm:$0xff]  ;;  %v802_v52 = vpack.c.bf16 %v418_v44, %v416_v43  ;;  %v412_v53 = vmax.f32 %v20_v48, 0.0  ;;  %v414_v54 = vmax.f32 %v22_v49, 0.0 }
   0xd   :  { %v818_v55 = vpack.c.bf16 %v450_v47, %v448_v46  ;;  %v444_v56 = vmax.f32 %v52_v50, 0.0  ;;  %v446_v57 = vmax.f32 %v54_v51, 0.0  ;;  %v16_v58 = vld [vmem:[%s6162_s0 + $0x20] sm:$0xff]  ;;  %v18_v59 = vld [vmem:[%s6162_s0 + $0x30] sm:$0xff] }
   0xe   :  { %3498 = vmatpush.bf16.msra.mxu2 %v806_v32  ;;  %1651 = vmatpush.bf16.msra.mxu0 %v806_v32  ;;  %v48_v60 = vld [vmem:[%s6162_s0 + $0x120] sm:$0xff]  ;;  %v50_v61 = vld [vmem:[%s6162_s0 + $0x130] sm:$0xff]  ;;  %v800_v62 = vpack.c.bf16 %v414_v54, %v412_v53  ;;  %v408_v63 = vmax.f32 %v16_v58, 0.0  ;;  %v410_v0 = vmax.f32 %v18_v59, 0.0 }
   0xf   :  { %3506 = vmatpush.bf16.msra.mxu3 %v822_v35  ;;  %1700 = vmatpush.bf16.msra.mxu1 %v822_v35  ;;  %v12_v1 = vld [vmem:[%s6162_s0] sm:$0xff]  ;;  %v816_v2 = vpack.c.bf16 %v446_v57, %v444_v56  ;;  %v440_v3 = vmax.f32 %v48_v60, 0.0  ;;  %v442_v4 = vmax.f32 %v50_v61, 0.0  ;;  %v14_v5 = vld [vmem:[%s6162_s0 + $0x10] sm:$0xff] }
  0x10   :  { %v44_v6 = vld [vmem:[%s6162_s0 + $0x100] sm:$0xff]  ;;  %v46_v7 = vld [vmem:[%s6162_s0 + $0x110] sm:$0xff]  ;;  %v404_v10 = vmax.f32 %v12_v1, 0.0  ;;  %v798_v13 = vpack.c.bf16 %v410_v0, %v408_v63  ;;  %v406_v14 = vmax.f32 %v14_v5, 0.0 }
  0x11   :  { %v104_v8 = vld [vmem:[%s6162_s0 + $0x2e0] sm:$0xff]  ;;  %v106_v9 = vld [vmem:[%s6162_s0 + $0x2f0] sm:$0xff]  ;;  %v436_v15 = vmax.f32 %v44_v6, 0.0  ;;  %v438_v16 = vmax.f32 %v46_v7, 0.0  ;;  %v814_v17 = vpack.c.bf16 %v442_v4, %v440_v3 }
  0x12   :  { %3499 = vmatpush.bf16.msra.mxu2 %v804_v42  ;;  %1652 = vmatpush.bf16.msra.mxu0 %v804_v42  ;;  %v136_v11 = vld [vmem:[%s6162_s0 + $0x3e0] sm:$0xff]  ;;  %v138_v12 = vld [vmem:[%s6162_s0 + $0x3f0] sm:$0xff]  ;;  %v496_v18 = vmax.f32 %v104_v8, 0.0  ;;  %v498_v19 = vmax.f32 %v106_v9, 0.0  ;;  %v796_v37 = vpack.c.bf16 %v406_v14, %v404_v10 }
  0x13   :  { %3507 = vmatpush.bf16.msra.mxu3 %v820_v45  ;;  %1701 = vmatpush.bf16.msra.mxu1 %v820_v45  ;;  %v3638_v20 = vld [vmem:[%s6162_s0 + $0x2c0] sm:$0xff]  ;;  %v3450_v23 = vld [vmem:[%s6163_s1 + $0x1d0] sm:$0xf0]  ;;  %v528_v29 = vmax.f32 %v136_v11, 0.0  ;;  %v530_v30 = vmax.f32 %v138_v12, 0.0  ;;  %v812_v38 = vpack.c.bf16 %v438_v16, %v436_v15 }
  0x14   :  { %v168_v21 = vld [vmem:[%s6162_s0 + $0x4e0] sm:$0xff]  ;;  %v3398_v27 = vld [vmem:[%s6163_s1 + $0x30] sm:$0xf0]  ;;  %v492_v40 = vmax.f32 %v3638_v20, 0.0  ;;  %v842_v43 = vpack.c.bf16 %v498_v19, %v496_v18 }
  0x15   :  { %v3170_v22 = vld [vmem:[%s6163_s1 + $0x1a0] sm:$0xf]  ;;  %v3444_v24 = vld [vmem:[%s6163_s1 + $0x1a4] sm:$0xf]  ;;  %v170_v31 = vld [vmem:[%s6162_s0 + $0x4f0] sm:$0xff]  ;;  %v560_v41 = vmax.f32 %v168_v21, 0.0  ;;  %v858_v50 = vpack.c.bf16 %v530_v30, %v528_v29 }
  0x16   :  { %3500 = vmatpush.bf16.msra.mxu2 %v802_v52  ;;  %1653 = vmatpush.bf16.msra.mxu0 %v802_v52  ;;  %v2962_v26 = vld [vmem:[%s6163_s1] sm:$0xf]  ;;  %v3392_v28 = vld [vmem:[%s6163_s1 + $0x4] sm:$0xf]  ;;  %v202_v33 = vld [vmem:[%s6162_s0 + $0x5f0] sm:$0xff]  ;;  %v562_v44 = vmax.f32 %v170_v31, 0.0  ;;  %v3704_v56 = vor.u32 %v3450_v23, %v3170_v22  ;;  %v3706_v57 = vor.u32 %v3444_v24, %v3172_v25 }
  0x17   :  { %3508 = vmatpush.bf16.msra.mxu3 %v818_v55  ;;  %1702 = vmatpush.bf16.msra.mxu1 %v818_v55  ;;  %v200_v32 = vld [vmem:[%s6162_s0 + $0x5e0] sm:$0xff]  ;;  %v102_v34 = vld [vmem:[%s6162_s0 + $0x2d0] sm:$0xff]  ;;  %v594_v46 = vmax.f32 %v202_v33, 0.0  ;;  %v3708_v58 = vor.u32 %v3398_v27, %v2962_v26  ;;  %v3710_v59 = vor.u32 %v3392_v28, %v2964_v39 }
  0x18   :  { %v132_v35 = vld [vmem:[%s6162_s0 + $0x3c0] sm:$0xff]  ;;  %v134_v36 = vld [vmem:[%s6162_s0 + $0x3d0] sm:$0xff]  ;;  %v592_v45 = vmax.f32 %v200_v32, 0.0  ;;  %v494_v51 = vmax.f32 %v102_v34, 0.0  ;;  %6236 = vst [vmem:[#allocation2_spill] sm:$0xff] %v3706_v57 }
  0x19   :  { %v96_v42 = vld [vmem:[%s6162_s0 + $0x2a0] sm:$0xff]  ;;  %v98_v47 = vld [vmem:[%s6162_s0 + $0x2b0] sm:$0xff]  ;;  %v524_v52 = vmax.f32 %v132_v35, 0.0  ;;  %v526_v53 = vmax.f32 %v134_v36, 0.0 }
  0x1a   :  { %3501 = vmatpush.bf16.msra.mxu2 %v800_v62  ;;  %1654 = vmatpush.bf16.msra.mxu0 %v800_v62  ;;  %v164_v48 = vld [vmem:[%s6162_s0 + $0x4c0] sm:$0xff]  ;;  %v166_v49 = vld [vmem:[%s6162_s0 + $0x4d0] sm:$0xff]  ;;  %v488_v62 = vmax.f32 %v96_v42, 0.0  ;;  %v490_v63 = vmax.f32 %v98_v47, 0.0  ;;  %v890_v3 = vpack.c.bf16 %v594_v46, %v592_v45  ;;  %v840_v8 = vpack.c.bf16 %v494_v51, %v492_v40  ;;  %v3463_v51 = vld [vmem:[%s6163_s1 + $0x238] sm:$0xf0] }
  0x1b   :  { %3509 = vmatpush.bf16.msra.mxu3 %v816_v2  ;;  %1703 = vmatpush.bf16.msra.mxu1 %v816_v2  ;;  %v196_v54 = vld [vmem:[%s6162_s0 + $0x5c0] sm:$0xff]  ;;  %v198_v55 = vld [vmem:[%s6162_s0 + $0x5d0] sm:$0xff]  ;;  %v556_v0 = vmax.f32 %v164_v48, 0.0  ;;  %v558_v1 = vmax.f32 %v166_v49, 0.0  ;;  %v874_v2 = vpack.c.bf16 %v562_v44, %v560_v41  ;;  %v856_v9 = vpack.c.bf16 %v526_v53, %v524_v52 }
  0x1c   :  { %v128_v60 = vld [vmem:[%s6162_s0 + $0x3a0] sm:$0xff]  ;;  %v130_v61 = vld [vmem:[%s6162_s0 + $0x3b0] sm:$0xff]  ;;  %v588_v4 = vmax.f32 %v196_v54, 0.0  ;;  %v590_v5 = vmax.f32 %v198_v55, 0.0  ;;  %v838_v18 = vpack.c.bf16 %v490_v63, %v488_v62 }
  0x1d   :  { %v92_v6 = vld [vmem:[%s6162_s0 + $0x280] sm:$0xff]  ;;  %v520_v10 = vmax.f32 %v128_v60, 0.0  ;;  %v522_v11 = vmax.f32 %v130_v61, 0.0  ;;  %v162_v12 = vld [vmem:[%s6162_s0 + $0x4b0] sm:$0xff]  ;;  %v872_v19 = vpack.c.bf16 %v558_v1, %v556_v0  ;;  %v3457_v61 = vld [vmem:[%s6163_s1 + $0x20c] sm:$0xf] }
  0x1e   :  { %3502 = vmatpush.bf16.msra.mxu2 %v798_v13  ;;  %1655 = vmatpush.bf16.msra.mxu0 %v798_v13  ;;  %v160_v7 = vld [vmem:[%s6162_s0 + $0x4a0] sm:$0xff]  ;;  %v194_v14 = vld [vmem:[%s6162_s0 + $0x5b0] sm:$0xff]  ;;  %v484_v20 = vmax.f32 %v92_v6, 0.0  ;;  %v888_v24 = vpack.c.bf16 %v590_v5, %v588_v4  ;;  %v554_v25 = vmax.f32 %v162_v12, 0.0  ;;  %v3405_v4 = vld [vmem:[%s6163_s1 + $0x6c] sm:$0xf] }
  0x1f   :  { %3510 = vmatpush.bf16.msra.mxu3 %v814_v17  ;;  %1704 = vmatpush.bf16.msra.mxu1 %v814_v17  ;;  %v192_v13 = vld [vmem:[%s6162_s0 + $0x5a0] sm:$0xff]  ;;  %v94_v15 = vld [vmem:[%s6162_s0 + $0x290] sm:$0xff]  ;;  %v552_v21 = vmax.f32 %v160_v7, 0.0  ;;  %v586_v27 = vmax.f32 %v194_v14, 0.0  ;;  %v854_v31 = vpack.c.bf16 %v522_v11, %v520_v10 }
  0x20   :  { %v124_v16 = vld [vmem:[%s6162_s0 + $0x380] sm:$0xff]  ;;  %v126_v17 = vld [vmem:[%s6162_s0 + $0x390] sm:$0xff]  ;;  %v584_v26 = vmax.f32 %v192_v13, 0.0  ;;  %v486_v32 = vmax.f32 %v94_v15, 0.0 }
  0x21   :  { %v88_v22 = vld [vmem:[%s6162_s0 + $0x260] sm:$0xff]  ;;  %v90_v23 = vld [vmem:[%s6162_s0 + $0x270] sm:$0xff]  ;;  %v516_v33 = vmax.f32 %v124_v16, 0.0  ;;  %v518_v34 = vmax.f32 %v126_v17, 0.0  ;;  %v870_v46 = vpack.c.bf16 %v554_v25, %v552_v21 }
  0x22   :  { %3503 = vmatpush.bf16.msra.mxu2 %v796_v37  ;;  %1656 = vmatpush.bf16.msra.mxu0 %v796_v37  ;;  %v120_v28 = vld [vmem:[%s6162_s0 + $0x360] sm:$0xff]  ;;  %v122_v29 = vld [vmem:[%s6162_s0 + $0x370] sm:$0xff]  ;;  %v482_v39 = vmax.f32 %v90_v23, 0.0  ;;  %v886_v47 = vpack.c.bf16 %v586_v27, %v584_v26  ;;  %v836_v52 = vpack.c.bf16 %v486_v32, %v484_v20 }
  0x23   :  { %3511 = vmatpush.bf16.msra.mxu3 %v812_v38  ;;  %1705 = vmatpush.bf16.msra.mxu1 %v812_v38  ;;  %v156_v30 = vld [vmem:[%s6162_s0 + $0x480] sm:$0xff]  ;;  %v158_v35 = vld [vmem:[%s6162_s0 + $0x490] sm:$0xff]  ;;  %v480_v38 = vmax.f32 %v88_v22, 0.0  ;;  %v512_v40 = vmax.f32 %v120_v28, 0.0  ;;  %v514_v41 = vmax.f32 %v122_v29, 0.0  ;;  %v852_v53 = vpack.c.bf16 %v518_v34, %v516_v33 }
  0x24   :  { %v188_v36 = vld [vmem:[%s6162_s0 + $0x580] sm:$0xff]  ;;  %v190_v37 = vld [vmem:[%s6162_s0 + $0x590] sm:$0xff]  ;;  %v548_v42 = vmax.f32 %v156_v30, 0.0 }
  0x25   :  { %1677 = vmatmul.bf16.vlgmr.msra.gmra.mxu2 %v3704_v56  ;;  %1657 = vmatmul.bf16.vlgmr.msra.gmra.mxu0 %v3708_v58  ;;  %v580_v44 = vmax.f32 %v188_v36, 0.0  ;;  %v582_v45 = vmax.f32 %v190_v37, 0.0  ;;  %v84_v48 = vld [vmem:[%s6162_s0 + $0x240] sm:$0xff]  ;;  %v154_v54 = vld [vmem:[%s6162_s0 + $0x470] sm:$0xff]  ;;  %v834_v5 = vpack.c.bf16 %v482_v39, %v480_v38  ;;  %v850_v6 = vpack.c.bf16 %v514_v41, %v512_v40 }
  0x26   :  { %1747 = vmatpush.bf16.msrb.mxu2 %v842_v43  ;;  %1726 = vmatmul.bf16.vlgmr.msra.gmra.mxu3 %v3706_v57  ;;  %v550_v43 = vmax.f32 %v158_v35, 0.0  ;;  %v152_v49 = vld [vmem:[%s6162_s0 + $0x460] sm:$0xff]  ;;  %v186_v60 = vld [vmem:[%s6162_s0 + $0x570] sm:$0xff]  ;;  %v546_v11 = vmax.f32 %v154_v54, 0.0  ;;  %v476_v14 = vmax.f32 %v84_v48, 0.0 }
  0x27   :  { %1796 = vmatpush.bf16.msrb.mxu3 %v858_v50  ;;  %1706 = vmatmul.bf16.vlgmr.msra.gmra.mxu1 %v3710_v59  ;;  %v3222_v50 = vld [vmem:[%s6163_s1 + $0x208] sm:$0xf]  ;;  %v184_v55 = vld [vmem:[%s6162_s0 + $0x560] sm:$0xff]  ;;  %v86_v63 = vld [vmem:[%s6162_s0 + $0x250] sm:$0xff]  ;;  %v544_v10 = vmax.f32 %v152_v49, 0.0  ;;  %v578_v13 = vmax.f32 %v186_v60, 0.0 }
  0x28   :  { %1845 = vmatpush.bf16.msrb.mxu0 %v874_v2  ;;  %1894 = vmatpush.bf16.msrb.mxu1 %v890_v3  ;;  %v3224_v62 = vld [vmem:[%s6163_s1 + $0x23c] sm:$0xf0]  ;;  %v118_v1 = vld [vmem:[%s6162_s0 + $0x350] sm:$0xff]  ;;  %v3014_v2 = vld [vmem:[%s6163_s1 + $0x68] sm:$0xf]  ;;  %v868_v7 = vpack.c.bf16 %v550_v43, %v548_v42  ;;  %v576_v12 = vmax.f32 %v184_v55, 0.0 }
  0x29   :  { %v116_v0 = vld [vmem:[%s6162_s0 + $0x340] sm:$0xff]  ;;  %v3411_v3 = vld [vmem:[%s6163_s1 + $0x98] sm:$0xf0]  ;;  %v478_v15 = vmax.f32 %v86_v63, 0.0  ;;  %v510_v17 = vmax.f32 %v118_v1, 0.0  ;;  %v3822_v20 = vor.u32 %v3457_v61, %v3224_v62  ;;  %v866_v22 = vpack.c.bf16 %v546_v11, %v544_v10  ;;  %v82_v27 = vld [vmem:[%s6162_s0 + $0x230] sm:$0xff] }
  0x2a   :  { %1748 = vmatpush.bf16.msrb.mxu2 %v840_v8  ;;  %v884_v8 = vpack.c.bf16 %v582_v45, %v580_v44  ;;  %v508_v16 = vmax.f32 %v116_v0, 0.0  ;;  %v882_v23 = vpack.c.bf16 %v578_v13, %v576_v12  ;;  %v80_v26 = vld [vmem:[%s6162_s0 + $0x220] sm:$0xff]  ;;  %v474_v29 = vmax.f32 %v82_v27, 0.0  ;;  %v150_v35 = vld [vmem:[%s6162_s0 + $0x450] sm:$0xff] }
  0x2b   :  { %1797 = vmatpush.bf16.msrb.mxu3 %v856_v9  ;;  %v3016_v9 = vld [vmem:[%s6163_s1 + $0x9c] sm:$0xf0]  ;;  %6237 = vst [vmem:[#allocation3_spill] sm:$0xff] %v3822_v20  ;;  %v472_v28 = vmax.f32 %v80_v26, 0.0  ;;  %v182_v38 = vld [vmem:[%s6162_s0 + $0x550] sm:$0xff]  ;;  %v542_v40 = vmax.f32 %v150_v35, 0.0 }
  0x2c   :  { %1846 = vmatpush.bf16.msrb.mxu0 %v872_v19  ;;  %1895 = vmatpush.bf16.msrb.mxu1 %v888_v24  ;;  %v3820_v19 = vor.u32 %v3411_v3, %v3014_v2  ;;  %v3824_v21 = vor.u32 %v3405_v4, %v3016_v9  ;;  %v832_v24 = vpack.c.bf16 %v478_v15, %v476_v14  ;;  %v112_v30 = vld [vmem:[%s6162_s0 + $0x320] sm:$0xff]  ;;  %v574_v42 = vmax.f32 %v182_v38, 0.0  ;;  %v78_v44 = vld [vmem:[%s6162_s0 + $0x210] sm:$0xff]  ;;  %v3276_v9 = vld [vmem:[%s6163_s1 + $0x2a4] sm:$0xf0] }
  0x2d   :  { %v848_v25 = vpack.c.bf16 %v510_v17, %v508_v16  ;;  %v148_v32 = vld [vmem:[%s6162_s0 + $0x440] sm:$0xff]  ;;  %v504_v33 = vmax.f32 %v112_v30, 0.0  ;;  %v830_v39 = vpack.c.bf16 %v474_v29, %v472_v28  ;;  %v470_v48 = vmax.f32 %v78_v44, 0.0  ;;  %v110_v49 = vld [vmem:[%s6162_s0 + $0x310] sm:$0xff]  ;;  %v3068_v15 = vld [vmem:[%s6163_s1 + $0x104] sm:$0xf0] }
  0x2e   :  { %1749 = vmatpush.bf16.msrb.mxu2 %v838_v18  ;;  %v3818_v18 = vor.u32 %v3463_v51, %v3222_v50  ;;  %v540_v36 = vmax.f32 %v148_v32, 0.0  ;;  %v180_v37 = vld [vmem:[%s6162_s0 + $0x540] sm:$0xff]  ;;  %v502_v55 = vmax.f32 %v110_v49, 0.0  ;;  %v178_v62 = vld [vmem:[%s6162_s0 + $0x530] sm:$0xff] }
  0x2f   :  { %1798 = vmatpush.bf16.msrb.mxu3 %v854_v31  ;;  %v114_v31 = vld [vmem:[%s6162_s0 + $0x330] sm:$0xff]  ;;  %v572_v41 = vmax.f32 %v180_v37, 0.0  ;;  %v76_v43 = vld [vmem:[%s6162_s0 + $0x200] sm:$0xff]  ;;  %v570_v2 = vmax.f32 %v178_v62, 0.0  ;;  %v3431_v62 = vld [vmem:[%s6163_s1 + $0x13c] sm:$0xf] }
  0x30   :  { %1847 = vmatpush.bf16.msrb.mxu0 %v870_v46  ;;  %1896 = vmatpush.bf16.msrb.mxu1 %v886_v47  ;;  %v506_v34 = vmax.f32 %v114_v31, 0.0  ;;  %v108_v45 = vld [vmem:[%s6162_s0 + $0x300] sm:$0xff]  ;;  %v468_v47 = vmax.f32 %v76_v43, 0.0  ;;  %v142_v4 = vld [vmem:[%s6162_s0 + $0x410] sm:$0xff] }
  0x31   :  { %v500_v50 = vmax.f32 %v108_v45, 0.0  ;;  %v144_v51 = vld [vmem:[%s6162_s0 + $0x420] sm:$0xff]  ;;  %v880_v54 = vpack.c.bf16 %v574_v42, %v572_v41  ;;  %v3066_v10 = vld [vmem:[%s6163_s1 + $0xd0] sm:$0xf]  ;;  %v3418_v14 = vld [vmem:[%s6163_s1 + $0xd4] sm:$0xf] }
  0x32   :  { %1750 = vmatpush.bf16.msrb.mxu2 %v836_v52  ;;  %v846_v46 = vpack.c.bf16 %v506_v34, %v504_v33  ;;  %v146_v52 = vld [vmem:[%s6162_s0 + $0x430] sm:$0xff]  ;;  %v536_v60 = vmax.f32 %v144_v51, 0.0  ;;  %v176_v61 = vld [vmem:[%s6162_s0 + $0x520] sm:$0xff]  ;;  %v828_v63 = vpack.c.bf16 %v470_v48, %v468_v47  ;;  %v534_v17 = vmax.f32 %v142_v4, 0.0 }
  0x33   :  { %1799 = vmatpush.bf16.msrb.mxu3 %v852_v53  ;;  %v864_v53 = vpack.c.bf16 %v542_v40, %v540_v36  ;;  %v538_v0 = vmax.f32 %v146_v52, 0.0  ;;  %v568_v1 = vmax.f32 %v176_v61, 0.0  ;;  %v140_v3 = vld [vmem:[%s6162_s0 + $0x400] sm:$0xff]  ;;  %v174_v27 = vld [vmem:[%s6162_s0 + $0x510] sm:$0xff]  ;;  %v3326_v52 = vld [vmem:[%s6163_s1 + $0x2d8] sm:$0xf] }
  0x34   :  { %1848 = vmatpush.bf16.msrb.mxu0 %v868_v7  ;;  %1897 = vmatpush.bf16.msrb.mxu1 %v884_v8  ;;  %v3470_v7 = vld [vmem:[%s6163_s1 + $0x274] sm:$0xf]  ;;  %v844_v8 = vpack.c.bf16 %v502_v55, %v500_v50  ;;  %v3424_v11 = vld [vmem:[%s6163_s1 + $0x100] sm:$0xf0]  ;;  %v532_v16 = vmax.f32 %v140_v3, 0.0  ;;  %v566_v30 = vmax.f32 %v174_v27, 0.0 }
  0x35   :  { %1682 = vmatmul.bf16.gmra.mxu2 %v3818_v18  ;;  %1662 = vmatmul.bf16.gmra.mxu0 %v3820_v19  ;;  %v862_v12 = vpack.c.bf16 %v538_v0, %v536_v60  ;;  %v878_v13 = vpack.c.bf16 %v570_v2, %v568_v1  ;;  %v172_v26 = vld [vmem:[%s6162_s0 + $0x500] sm:$0xff]  ;;  %v234_v33 = vld [vmem:[%s6162_s0 + $0x6f0] sm:$0xff]  ;;  %v3118_v55 = vld [vmem:[%s6163_s1 + $0x138] sm:$0xf] }
  0x36   :  { %1751 = vmatpush.bf16.msrb.mxu2 %v834_v5  ;;  %1731 = vmatmul.bf16.gmra.mxu3 %v3822_v20  ;;  %v3274_v5 = vld [vmem:[%s6163_s1 + $0x270] sm:$0xf]  ;;  %v860_v28 = vpack.c.bf16 %v534_v17, %v532_v16  ;;  %v564_v29 = vmax.f32 %v172_v26, 0.0  ;;  %v232_v32 = vld [vmem:[%s6162_s0 + $0x6e0] sm:$0xff]  ;;  %v626_v36 = vmax.f32 %v234_v33, 0.0 }
  0x37   :  { %1800 = vmatpush.bf16.msrb.mxu3 %v850_v6  ;;  %1711 = vmatmul.bf16.gmra.mxu1 %v3824_v21  ;;  %v3476_v6 = vld [vmem:[%s6163_s1 + $0x2a0] sm:$0xf0]  ;;  %v624_v35 = vmax.f32 %v232_v32, 0.0  ;;  %v266_v37 = vld [vmem:[%s6162_s0 + $0x7f0] sm:$0xff]  ;;  %v3437_v60 = vld [vmem:[%s6163_s1 + $0x168] sm:$0xf0] }
  0x38   :  { %1849 = vmatpush.bf16.msrb.mxu0 %v866_v22  ;;  %1898 = vmatpush.bf16.msrb.mxu1 %v882_v23  ;;  %v3908_v22 = vor.u32 %v3476_v6, %v3274_v5  ;;  %v3910_v23 = vor.u32 %v3424_v11, %v3066_v10  ;;  %v876_v31 = vpack.c.bf16 %v566_v30, %v564_v29  ;;  %v264_v34 = vld [vmem:[%s6162_s0 + $0x7e0] sm:$0xff]  ;;  %v298_v41 = vld [vmem:[%s6162_s0 + $0x8f0] sm:$0xff]  ;;  %v2970_v32 = vld [vmem:[%s6163_s1 + $0x8] sm:$0xf] }
  0x39   :  { %v656_v38 = vmax.f32 %v264_v34, 0.0  ;;  %v296_v40 = vld [vmem:[%s6162_s0 + $0x8e0] sm:$0xff]  ;;  %v906_v42 = vpack.c.bf16 %v626_v36, %v624_v35  ;;  %v690_v44 = vmax.f32 %v298_v41, 0.0  ;;  %v3328_v61 = vld [vmem:[%s6163_s1 + $0x30c] sm:$0xf0]  ;;  %v3976_v1 = vor.u32 %v3437_v60, %v3118_v55 }
  0x3a   :  { %1752 = vmatpush.bf16.msrb.mxu2 %v832_v24  ;;  %v3912_v24 = vor.u32 %v3470_v7, %v3276_v9  ;;  %v688_v43 = vmax.f32 %v296_v40, 0.0  ;;  %v328_v45 = vld [vmem:[%s6162_s0 + $0x9e0] sm:$0xff]  ;;  %v230_v5 = vld [vmem:[%s6162_s0 + $0x6d0] sm:$0xff]  ;;  %v3399_v33 = vld [vmem:[%s6163_s1 + $0x38] sm:$0xf0] }
  0x3b   :  { %1801 = vmatpush.bf16.msrb.mxu3 %v848_v25  ;;  %v3914_v25 = vor.u32 %v3418_v14, %v3068_v15  ;;  %v720_v48 = vmax.f32 %v328_v45, 0.0  ;;  %v228_v4 = vld [vmem:[%s6162_s0 + $0x6c0] sm:$0xff]  ;;  %v262_v9 = vld [vmem:[%s6162_s0 + $0x7d0] sm:$0xff]  ;;  %v3393_v34 = vld [vmem:[%s6163_s1 + $0xc] sm:$0xf]  ;;  %v4034_v40 = vor.u32 %v3399_v33, %v2970_v32 }
  0x3c   :  { %1850 = vmatpush.bf16.msrb.mxu0 %v864_v53  ;;  %1899 = vmatpush.bf16.msrb.mxu1 %v880_v54  ;;  %6238 = vst [vmem:[#allocation4_spill] sm:$0xff] %v3912_v24  ;;  %v938_v50 = vpack.c.bf16 %v690_v44, %v688_v43  ;;  %v3489_v53 = vld [vmem:[%s6163_s1 + $0x308] sm:$0xf0]  ;;  %v3483_v54 = vld [vmem:[%s6163_s1 + $0x2dc] sm:$0xf]  ;;  %v260_v6 = vld [vmem:[%s6162_s0 + $0x7c0] sm:$0xff] }
  0x3d   :  { %v3974_v0 = vor.u32 %v3489_v53, %v3326_v52  ;;  %v3978_v2 = vor.u32 %v3483_v54, %v3328_v61  ;;  %v620_v7 = vmax.f32 %v228_v4, 0.0  ;;  %v652_v10 = vmax.f32 %v260_v6, 0.0  ;;  %v324_v17 = vld [vmem:[%s6162_s0 + $0x9c0] sm:$0xff]  ;;  %v326_v26 = vld [vmem:[%s6162_s0 + $0x9d0] sm:$0xff] }
  0x3e   :  { %1753 = vmatpush.bf16.msrb.mxu2 %v830_v39  ;;  %v658_v39 = vmax.f32 %v266_v37, 0.0  ;;  %v654_v11 = vmax.f32 %v262_v9, 0.0  ;;  %v718_v29 = vmax.f32 %v326_v26, 0.0  ;;  %v2978_v35 = vld [vmem:[%s6163_s1 + $0x10] sm:$0xf]  ;;  %v224_v44 = vld [vmem:[%s6162_s0 + $0x6a0] sm:$0xff] }
  0x3f   :  { %1802 = vmatpush.bf16.msrb.mxu3 %v846_v46  ;;  %v330_v46 = vld [vmem:[%s6162_s0 + $0x9f0] sm:$0xff]  ;;  %6239 = vst [vmem:[#allocation5_spill] sm:$0xff] %v3978_v2  ;;  %v3400_v36 = vld [vmem:[%s6163_s1 + $0x40] sm:$0xf0]  ;;  %v2972_v37 = vld [vmem:[%s6163_s1 + $0x3c] sm:$0xf0] }
  0x40   :  { %1851 = vmatpush.bf16.msrb.mxu0 %v862_v12  ;;  %1900 = vmatpush.bf16.msrb.mxu1 %v878_v13  ;;  %v922_v47 = vpack.c.bf16 %v658_v39, %v656_v38  ;;  %v722_v49 = vmax.f32 %v330_v46, 0.0  ;;  %v292_v12 = vld [vmem:[%s6162_s0 + $0x8c0] sm:$0xff]  ;;  %v294_v13 = vld [vmem:[%s6162_s0 + $0x8d0] sm:$0xff]  ;;  %v920_v27 = vpack.c.bf16 %v654_v11, %v652_v10  ;;  %v2980_v39 = vld [vmem:[%s6163_s1 + $0x44] sm:$0xf0]  ;;  %v4036_v41 = vor.u32 %v3400_v36, %v2978_v35 }
  0x41   :  { %v684_v15 = vmax.f32 %v292_v12, 0.0  ;;  %v686_v16 = vmax.f32 %v294_v13, 0.0  ;;  %v3394_v38 = vld [vmem:[%s6163_s1 + $0x14] sm:$0xf]  ;;  %v256_v46 = vld [vmem:[%s6162_s0 + $0x7a0] sm:$0xff] }
  0x42   :  { %1754 = vmatpush.bf16.msrb.mxu2 %v828_v63  ;;  %v954_v51 = vpack.c.bf16 %v722_v49, %v720_v48  ;;  %v3120_v63 = vld [vmem:[%s6163_s1 + $0x16c] sm:$0xf0]  ;;  %v4040_v43 = vor.u32 %v3394_v38, %v2980_v39  ;;  %v288_v52 = vld [vmem:[%s6162_s0 + $0x8a0] sm:$0xff]  ;;  %v3406_v10 = vld [vmem:[%s6163_s1 + $0x74] sm:$0xf] }
  0x43   :  { %1803 = vmatpush.bf16.msrb.mxu3 %v844_v8  ;;  %v3980_v3 = vor.u32 %v3431_v62, %v3120_v63  ;;  %v622_v8 = vmax.f32 %v230_v5, 0.0  ;;  %v936_v30 = vpack.c.bf16 %v686_v16, %v684_v15  ;;  %v226_v45 = vld [vmem:[%s6162_s0 + $0x6b0] sm:$0xff]  ;;  %v680_v55 = vmax.f32 %v288_v52, 0.0  ;;  %v320_v61 = vld [vmem:[%s6162_s0 + $0x9a0] sm:$0xff]  ;;  %v3030_v11 = vld [vmem:[%s6163_s1 + $0x78] sm:$0xf] }
  0x44   :  { %1852 = vmatpush.bf16.msrb.mxu0 %v860_v28  ;;  %1901 = vmatpush.bf16.msrb.mxu1 %v876_v31  ;;  %v716_v28 = vmax.f32 %v324_v17, 0.0  ;;  %6240 = vst [vmem:[#allocation6_spill] sm:$0xff] %v4040_v43  ;;  %v618_v48 = vmax.f32 %v226_v45, 0.0  ;;  %v258_v49 = vld [vmem:[%s6162_s0 + $0x7b0] sm:$0xff]  ;;  %v712_v4 = vmax.f32 %v320_v61, 0.0  ;;  %v284_v36 = vld [vmem:[%s6162_s0 + $0x880] sm:$0xff] }
  0x45   :  { %1687 = vmatmul.bf16.gmra.mxu2 %v3908_v22  ;;  %1667 = vmatmul.bf16.gmra.mxu0 %v3910_v23  ;;  %v904_v14 = vpack.c.bf16 %v622_v8, %v620_v7  ;;  %v290_v53 = vld [vmem:[%s6162_s0 + $0x8b0] sm:$0xff]  ;;  %v3412_v9 = vld [vmem:[%s6163_s1 + $0xa0] sm:$0xf0]  ;;  %v3413_v12 = vld [vmem:[%s6163_s1 + $0xa8] sm:$0xf0]  ;;  %v676_v39 = vmax.f32 %v284_v36, 0.0 }
  0x46   :  { %1736 = vmatmul.bf16.gmra.mxu3 %v3912_v24  ;;  %1943 = vmatpush.bf16.msra.mxu2 %v906_v42  ;;  %v952_v31 = vpack.c.bf16 %v718_v29, %v716_v28  ;;  %v4038_v42 = vor.u32 %v3393_v34, %v2972_v37  ;;  %v682_v60 = vmax.f32 %v290_v53, 0.0  ;;  %v322_v62 = vld [vmem:[%s6162_s0 + $0x9b0] sm:$0xff]  ;;  %v3024_v13 = vld [vmem:[%s6163_s1 + $0xa4] sm:$0xf0]  ;;  %v4096_v17 = vor.u32 %v3413_v12, %v3030_v11  ;;  %v220_v28 = vld [vmem:[%s6162_s0 + $0x680] sm:$0xff] }
  0x47   :  { %1716 = vmatmul.bf16.gmra.mxu1 %v3914_v25  ;;  %1992 = vmatpush.bf16.msra.mxu3 %v922_v47  ;;  %v616_v47 = vmax.f32 %v224_v44, 0.0  ;;  %v714_v5 = vmax.f32 %v322_v62, 0.0  ;;  %v3022_v8 = vld [vmem:[%s6163_s1 + $0x70] sm:$0xf]  ;;  %v4098_v26 = vor.u32 %v3406_v10, %v3024_v13  ;;  %v316_v45 = vld [vmem:[%s6162_s0 + $0x980] sm:$0xff] }
  0x48   :  { %2041 = vmatpush.bf16.msra.mxu0 %v938_v50  ;;  %2090 = vmatpush.bf16.msra.mxu1 %v954_v51  ;;  %v648_v50 = vmax.f32 %v256_v46, 0.0  ;;  %v650_v51 = vmax.f32 %v258_v49, 0.0  ;;  %v934_v6 = vpack.c.bf16 %v682_v60, %v680_v55  ;;  %v3032_v15 = vld [vmem:[%s6163_s1 + $0xac] sm:$0xf0]  ;;  %v4094_v16 = vor.u32 %v3412_v9, %v3022_v8  ;;  %v3074_v52 = vld [vmem:[%s6163_s1 + $0xd8] sm:$0xf] }
  0x49   :  { %v902_v54 = vpack.c.bf16 %v618_v48, %v616_v47  ;;  %v950_v7 = vpack.c.bf16 %v714_v5, %v712_v4  ;;  %v222_v29 = vld [vmem:[%s6162_s0 + $0x690] sm:$0xff]  ;;  %v708_v48 = vmax.f32 %v316_v45, 0.0  ;;  %v3425_v53 = vld [vmem:[%s6163_s1 + $0x108] sm:$0xf0]  ;;  %v3082_v55 = vld [vmem:[%s6163_s1 + $0xe0] sm:$0xf] }
  0x4a   :  { %1944 = vmatpush.bf16.msra.mxu2 %v904_v14  ;;  %v918_v63 = vpack.c.bf16 %v650_v51, %v648_v50  ;;  %v3407_v14 = vld [vmem:[%s6163_s1 + $0x7c] sm:$0xf]  ;;  %v614_v32 = vmax.f32 %v222_v29, 0.0  ;;  %v254_v33 = vld [vmem:[%s6162_s0 + $0x790] sm:$0xff]  ;;  %v3420_v62 = vld [vmem:[%s6163_s1 + $0xe4] sm:$0xf]  ;;  %v4154_v4 = vor.u32 %v3425_v53, %v3074_v52 }
  0x4b   :  { %1993 = vmatpush.bf16.msra.mxu3 %v920_v27  ;;  %v4100_v27 = vor.u32 %v3407_v14, %v3032_v15  ;;  %v646_v35 = vmax.f32 %v254_v33, 0.0  ;;  %v286_v37 = vld [vmem:[%s6162_s0 + $0x890] sm:$0xff]  ;;  %v216_v8 = vld [vmem:[%s6162_s0 + $0x660] sm:$0xff] }
  0x4c   :  { %2042 = vmatpush.bf16.msra.mxu0 %v936_v30  ;;  %2091 = vmatpush.bf16.msra.mxu1 %v952_v31  ;;  %v252_v30 = vld [vmem:[%s6162_s0 + $0x780] sm:$0xff]  ;;  %v612_v31 = vmax.f32 %v220_v28, 0.0  ;;  %v678_v44 = vmax.f32 %v286_v37, 0.0  ;;  %v318_v46 = vld [vmem:[%s6162_s0 + $0x990] sm:$0xff]  ;;  %v608_v11 = vmax.f32 %v216_v8, 0.0 }
  0x4d   :  { %6241 = vst [vmem:[#allocation7_spill] sm:$0xff] %v4100_v27  ;;  %v644_v34 = vmax.f32 %v252_v30, 0.0  ;;  %v710_v49 = vmax.f32 %v318_v46, 0.0  ;;  %v3426_v60 = vld [vmem:[%s6163_s1 + $0x110] sm:$0xf0]  ;;  %v248_v10 = vld [vmem:[%s6162_s0 + $0x760] sm:$0xff] }
  0x4e   :  { %1945 = vmatpush.bf16.msra.mxu2 %v902_v54  ;;  %v900_v38 = vpack.c.bf16 %v614_v32, %v612_v31  ;;  %v932_v50 = vpack.c.bf16 %v678_v44, %v676_v39  ;;  %v3419_v54 = vld [vmem:[%s6163_s1 + $0xdc] sm:$0xf]  ;;  %v3076_v61 = vld [vmem:[%s6163_s1 + $0x10c] sm:$0xf0]  ;;  %v4156_v5 = vor.u32 %v3426_v60, %v3082_v55  ;;  %v640_v14 = vmax.f32 %v248_v10, 0.0  ;;  %v280_v30 = vld [vmem:[%s6162_s0 + $0x860] sm:$0xff] }
  0x4f   :  { %1994 = vmatpush.bf16.msra.mxu3 %v918_v63  ;;  %v916_v47 = vpack.c.bf16 %v646_v35, %v644_v34  ;;  %v948_v51 = vpack.c.bf16 %v710_v49, %v708_v48  ;;  %v3084_v63 = vld [vmem:[%s6163_s1 + $0x114] sm:$0xf0]  ;;  %v218_v9 = vld [vmem:[%s6162_s0 + $0x670] sm:$0xff]  ;;  %v3126_v32 = vld [vmem:[%s6163_s1 + $0x140] sm:$0xf]  ;;  %v672_v34 = vmax.f32 %v280_v30, 0.0 }
  0x50   :  { %2043 = vmatpush.bf16.msra.mxu0 %v934_v6  ;;  %2092 = vmatpush.bf16.msra.mxu1 %v950_v7  ;;  %v4158_v6 = vor.u32 %v3419_v54, %v3076_v61  ;;  %v4160_v7 = vor.u32 %v3420_v62, %v3084_v63  ;;  %v610_v12 = vmax.f32 %v218_v9, 0.0  ;;  %v250_v13 = vld [vmem:[%s6162_s0 + $0x770] sm:$0xff]  ;;  %v3432_v36 = vld [vmem:[%s6163_s1 + $0x144] sm:$0xf]  ;;  %v3134_v37 = vld [vmem:[%s6163_s1 + $0x148] sm:$0xf] }
  0x51   :  { %v642_v15 = vmax.f32 %v250_v13, 0.0  ;;  %v282_v31 = vld [vmem:[%s6162_s0 + $0x870] sm:$0xff]  ;;  %v3128_v39 = vld [vmem:[%s6163_s1 + $0x174] sm:$0xf0]  ;;  %v3433_v44 = vld [vmem:[%s6163_s1 + $0x14c] sm:$0xf] }
  0x52   :  { %1946 = vmatpush.bf16.msra.mxu2 %v900_v38  ;;  %6242 = vst [vmem:[#allocation8_spill] sm:$0xff] %v4160_v7  ;;  %v898_v28 = vpack.c.bf16 %v610_v12, %v608_v11  ;;  %v3438_v33 = vld [vmem:[%s6163_s1 + $0x170] sm:$0xf0]  ;;  %v674_v35 = vmax.f32 %v282_v31, 0.0  ;;  %v3439_v38 = vld [vmem:[%s6163_s1 + $0x178] sm:$0xf0]  ;;  %v4212_v49 = vor.u32 %v3432_v36, %v3128_v39 }
  0x53   :  { %1995 = vmatpush.bf16.msra.mxu3 %v916_v47  ;;  %v914_v29 = vpack.c.bf16 %v642_v15, %v640_v14  ;;  %v3136_v45 = vld [vmem:[%s6163_s1 + $0x17c] sm:$0xf0]  ;;  %v4208_v47 = vor.u32 %v3438_v33, %v3126_v32  ;;  %v4210_v48 = vor.u32 %v3439_v38, %v3134_v37  ;;  %v314_v52 = vld [vmem:[%s6162_s0 + $0x970] sm:$0xff]  ;;  %v3445_v32 = vld [vmem:[%s6163_s1 + $0x1ac] sm:$0xf] }
  0x54   :  { %2044 = vmatpush.bf16.msra.mxu0 %v932_v50  ;;  %2093 = vmatpush.bf16.msra.mxu1 %v948_v51  ;;  %v930_v46 = vpack.c.bf16 %v674_v35, %v672_v34  ;;  %v4214_v50 = vor.u32 %v3433_v44, %v3136_v45  ;;  %v312_v51 = vld [vmem:[%s6162_s0 + $0x960] sm:$0xff]  ;;  %v706_v54 = vmax.f32 %v314_v52, 0.0  ;;  %v214_v61 = vld [vmem:[%s6162_s0 + $0x650] sm:$0xff]  ;;  %v3188_v37 = vld [vmem:[%s6163_s1 + $0x1e4] sm:$0xf0] }
  0x55   :  { %1692 = vmatmul.bf16.gmra.mxu2 %v3974_v0  ;;  %1672 = vmatmul.bf16.gmra.mxu0 %v3976_v1  ;;  %6243 = vst [vmem:[#allocation9_spill] sm:$0xff] %v4208_v47  ;;  %v704_v53 = vmax.f32 %v312_v51, 0.0  ;;  %v212_v60 = vld [vmem:[%s6162_s0 + $0x640] sm:$0xff]  ;;  %v606_v8 = vmax.f32 %v214_v61, 0.0  ;;  %v246_v9 = vld [vmem:[%s6162_s0 + $0x750] sm:$0xff] }
  0x56   :  { %1741 = vmatmul.bf16.gmra.mxu3 %v3978_v2  ;;  %1947 = vmatpush.bf16.msra.mxu2 %v898_v28  ;;  %6244 = vst [vmem:[#allocation10_spill] sm:$0xff] %v4210_v48  ;;  %v244_v62 = vld [vmem:[%s6162_s0 + $0x740] sm:$0xff]  ;;  %v604_v63 = vmax.f32 %v212_v60, 0.0  ;;  %v638_v11 = vmax.f32 %v246_v9, 0.0  ;;  %v278_v15 = vld [vmem:[%s6162_s0 + $0x850] sm:$0xff] }
  0x57   :  { %1721 = vmatmul.bf16.gmra.mxu1 %v3980_v3  ;;  %1996 = vmatpush.bf16.msra.mxu3 %v914_v29  ;;  %6245 = vst [vmem:[#allocation11_spill] sm:$0xff] %v4214_v50  ;;  %v946_v55 = vpack.c.bf16 %v706_v54, %v704_v53  ;;  %v636_v10 = vmax.f32 %v244_v62, 0.0  ;;  %v276_v14 = vld [vmem:[%s6162_s0 + $0x840] sm:$0xff]  ;;  %v3178_v28 = vld [vmem:[%s6163_s1 + $0x1a8] sm:$0xf]  ;;  %v670_v31 = vmax.f32 %v278_v15, 0.0 }
  0x58   :  { %2045 = vmatpush.bf16.msra.mxu0 %v930_v46  ;;  %v896_v12 = vpack.c.bf16 %v606_v8, %v604_v63  ;;  %v3451_v29 = vld [vmem:[%s6163_s1 + $0x1d8] sm:$0xf0]  ;;  %v668_v30 = vmax.f32 %v276_v14, 0.0  ;;  %v3186_v33 = vld [vmem:[%s6163_s1 + $0x1b0] sm:$0xf]  ;;  %v308_v52 = vld [vmem:[%s6162_s0 + $0x940] sm:$0xff] }
  0x59   :  { %2094 = vmatpush.bf16.msra.mxu1 %v946_v55  ;;  %v912_v13 = vpack.c.bf16 %v638_v11, %v636_v10  ;;  %v3452_v34 = vld [vmem:[%s6163_s1 + $0x1e0] sm:$0xf0]  ;;  %v3180_v35 = vld [vmem:[%s6163_s1 + $0x1dc] sm:$0xf0]  ;;  %v3446_v36 = vld [vmem:[%s6163_s1 + $0x1b4] sm:$0xf]  ;;  %v4268_v39 = vor.u32 %v3451_v29, %v3178_v28 }
  0x5a   :  { %1948 = vmatpush.bf16.msra.mxu2 %v896_v12  ;;  %v928_v38 = vpack.c.bf16 %v670_v31, %v668_v30  ;;  %v4270_v44 = vor.u32 %v3452_v34, %v3186_v33  ;;  %v4272_v46 = vor.u32 %v3445_v32, %v3180_v35  ;;  %v4274_v51 = vor.u32 %v3446_v36, %v3188_v37  ;;  %v310_v53 = vld [vmem:[%s6162_s0 + $0x950] sm:$0xff]  ;;  %v208_v63 = vld [vmem:[%s6162_s0 + $0x620] sm:$0xff] }
  0x5b   :  { %1997 = vmatpush.bf16.msra.mxu3 %v912_v13  ;;  %6246 = vst [vmem:[#allocation12_spill] sm:$0xff] %v4268_v39  ;;  %v700_v55 = vmax.f32 %v308_v52, 0.0  ;;  %v702_v60 = vmax.f32 %v310_v53, 0.0  ;;  %v210_v8 = vld [vmem:[%s6162_s0 + $0x630] sm:$0xff]  ;;  %v240_v9 = vld [vmem:[%s6162_s0 + $0x720] sm:$0xff]  ;;  %v600_v10 = vmax.f32 %v208_v63, 0.0 }
  0x5c   :  { %6247 = vst [vmem:[#allocation13_spill] sm:$0xff] %v4270_v44  ;;  %2046 = vmatpush.bf16.msra.mxu0 %v928_v38  ;;  %v602_v11 = vmax.f32 %v210_v8, 0.0  ;;  %v242_v12 = vld [vmem:[%s6162_s0 + $0x730] sm:$0xff]  ;;  %v632_v13 = vmax.f32 %v240_v9, 0.0  ;;  %v272_v35 = vld [vmem:[%s6162_s0 + $0x820] sm:$0xff] }
  0x5d   :  { %6248 = vst [vmem:[#allocation14_spill] sm:$0xff] %v4272_v46  ;;  %v944_v62 = vpack.c.bf16 %v702_v60, %v700_v55  ;;  %v634_v15 = vmax.f32 %v242_v12, 0.0  ;;  %v274_v36 = vld [vmem:[%s6162_s0 + $0x830] sm:$0xff]  ;;  %v3464_v38 = vld [vmem:[%s6163_s1 + $0x240] sm:$0xf0] }
  0x5e   :  { %6249 = vst [vmem:[#allocation15_spill] sm:$0xff] %v4274_v51  ;;  %v894_v29 = vpack.c.bf16 %v602_v11, %v600_v10  ;;  %v3230_v37 = vld [vmem:[%s6163_s1 + $0x210] sm:$0xf]  ;;  %v666_v52 = vmax.f32 %v274_v36, 0.0  ;;  %v3458_v53 = vld [vmem:[%s6163_s1 + $0x214] sm:$0xf] }
  0x5f   :  { %2095 = vmatpush.bf16.msra.mxu1 %v944_v62  ;;  %v910_v32 = vpack.c.bf16 %v634_v15, %v632_v13  ;;  %v3465_v55 = vld [vmem:[%s6163_s1 + $0x248] sm:$0xf0]  ;;  %v3232_v60 = vld [vmem:[%s6163_s1 + $0x244] sm:$0xf0]  ;;  %v3459_v62 = vld [vmem:[%s6163_s1 + $0x21c] sm:$0xf]  ;;  %v4334_v11 = vor.u32 %v3464_v38, %v3230_v37 }
  0x60   :  { %1949 = vmatpush.bf16.msra.mxu2 %v894_v29  ;;  %v3240_v63 = vld [vmem:[%s6163_s1 + $0x24c] sm:$0xf0]  ;;  %v4340_v15 = vor.u32 %v3458_v53, %v3232_v60  ;;  %v304_v29 = vld [vmem:[%s6162_s0 + $0x920] sm:$0xff] }
  0x61   :  { %1998 = vmatpush.bf16.msra.mxu3 %v910_v32  ;;  %6250 = vst [vmem:[#allocation16_spill] sm:$0xff] %v4334_v11  ;;  %v204_v38 = vld [vmem:[%s6162_s0 + $0x600] sm:$0xff] }
  0x62   :  { %6252 = vst [vmem:[#allocation18_spill] sm:$0xff] %v4340_v15  ;;  %v596_v53 = vmax.f32 %v204_v38, 0.0  ;;  %v3477_v38 = vld [vmem:[%s6163_s1 + $0x2a8] sm:$0xf0] }
  0x65   :  { %1755 = vmatmul.bf16.vlgmr.msrb.gmra.mxu2 %v4034_v40  ;;  %1853 = vmatmul.bf16.vlgmr.msrb.gmra.mxu0 %v4036_v41 }
  0x66   :  { %1804 = vmatmul.bf16.vlgmr.msrb.gmra.mxu3 %v4038_v42 }
  0x67   :  { %1902 = vmatmul.bf16.vlgmr.msrb.gmra.mxu1 %v4040_v43 }
  0x75   :  { %1760 = vmatmul.bf16.gmra.mxu2 %v4094_v16  ;;  %1858 = vmatmul.bf16.gmra.mxu0 %v4096_v17 }
  0x76   :  { %1809 = vmatmul.bf16.gmra.mxu3 %v4098_v26 }
  0x77   :  { %1907 = vmatmul.bf16.gmra.mxu1 %v4100_v27 }
  0x85   :  { %1765 = vmatmul.bf16.gmra.mxu2 %v4154_v4  ;;  %1863 = vmatmul.bf16.gmra.mxu0 %v4156_v5 }
  0x86   :  { %1814 = vmatmul.bf16.gmra.mxu3 %v4158_v6 }
  0x87   :  { %1912 = vmatmul.bf16.gmra.mxu1 %v4160_v7 }
  0x95   :  { %1770 = vmatmul.bf16.gmra.mxu2 %v4208_v47  ;;  %1868 = vmatmul.bf16.gmra.mxu0 %v4210_v48 }
  0x96   :  { %1819 = vmatmul.bf16.gmra.mxu3 %v4212_v49 }
  0x97   :  { %1917 = vmatmul.bf16.gmra.mxu1 %v4214_v50  ;;  %v300_v50 = vld [vmem:[%s6162_s0 + $0x900] sm:$0xff] }
  0xa2   :  { %v1658_v45 = vpop.f32.mrf.mxu0 }
  0xa4   :  { %v1707_v54 = vpop.f32.mrf.mxu1 }
  0xa5   :  { %v4282_v61 = vadd.f32 %v1707_v54, %v1658_v45  ;;  %1775 = vmatmul.bf16.gmra.mxu2 %v4268_v39  ;;  %1873 = vmatmul.bf16.gmra.mxu0 %v4270_v44  ;;  %v664_v45 = vmax.f32 %v272_v35, 0.0  ;;  %v3238_v54 = vld [vmem:[%s6163_s1 + $0x218] sm:$0xf]  ;;  %v3038_v44 = vld [vmem:[%s6163_s1 + $0x80] sm:$0xf] }
  0xa6   :  { %1824 = vmatmul.bf16.gmra.mxu3 %v4272_v46  ;;  %v4336_v12 = vor.u32 %v3465_v55, %v3238_v54  ;;  %v238_v55 = vld [vmem:[%s6162_s0 + $0x710] sm:$0xff] }
  0xa7   :  { %1922 = vmatmul.bf16.gmra.mxu1 %v4274_v51  ;;  %v926_v8 = vpack.c.bf16 %v666_v52, %v664_v45  ;;  %v206_v45 = vld [vmem:[%s6162_s0 + $0x610] sm:$0xff]  ;;  %v236_v52 = vld [vmem:[%s6162_s0 + $0x700] sm:$0xff] }
  0xa8   :  { %v1678_v14 = vpop.f32.mrf.mxu2  ;;  %6251 = vst [vmem:[#allocation17_spill] sm:$0xff] %v4336_v12  ;;  %v598_v54 = vmax.f32 %v206_v45, 0.0  ;;  %v628_v60 = vmax.f32 %v236_v52, 0.0 }
  0xa9   :  { %v1727_v28 = vpop.f32.mrf.mxu3  ;;  %2047 = vmatpush.bf16.msra.mxu0 %v926_v8 }
  0xaa   :  { %v4300_v30 = vadd.f32 %v1727_v28, %v1678_v14  ;;  %v1660_v31 = vpop.f32.mrf.mxu0  ;;  %v4342_v28 = vor.u32 %v3459_v62, %v3240_v63  ;;  %v630_v63 = vmax.f32 %v238_v55, 0.0  ;;  %v3478_v55 = vld [vmem:[%s6163_s1 + $0x2b0] sm:$0xf0] }
  0xac   :  { %v1709_v33 = vpop.f32.mrf.mxu1  ;;  %6253 = vst [vmem:[#allocation19_spill] sm:$0xff] %v4342_v28 }
  0xad   :  { %v4302_v34 = vadd.f32 %v1709_v33, %v1660_v31  ;;  %v306_v31 = vld [vmem:[%s6162_s0 + $0x930] sm:$0xff]  ;;  %v696_v33 = vmax.f32 %v304_v29, 0.0  ;;  %v908_v29 = vpack.c.bf16 %v630_v63, %v628_v60  ;;  %v3292_v63 = vld [vmem:[%s6163_s1 + $0x2b4] sm:$0xf0] }
  0xae   :  { %v698_v35 = vmax.f32 %v306_v31, 0.0  ;;  %v3284_v60 = vld [vmem:[%s6163_s1 + $0x2ac] sm:$0xf0] }
  0xaf   :  { %1999 = vmatpush.bf16.msra.mxu3 %v908_v29 }
  0xb0   :  { %v1680_v9 = vpop.f32.mrf.mxu2  ;;  %v942_v37 = vpack.c.bf16 %v698_v35, %v696_v33  ;;  %v268_v33 = vld [vmem:[%s6162_s0 + $0x800] sm:$0xff]  ;;  %v270_v35 = vld [vmem:[%s6162_s0 + $0x810] sm:$0xff] }
  0xb1   :  { %v1729_v10 = vpop.f32.mrf.mxu3  ;;  %v660_v45 = vmax.f32 %v268_v33, 0.0  ;;  %v662_v52 = vmax.f32 %v270_v35, 0.0 }
  0xb2   :  { %v4338_v13 = vadd.f32 %v1729_v10, %v1680_v9  ;;  %v1663_v14 = vpop.f32.mrf.mxu0  ;;  %2096 = vmatpush.bf16.msra.mxu1 %v942_v37  ;;  %v892_v9 = vpack.c.bf16 %v598_v54, %v596_v53  ;;  %v3282_v37 = vld [vmem:[%s6163_s1 + $0x278] sm:$0xf]  ;;  %v3471_v53 = vld [vmem:[%s6163_s1 + $0x27c] sm:$0xf]  ;;  %v3290_v54 = vld [vmem:[%s6163_s1 + $0x280] sm:$0xf] }
  0xb3   :  { %v4402_v29 = vor.u32 %v3477_v38, %v3282_v37  ;;  %v692_v38 = vmax.f32 %v300_v50, 0.0  ;;  %v362_v50 = vld [vmem:[%s6162_s0 + $0xaf0] sm:$0xff] }
  0xb4   :  { %v1712_v32 = vpop.f32.mrf.mxu1  ;;  %1950 = vmatpush.bf16.msra.mxu2 %v892_v9 }
  0xb5   :  { %v4350_v36 = vadd.f32 %v1712_v32, %v1663_v14  ;;  %1780 = vmatmul.bf16.gmra.mxu2 %v4334_v11  ;;  %1878 = vmatmul.bf16.gmra.mxu0 %v4336_v12  ;;  %6254 = vst [vmem:[#allocation20_spill] sm:$0xff] %v4402_v29  ;;  %v37_v12 = vld [vmem:[%s6162_s0 + $0xc8] sm:$0xff] }
  0xb6   :  { %1829 = vmatmul.bf16.gmra.mxu3 %v4340_v15 }
  0xb7   :  { %1927 = vmatmul.bf16.gmra.mxu1 %v4342_v28  ;;  %v4408_v28 = vor.u32 %v3471_v53, %v3284_v60  ;;  %v392_v60 = vld [vmem:[%s6162_s0 + $0xbe0] sm:$0xff] }
  0xb8   :  { %v1683_v62 = vpop.f32.mrf.mxu2 }
  0xb9   :  { %v1732_v8 = vpop.f32.mrf.mxu3  ;;  %6256 = vst [vmem:[#allocation22_spill] sm:$0xff] %v4408_v28 }
  0xba   :  { %v4368_v10 = vadd.f32 %v1732_v8, %v1683_v62  ;;  %v1665_v14 = vpop.f32.mrf.mxu0  ;;  %v3472_v62 = vld [vmem:[%s6163_s1 + $0x284] sm:$0xf]  ;;  %v924_v8 = vpack.c.bf16 %v662_v52, %v660_v45  ;;  %v302_v45 = vld [vmem:[%s6162_s0 + $0x910] sm:$0xff] }
  0xbb   :  { %v4410_v51 = vor.u32 %v3472_v62, %v3292_v63  ;;  %v694_v52 = vmax.f32 %v302_v45, 0.0  ;;  %v754_v63 = vmax.f32 %v362_v50, 0.0  ;;  %v3484_v50 = vld [vmem:[%s6163_s1 + $0x2e4] sm:$0xf] }
  0xbc   :  { %v1714_v31 = vpop.f32.mrf.mxu1  ;;  %2048 = vmatpush.bf16.msra.mxu0 %v924_v8  ;;  %v394_v8 = vld [vmem:[%s6162_s0 + $0xbf0] sm:$0xff] }
  0xbd   :  { %v4370_v32 = vadd.f32 %v1714_v31, %v1665_v14  ;;  %v4404_v31 = vor.u32 %v3478_v55, %v3290_v54  ;;  %6257 = vst [vmem:[#allocation23_spill] sm:$0xff] %v4410_v51  ;;  %v940_v53 = vpack.c.bf16 %v694_v52, %v692_v38  ;;  %v360_v55 = vld [vmem:[%s6162_s0 + $0xae0] sm:$0xff] }
  0xbe   :  { %v752_v62 = vmax.f32 %v360_v55, 0.0  ;;  %v3490_v55 = vld [vmem:[%s6163_s1 + $0x310] sm:$0xf0] }
  0xbf   :  { %6255 = vst [vmem:[#allocation21_spill] sm:$0xff] %v4404_v31  ;;  %2097 = vmatpush.bf16.msra.mxu1 %v940_v53  ;;  %v3334_v53 = vld [vmem:[%s6163_s1 + $0x2e0] sm:$0xf] }
  0xc0   :  { %v1685_v9 = vpop.f32.mrf.mxu2  ;;  %v4470_v43 = vor.u32 %v3490_v55, %v3334_v53  ;;  %v41_v53 = vld [vmem:[%s6162_s0 + $0xe8] sm:$0xff]  ;;  %v43_v55 = vld [vmem:[%s6162_s0 + $0xf8] sm:$0xff] }
  0xc1   :  { %v1734_v14 = vpop.f32.mrf.mxu3 }
  0xc2   :  { %v4406_v33 = vadd.f32 %v1734_v14, %v1685_v9  ;;  %v1668_v35 = vpop.f32.mrf.mxu0  ;;  %v784_v9 = vmax.f32 %v392_v60, 0.0  ;;  %v400_v60 = vld [vmem:[%s6162_s0 + $0xc20] sm:$0xff]  ;;  %6258 = vst [vmem:[#allocation24_spill] sm:$0xff] %v4470_v43 }
  0xc4   :  { %v1717_v37 = vpop.f32.mrf.mxu1 }
  0xc5   :  { %v4418_v54 = vadd.f32 %v1717_v37, %v1668_v35  ;;  %1785 = vmatmul.bf16.gmra.mxu2 %v4402_v29  ;;  %1883 = vmatmul.bf16.gmra.mxu0 %v4404_v31  ;;  %v786_v35 = vmax.f32 %v394_v8, 0.0  ;;  %v970_v37 = vpack.c.bf16 %v754_v63, %v752_v62  ;;  %v3342_v62 = vld [vmem:[%s6163_s1 + $0x2e8] sm:$0xf]  ;;  %v792_v63 = vmax.f32 %v400_v60, 0.0 }
  0xc6   :  { %1834 = vmatmul.bf16.gmra.mxu3 %v4408_v28 }
  0xc7   :  { %1932 = vmatmul.bf16.gmra.mxu1 %v4410_v51  ;;  %v986_v51 = vpack.c.bf16 %v786_v35, %v784_v9  ;;  %2139 = vmatpush.bf16.msrb.mxu2 %v970_v37  ;;  %v3336_v9 = vld [vmem:[%s6163_s1 + $0x314] sm:$0xf0]  ;;  %v3344_v35 = vld [vmem:[%s6163_s1 + $0x31c] sm:$0xf0] }
  0xc8   :  { %v1688_v14 = vpop.f32.mrf.mxu2  ;;  %v4476_v31 = vor.u32 %v3484_v50, %v3336_v9  ;;  %v433_v50 = vmax.f32 %v41_v53, 0.0  ;;  %v388_v9 = vld [vmem:[%s6162_s0 + $0xbc0] sm:$0xff] }
  0xc9   :  { %v1737_v45 = vpop.f32.mrf.mxu3  ;;  %2188 = vmatpush.bf16.msrb.mxu3 %v986_v51  ;;  %v3491_v51 = vld [vmem:[%s6163_s1 + $0x318] sm:$0xf0] }
  0xca   :  { %v4436_v38 = vadd.f32 %v1737_v45, %v1688_v14  ;;  %v1670_v52 = vpop.f32.mrf.mxu0  ;;  %v3485_v14 = vld [vmem:[%s6163_s1 + $0x2ec] sm:$0xf]  ;;  %v4472_v2 = vor.u32 %v3491_v51, %v3342_v62  ;;  %6260 = vst [vmem:[#allocation26_spill] sm:$0xff] %v4476_v31  ;;  %v435_v62 = vmax.f32 %v43_v55, 0.0  ;;  %v358_v51 = vld [vmem:[%s6162_s0 + $0xad0] sm:$0xff] }
  0xcb   :  { %v4478_v29 = vor.u32 %v3485_v14, %v3344_v35  ;;  %v390_v14 = vld [vmem:[%s6162_s0 + $0xbd0] sm:$0xff] }
  0xcc   :  { %v1719_v7 = vpop.f32.mrf.mxu1  ;;  %6259 = vst [vmem:[#allocation25_spill] sm:$0xff] %v4472_v2 }
  0xcd   :  { %v4438_v27 = vadd.f32 %v1719_v7, %v1670_v52  ;;  %v402_v7 = vld [vmem:[%s6162_s0 + $0xc30] sm:$0xff]  ;;  %6261 = vst [vmem:[#allocation27_spill] sm:$0xff] %v4478_v29 }
  0xce   :  { %v794_v8 = vmax.f32 %v402_v7, 0.0 }
  0xd0   :  { %v1690_v45 = vpop.f32.mrf.mxu2  ;;  %v990_v37 = vpack.c.bf16 %v794_v8, %v792_v63  ;;  %v750_v8 = vmax.f32 %v358_v51, 0.0 }
  0xd1   :  { %v1739_v52 = vpop.f32.mrf.mxu3 }
  0xd2   :  { %v4474_v60 = vadd.f32 %v1739_v52, %v1690_v45  ;;  %v1673_v7 = vpop.f32.mrf.mxu0  ;;  %2243 = vmatpush.bf16.msrb.mxu0 %v990_v37  ;;  %v811_v45 = vpack.c.bf16 %v435_v62, %v433_v50  ;;  %v780_v37 = vmax.f32 %v388_v9, 0.0  ;;  %v782_v52 = vmax.f32 %v390_v14, 0.0  ;;  %v3401_v50 = vld [vmem:[%s6163_s1 + $0x48] sm:$0xf0]  ;;  %v3395_v62 = vld [vmem:[%s6163_s1 + $0x1c] sm:$0xf] }
  0xd3   :  { %v3396_v9 = vld [vmem:[%s6163_s1 + $0x24] sm:$0xf]  ;;  %v2996_v14 = vld [vmem:[%s6163_s1 + $0x54] sm:$0xf0] }
  0xd4   :  { %v1722_v28 = vpop.f32.mrf.mxu1  ;;  %2286 = vmatpush.bf16.msrb.mxu1 %v811_v45 }
  0xd5   :  { %v4480_v24 = vadd.f32 %v1722_v28, %v1673_v7  ;;  %1790 = vmatmul.bf16.gmra.mxu2 %v4470_v43  ;;  %1888 = vmatmul.bf16.gmra.mxu0 %v4472_v2  ;;  %v356_v28 = vld [vmem:[%s6162_s0 + $0xac0] sm:$0xff]  ;;  %v2986_v43 = vld [vmem:[%s6163_s1 + $0x18] sm:$0xf] }
  0xd6   :  { %1839 = vmatmul.bf16.gmra.mxu3 %v4476_v31  ;;  %v748_v63 = vmax.f32 %v356_v28, 0.0  ;;  %v984_v28 = vpack.c.bf16 %v782_v52, %v780_v37  ;;  %v4532_v37 = vor.u32 %v3401_v50, %v2986_v43  ;;  %v39_v43 = vld [vmem:[%s6162_s0 + $0xd8] sm:$0xff]  ;;  %v429_v50 = vmax.f32 %v37_v12, 0.0 }
  0xd7   :  { %1937 = vmatmul.bf16.gmra.mxu1 %v4478_v29 }
  0xd8   :  { %v1693_v35 = vpop.f32.mrf.mxu2  ;;  %v968_v53 = vpack.c.bf16 %v750_v8, %v748_v63  ;;  %2189 = vmatpush.bf16.msrb.mxu3 %v984_v28  ;;  %v2994_v63 = vld [vmem:[%s6163_s1 + $0x20] sm:$0xf]  ;;  %v2988_v8 = vld [vmem:[%s6163_s1 + $0x4c] sm:$0xf0]  ;;  %6262 = vst [vmem:[#allocation28_spill] sm:$0xff] %v4532_v37 }
  0xd9   :  { %v1742_v7 = vpop.f32.mrf.mxu3  ;;  %v4538_v28 = vor.u32 %v3395_v62, %v2988_v8  ;;  %v431_v62 = vmax.f32 %v39_v43, 0.0 }
  0xda   :  { %v4504_v55 = vadd.f32 %v1742_v7, %v1693_v35  ;;  %v1675_v29 = vpop.f32.mrf.mxu0  ;;  %2140 = vmatpush.bf16.msrb.mxu2 %v968_v53 }
  0xdb   :  { %6264 = vst [vmem:[#allocation30_spill] sm:$0xff] %v4538_v28 }
  0xdc   :  { %v1724_v51 = vpop.f32.mrf.mxu1 }
  0xdd   :  { %v4506_v2 = vadd.f32 %v1724_v51, %v1675_v29  ;;  %v3402_v29 = vld [vmem:[%s6163_s1 + $0x50] sm:$0xf0]  ;;  %v4540_v51 = vor.u32 %v3396_v9, %v2996_v14  ;;  %v384_v14 = vld [vmem:[%s6162_s0 + $0xba0] sm:$0xff] }
  0xde   :  { %v4534_v52 = vor.u32 %v3402_v29, %v2994_v63  ;;  %v352_v63 = vld [vmem:[%s6162_s0 + $0xaa0] sm:$0xff]  ;;  %v354_v29 = vld [vmem:[%s6162_s0 + $0xab0] sm:$0xff]  ;;  %v776_v43 = vmax.f32 %v384_v14, 0.0 }
  0xdf   :  { %6265 = vst [vmem:[#allocation31_spill] sm:$0xff] %v4540_v51  ;;  %v744_v8 = vmax.f32 %v352_v63, 0.0  ;;  %v746_v9 = vmax.f32 %v354_v29, 0.0 }
  0xe0   :  { %v1695_v35 = vpop.f32.mrf.mxu2  ;;  %6263 = vst [vmem:[#allocation29_spill] sm:$0xff] %v4534_v52 }
  0xe1   :  { %v1744_v45 = vpop.f32.mrf.mxu3 }
  0xe2   :  { %v4536_v7 = vadd.f32 %v1744_v45, %v1695_v35  ;;  %v1854_v53 = vpop.f32.mrf.mxu0  ;;  %v386_v35 = vld [vmem:[%s6162_s0 + $0xbb0] sm:$0xff]  ;;  %v809_v45 = vpack.c.bf16 %v431_v62, %v429_v50 }
  0xe3   :  { %v3414_v50 = vld [vmem:[%s6163_s1 + $0xb0] sm:$0xf0] }
  0xe4   :  { %v1903_v31 = vpop.f32.mrf.mxu1  ;;  %2287 = vmatpush.bf16.msrb.mxu1 %v809_v45 }
  0xe5   :  { %1951 = vmatmul.bf16.vlgmr.msra.gmra.mxu2 %v4532_v37  ;;  %2049 = vmatmul.bf16.vlgmr.msra.gmra.mxu0 %v4534_v52 }
  0xe6   :  { %2000 = vmatmul.bf16.vlgmr.msra.gmra.mxu3 %v4538_v28  ;;  %v966_v28 = vpack.c.bf16 %v746_v9, %v744_v8 }
  0xe7   :  { %2098 = vmatmul.bf16.vlgmr.msra.gmra.mxu1 %v4540_v51  ;;  %v778_v51 = vmax.f32 %v386_v35, 0.0  ;;  %v4592_v35 = vor.u32 %v3414_v50, %v3038_v44  ;;  %v35_v44 = vld [vmem:[%s6162_s0 + $0xb8] sm:$0xff]  ;;  %v350_v50 = vld [vmem:[%s6162_s0 + $0xa90] sm:$0xff] }
  0xe8   :  { %v1756_v12 = vpop.f32.mrf.mxu2  ;;  %2141 = vmatpush.bf16.msrb.mxu2 %v966_v28  ;;  %v3409_v28 = vld [vmem:[%s6163_s1 + $0x8c] sm:$0xf] }
  0xe9   :  { %v1757_v52 = vadd.f32 %v1756_v12, %v4282_v61  ;;  %v1805_v37 = vpop.f32.mrf.mxu3  ;;  %v982_v63 = vpack.c.bf16 %v778_v51, %v776_v43  ;;  %v3408_v61 = vld [vmem:[%s6163_s1 + $0x84] sm:$0xf]  ;;  %v3048_v51 = vld [vmem:[%s6163_s1 + $0xbc] sm:$0xf0]  ;;  %6266 = vst [vmem:[#allocation32_spill] sm:$0xff] %v4592_v35 }
  0xea   :  { %v1856_v11 = vpop.f32.mrf.mxu0 }
  0xeb   :  { %v1806_v29 = vadd.f32 %v1805_v37, %v1757_v52  ;;  %2190 = vmatpush.bf16.msrb.mxu3 %v982_v63  ;;  %v3046_v37 = vld [vmem:[%s6163_s1 + $0x88] sm:$0xf]  ;;  %v3415_v52 = vld [vmem:[%s6163_s1 + $0xb8] sm:$0xf0]  ;;  %v4598_v63 = vor.u32 %v3409_v28, %v3048_v51 }
  0xec   :  { %v1905_v15 = vpop.f32.mrf.mxu1  ;;  %v4594_v12 = vor.u32 %v3415_v52, %v3046_v37  ;;  %v742_v37 = vmax.f32 %v350_v50, 0.0  ;;  %v380_v52 = vld [vmem:[%s6162_s0 + $0xb80] sm:$0xff] }
  0xed   :  { %v1855_v20 = vadd.f32 %v1854_v53, %v1806_v29  ;;  %v3040_v53 = vld [vmem:[%s6163_s1 + $0xb4] sm:$0xf0]  ;;  %6269 = vst [vmem:[#allocation35_spill] sm:$0xff] %v4598_v63 }
  0xee   :  { %6267 = vst [vmem:[#allocation33_spill] sm:$0xff] %v4594_v12  ;;  %v4596_v43 = vor.u32 %v3408_v61, %v3040_v53  ;;  %v382_v53 = vld [vmem:[%s6162_s0 + $0xb90] sm:$0xff] }
  0xef   :  { %v4589_v62 = vadd.f32 %v1903_v31, %v1855_v20  ;;  %v33_v20 = vld [vmem:[%s6162_s0 + $0xa8] sm:$0xff]  ;;  %v427_v31 = vmax.f32 %v35_v44, 0.0 }
  0xf0   :  { %v1758_v8 = vpop.f32.mrf.mxu2  ;;  %6268 = vst [vmem:[#allocation34_spill] sm:$0xff] %v4596_v43 }
  0xf1   :  { %v1759_v9 = vadd.f32 %v1758_v8, %v4302_v34  ;;  %v1807_v14 = vpop.f32.mrf.mxu3  ;;  %v425_v34 = vmax.f32 %v33_v20, 0.0 }
  0xf2   :  { %v1859_v45 = vpop.f32.mrf.mxu0 }
  0xf3   :  { %v1808_v29 = vadd.f32 %v1807_v14, %v1759_v9  ;;  %v807_v8 = vpack.c.bf16 %v427_v31, %v425_v34  ;;  %v772_v9 = vmax.f32 %v380_v52, 0.0  ;;  %v774_v14 = vmax.f32 %v382_v53, 0.0  ;;  %v3098_v34 = vld [vmem:[%s6163_s1 + $0xf0] sm:$0xf]  ;;  %v3422_v31 = vld [vmem:[%s6163_s1 + $0xf4] sm:$0xf] }
  0xf4   :  { %v1908_v39 = vpop.f32.mrf.mxu1 }
  0xf5   :  { %v1857_v46 = vadd.f32 %v1856_v11, %v1808_v29  ;;  %1956 = vmatmul.bf16.gmra.mxu2 %v4592_v35  ;;  %2054 = vmatmul.bf16.gmra.mxu0 %v4594_v12  ;;  %v348_v11 = vld [vmem:[%s6162_s0 + $0xa80] sm:$0xff]  ;;  %v980_v50 = vpack.c.bf16 %v774_v14, %v772_v9 }
  0xf6   :  { %2005 = vmatmul.bf16.gmra.mxu3 %v4596_v43  ;;  %v740_v61 = vmax.f32 %v348_v11, 0.0  ;;  %2288 = vmatpush.bf16.msrb.mxu1 %v807_v8 }
  0xf7   :  { %2103 = vmatmul.bf16.gmra.mxu1 %v4598_v63  ;;  %v4622_v28 = vadd.f32 %v1905_v15, %v1857_v46  ;;  %2191 = vmatpush.bf16.msrb.mxu3 %v980_v50  ;;  %v3090_v46 = vld [vmem:[%s6163_s1 + $0xe8] sm:$0xf]  ;;  %v3427_v15 = vld [vmem:[%s6163_s1 + $0x118] sm:$0xf0] }
  0xf8   :  { %v1761_v51 = vpop.f32.mrf.mxu2  ;;  %v964_v44 = vpack.c.bf16 %v742_v37, %v740_v61  ;;  %v3100_v61 = vld [vmem:[%s6163_s1 + $0x124] sm:$0xf0]  ;;  %v4652_v8 = vor.u32 %v3427_v15, %v3090_v46  ;;  %v346_v15 = vld [vmem:[%s6162_s0 + $0xa70] sm:$0xff] }
  0xf9   :  { %v1762_v29 = vadd.f32 %v1761_v51, %v4350_v36  ;;  %v1810_v20 = vpop.f32.mrf.mxu3  ;;  %v3421_v36 = vld [vmem:[%s6163_s1 + $0xec] sm:$0xf] }
  0xfa   :  { %v1861_v11 = vpop.f32.mrf.mxu0  ;;  %2142 = vmatpush.bf16.msrb.mxu2 %v964_v44  ;;  %6270 = vst [vmem:[#allocation36_spill] sm:$0xff] %v4652_v8 }
  0xfb   :  { %v1811_v63 = vadd.f32 %v1810_v20, %v1762_v29  ;;  %v4658_v20 = vor.u32 %v3422_v31, %v3100_v61 }
  0xfc   :  { %v1910_v12 = vpop.f32.mrf.mxu1 }
  0xfd   :  { %v1860_v35 = vadd.f32 %v1859_v45, %v1811_v63  ;;  %v3428_v45 = vld [vmem:[%s6163_s1 + $0x120] sm:$0xf0]  ;;  %v3092_v63 = vld [vmem:[%s6163_s1 + $0x11c] sm:$0xf0]  ;;  %6273 = vst [vmem:[#allocation39_spill] sm:$0xff] %v4658_v20 }
  0xfe   :  { %v4654_v9 = vor.u32 %v3428_v45, %v3098_v34  ;;  %v4656_v29 = vor.u32 %v3421_v36, %v3092_v63  ;;  %v738_v34 = vmax.f32 %v346_v15, 0.0  ;;  %v376_v45 = vld [vmem:[%s6162_s0 + $0xb60] sm:$0xff]  ;;  %v378_v63 = vld [vmem:[%s6162_s0 + $0xb70] sm:$0xff] }
  0xff   :  { %v4649_v37 = vadd.f32 %v1908_v39, %v1860_v35  ;;  %v29_v39 = vld [vmem:[%s6162_s0 + $0x88] sm:$0xff] }
 0x100   :  { %v1763_v52 = vpop.f32.mrf.mxu2  ;;  %6271 = vst [vmem:[#allocation37_spill] sm:$0xff] %v4654_v9  ;;  %v421_v35 = vmax.f32 %v29_v39, 0.0 }
 0x101   :  { %v1764_v53 = vadd.f32 %v1763_v52, %v4370_v32  ;;  %v1812_v51 = vpop.f32.mrf.mxu3  ;;  %6272 = vst [vmem:[#allocation38_spill] sm:$0xff] %v4656_v29  ;;  %v31_v32 = vld [vmem:[%s6162_s0 + $0x98] sm:$0xff] }
 0x102   :  { %v1864_v14 = vpop.f32.mrf.mxu0  ;;  %v423_v46 = vmax.f32 %v31_v32, 0.0 }
 0x103   :  { %v1813_v44 = vadd.f32 %v1812_v51, %v1764_v53  ;;  %v768_v53 = vmax.f32 %v376_v45, 0.0  ;;  %v770_v51 = vmax.f32 %v378_v63, 0.0  ;;  %v3144_v45 = vld [vmem:[%s6163_s1 + $0x184] sm:$0xf0]  ;;  %v3435_v63 = vld [vmem:[%s6163_s1 + $0x15c] sm:$0xf] }
 0x104   :  { %v1913_v50 = vpop.f32.mrf.mxu1  ;;  %v805_v52 = vpack.c.bf16 %v423_v46, %v421_v35  ;;  %v396_v35 = vld [vmem:[%s6162_s0 + $0xc00] sm:$0xff]  ;;  %v398_v46 = vld [vmem:[%s6162_s0 + $0xc10] sm:$0xff] }
 0x105   :  { %v1862_v43 = vadd.f32 %v1861_v11, %v1813_v44  ;;  %1961 = vmatmul.bf16.gmra.mxu2 %v4652_v8  ;;  %2059 = vmatmul.bf16.gmra.mxu0 %v4654_v9  ;;  %v344_v11 = vld [vmem:[%s6162_s0 + $0xa60] sm:$0xff]  ;;  %v978_v15 = vpack.c.bf16 %v770_v51, %v768_v53  ;;  %v3142_v8 = vld [vmem:[%s6163_s1 + $0x150] sm:$0xf] }
 0x106   :  { %2010 = vmatmul.bf16.gmra.mxu3 %v4656_v29  ;;  %v736_v36 = vmax.f32 %v344_v11, 0.0  ;;  %2289 = vmatpush.bf16.msrb.mxu1 %v805_v52 }
 0x107   :  { %2108 = vmatmul.bf16.gmra.mxu1 %v4658_v20  ;;  %v4682_v31 = vadd.f32 %v1910_v12, %v1862_v43  ;;  %v3440_v12 = vld [vmem:[%s6163_s1 + $0x180] sm:$0xf0]  ;;  %2192 = vmatpush.bf16.msrb.mxu3 %v978_v15 }
 0x108   :  { %v1766_v61 = vpop.f32.mrf.mxu2  ;;  %v962_v32 = vpack.c.bf16 %v738_v34, %v736_v36  ;;  %v3150_v36 = vld [vmem:[%s6163_s1 + $0x158] sm:$0xf]  ;;  %v790_v34 = vmax.f32 %v398_v46, 0.0 }
 0x109   :  { %v1767_v44 = vadd.f32 %v1766_v61, %v4418_v54  ;;  %v1815_v39 = vpop.f32.mrf.mxu3  ;;  %v3434_v54 = vld [vmem:[%s6163_s1 + $0x154] sm:$0xf]  ;;  %v3152_v61 = vld [vmem:[%s6163_s1 + $0x18c] sm:$0xf0] }
 0x10a   :  { %v1866_v11 = vpop.f32.mrf.mxu0  ;;  %2143 = vmatpush.bf16.msrb.mxu2 %v962_v32  ;;  %v4718_v32 = vor.u32 %v3440_v12, %v3142_v8  ;;  %v4722_v46 = vor.u32 %v3434_v54, %v3144_v45  ;;  %v4724_v29 = vor.u32 %v3435_v63, %v3152_v61  ;;  %v27_v8 = vld [vmem:[%s6162_s0 + $0x78] sm:$0xff] }
 0x10b   :  { %v1816_v20 = vadd.f32 %v1815_v39, %v1767_v44  ;;  %v419_v12 = vmax.f32 %v27_v8, 0.0 }
 0x10c   :  { %v1915_v9 = vpop.f32.mrf.mxu1  ;;  %6274 = vst [vmem:[#allocation40_spill] sm:$0xff] %v4718_v32 }
 0x10d   :  { %v1865_v43 = vadd.f32 %v1864_v14, %v1816_v20  ;;  %v3441_v14 = vld [vmem:[%s6163_s1 + $0x188] sm:$0xf0]  ;;  %v788_v20 = vmax.f32 %v396_v35, 0.0  ;;  %6276 = vst [vmem:[#allocation42_spill] sm:$0xff] %v4722_v46 }
 0x10e   :  { %v4720_v15 = vor.u32 %v3441_v14, %v3150_v36  ;;  %6277 = vst [vmem:[#allocation43_spill] sm:$0xff] %v4724_v29  ;;  %v372_v36 = vld [vmem:[%s6162_s0 + $0xb40] sm:$0xff]  ;;  %v374_v14 = vld [vmem:[%s6162_s0 + $0xb50] sm:$0xff] }
 0x10f   :  { %v4715_v52 = vadd.f32 %v1913_v50, %v1865_v43  ;;  %v988_v51 = vpack.c.bf16 %v790_v34, %v788_v20  ;;  %v764_v63 = vmax.f32 %v372_v36, 0.0  ;;  %v766_v61 = vmax.f32 %v374_v14, 0.0 }
 0x110   :  { %v1768_v53 = vpop.f32.mrf.mxu2  ;;  %6275 = vst [vmem:[#allocation41_spill] sm:$0xff] %v4720_v15 }
 0x111   :  { %v1769_v44 = vadd.f32 %v1768_v53, %v4438_v27  ;;  %v1817_v39 = vpop.f32.mrf.mxu3  ;;  %2244 = vmatpush.bf16.msrb.mxu0 %v988_v51  ;;  %v25_v27 = vld [vmem:[%s6162_s0 + $0x68] sm:$0xff] }
 0x112   :  { %v1869_v35 = vpop.f32.mrf.mxu0  ;;  %v417_v50 = vmax.f32 %v25_v27, 0.0  ;;  %v976_v27 = vpack.c.bf16 %v766_v61, %v764_v63 }
 0x113   :  { %v1818_v57 = vadd.f32 %v1817_v39, %v1769_v44 }
 0x114   :  { %v1918_v48 = vpop.f32.mrf.mxu1  ;;  %v803_v45 = vpack.c.bf16 %v419_v12, %v417_v50  ;;  %2193 = vmatpush.bf16.msrb.mxu3 %v976_v27  ;;  %v3202_v50 = vld [vmem:[%s6163_s1 + $0x1c0] sm:$0xf]  ;;  %v3196_v12 = vld [vmem:[%s6163_s1 + $0x1ec] sm:$0xf0] }
 0x115   :  { %v1867_v47 = vadd.f32 %v1866_v11, %v1818_v57  ;;  %1966 = vmatmul.bf16.gmra.mxu2 %v4718_v32  ;;  %2064 = vmatmul.bf16.gmra.mxu0 %v4720_v15  ;;  %v340_v57 = vld [vmem:[%s6162_s0 + $0xa40] sm:$0xff]  ;;  %v342_v11 = vld [vmem:[%s6162_s0 + $0xa50] sm:$0xff] }
 0x116   :  { %2015 = vmatmul.bf16.gmra.mxu3 %v4722_v46  ;;  %v732_v43 = vmax.f32 %v340_v57, 0.0  ;;  %v734_v54 = vmax.f32 %v342_v11, 0.0  ;;  %2290 = vmatpush.bf16.msrb.mxu1 %v803_v45 }
 0x117   :  { %2113 = vmatmul.bf16.gmra.mxu1 %v4724_v29  ;;  %v4748_v20 = vadd.f32 %v1915_v9, %v1867_v47  ;;  %v3194_v47 = vld [vmem:[%s6163_s1 + $0x1b8] sm:$0xf]  ;;  %v3453_v9 = vld [vmem:[%s6163_s1 + $0x1e8] sm:$0xf0] }
 0x118   :  { %v1771_v34 = vpop.f32.mrf.mxu2  ;;  %v960_v44 = vpack.c.bf16 %v734_v54, %v732_v43  ;;  %v3448_v43 = vld [vmem:[%s6163_s1 + $0x1c4] sm:$0xf]  ;;  %v3204_v54 = vld [vmem:[%s6163_s1 + $0x1f4] sm:$0xf0]  ;;  %v4778_v63 = vor.u32 %v3453_v9, %v3194_v47  ;;  %v338_v9 = vld [vmem:[%s6162_s0 + $0xa30] sm:$0xff] }
 0x119   :  { %v1772_v53 = vadd.f32 %v1771_v34, %v4480_v24  ;;  %v1820_v51 = vpop.f32.mrf.mxu3  ;;  %v3447_v24 = vld [vmem:[%s6163_s1 + $0x1bc] sm:$0xf] }
 0x11a   :  { %v1871_v39 = vpop.f32.mrf.mxu0  ;;  %2144 = vmatpush.bf16.msrb.mxu2 %v960_v44  ;;  %6278 = vst [vmem:[#allocation44_spill] sm:$0xff] %v4778_v63  ;;  %v4784_v44 = vor.u32 %v3448_v43, %v3204_v54 }
 0x11b   :  { %v1821_v8 = vadd.f32 %v1820_v51, %v1772_v53  ;;  %v4782_v51 = vor.u32 %v3447_v24, %v3196_v12  ;;  %v370_v12 = vld [vmem:[%s6162_s0 + $0xb30] sm:$0xff] }
 0x11c   :  { %v1920_v57 = vpop.f32.mrf.mxu1  ;;  %6281 = vst [vmem:[#allocation47_spill] sm:$0xff] %v4784_v44 }
 0x11d   :  { %v1870_v11 = vadd.f32 %v1869_v35, %v1821_v8  ;;  %v3454_v35 = vld [vmem:[%s6163_s1 + $0x1f0] sm:$0xf0]  ;;  %6280 = vst [vmem:[#allocation46_spill] sm:$0xff] %v4782_v51 }
 0x11e   :  { %v4780_v61 = vor.u32 %v3454_v35, %v3202_v50  ;;  %v730_v50 = vmax.f32 %v338_v9, 0.0  ;;  %v368_v35 = vld [vmem:[%s6162_s0 + $0xb20] sm:$0xff] }
 0x11f   :  { %v4775_v36 = vadd.f32 %v1918_v48, %v1870_v11  ;;  %v23_v48 = vld [vmem:[%s6162_s0 + $0x58] sm:$0xff] }
 0x120   :  { %v1773_v14 = vpop.f32.mrf.mxu2  ;;  %6279 = vst [vmem:[#allocation45_spill] sm:$0xff] %v4780_v61  ;;  %v415_v47 = vmax.f32 %v23_v48, 0.0 }
 0x121   :  { %v1774_v34 = vadd.f32 %v1773_v14, %v4506_v2  ;;  %v1822_v45 = vpop.f32.mrf.mxu3  ;;  %v21_v2 = vld [vmem:[%s6162_s0 + $0x48] sm:$0xff] }
 0x122   :  { %v1874_v53 = vpop.f32.mrf.mxu0  ;;  %v413_v11 = vmax.f32 %v21_v2, 0.0 }
 0x123   :  { %v1823_v27 = vadd.f32 %v1822_v45, %v1774_v34  ;;  %v760_v34 = vmax.f32 %v368_v35, 0.0  ;;  %v762_v45 = vmax.f32 %v370_v12, 0.0 }
 0x124   :  { %v1923_v8 = vpop.f32.mrf.mxu1  ;;  %v801_v14 = vpack.c.bf16 %v415_v47, %v413_v11  ;;  %v3254_v11 = vld [vmem:[%s6163_s1 + $0x228] sm:$0xf]  ;;  %v3461_v47 = vld [vmem:[%s6163_s1 + $0x22c] sm:$0xf] }
 0x125   :  { %v1872_v29 = vadd.f32 %v1871_v39, %v1823_v27  ;;  %1971 = vmatmul.bf16.gmra.mxu2 %v4778_v63  ;;  %2069 = vmatmul.bf16.gmra.mxu0 %v4780_v61  ;;  %v336_v39 = vld [vmem:[%s6162_s0 + $0xa20] sm:$0xff]  ;;  %v974_v9 = vpack.c.bf16 %v762_v45, %v760_v34 }
 0x126   :  { %2020 = vmatmul.bf16.gmra.mxu3 %v4782_v51  ;;  %v728_v24 = vmax.f32 %v336_v39, 0.0  ;;  %2291 = vmatpush.bf16.msrb.mxu1 %v801_v14 }
 0x127   :  { %2118 = vmatmul.bf16.gmra.mxu1 %v4784_v44  ;;  %v4808_v43 = vadd.f32 %v1920_v57, %v1872_v29  ;;  %2194 = vmatpush.bf16.msrb.mxu3 %v974_v9  ;;  %v3246_v29 = vld [vmem:[%s6163_s1 + $0x220] sm:$0xf]  ;;  %v3466_v57 = vld [vmem:[%s6163_s1 + $0x250] sm:$0xf0] }
 0x128   :  { %v1776_v54 = vpop.f32.mrf.mxu2  ;;  %v958_v48 = vpack.c.bf16 %v730_v50, %v728_v24  ;;  %v3256_v24 = vld [vmem:[%s6163_s1 + $0x25c] sm:$0xf0]  ;;  %v4838_v14 = vor.u32 %v3466_v57, %v3246_v29  ;;  %v334_v57 = vld [vmem:[%s6162_s0 + $0xa10] sm:$0xff] }
 0x129   :  { %v1777_v27 = vadd.f32 %v1776_v54, %v4300_v30  ;;  %v1825_v2 = vpop.f32.mrf.mxu3  ;;  %v3460_v30 = vld [vmem:[%s6163_s1 + $0x224] sm:$0xf] }
 0x12a   :  { %v1876_v39 = vpop.f32.mrf.mxu0  ;;  %2145 = vmatpush.bf16.msrb.mxu2 %v958_v48  ;;  %6282 = vst [vmem:[#allocation48_spill] sm:$0xff] %v4838_v14 }
 0x12b   :  { %v1826_v44 = vadd.f32 %v1825_v2, %v1777_v27  ;;  %v4844_v2 = vor.u32 %v3461_v47, %v3256_v24 }
 0x12c   :  { %v1925_v61 = vpop.f32.mrf.mxu1 }
 0x12d   :  { %v1875_v63 = vadd.f32 %v1874_v53, %v1826_v44  ;;  %v3467_v53 = vld [vmem:[%s6163_s1 + $0x258] sm:$0xf0]  ;;  %v3248_v44 = vld [vmem:[%s6163_s1 + $0x254] sm:$0xf0]  ;;  %6285 = vst [vmem:[#allocation51_spill] sm:$0xff] %v4844_v2 }
 0x12e   :  { %v4840_v34 = vor.u32 %v3467_v53, %v3254_v11  ;;  %v4842_v27 = vor.u32 %v3460_v30, %v3248_v44  ;;  %v726_v11 = vmax.f32 %v334_v57, 0.0  ;;  %v364_v53 = vld [vmem:[%s6162_s0 + $0xb00] sm:$0xff]  ;;  %v366_v44 = vld [vmem:[%s6162_s0 + $0xb10] sm:$0xff] }
 0x12f   :  { %v4835_v50 = vadd.f32 %v1923_v8, %v1875_v63  ;;  %v19_v63 = vld [vmem:[%s6162_s0 + $0x38] sm:$0xff] }
 0x130   :  { %v1778_v35 = vpop.f32.mrf.mxu2  ;;  %6283 = vst [vmem:[#allocation49_spill] sm:$0xff] %v4840_v34  ;;  %v411_v29 = vmax.f32 %v19_v63, 0.0 }
 0x131   :  { %v1779_v12 = vadd.f32 %v1778_v35, %v4338_v13  ;;  %v1827_v54 = vpop.f32.mrf.mxu3  ;;  %6284 = vst [vmem:[#allocation50_spill] sm:$0xff] %v4842_v27  ;;  %v17_v13 = vld [vmem:[%s6162_s0 + $0x28] sm:$0xff] }
 0x132   :  { %v1879_v45 = vpop.f32.mrf.mxu0  ;;  %v409_v8 = vmax.f32 %v17_v13, 0.0 }
 0x133   :  { %v1828_v48 = vadd.f32 %v1827_v54, %v1779_v12  ;;  %v756_v12 = vmax.f32 %v364_v53, 0.0  ;;  %v758_v54 = vmax.f32 %v366_v44, 0.0 }
 0x134   :  { %v1928_v9 = vpop.f32.mrf.mxu1  ;;  %v799_v35 = vpack.c.bf16 %v411_v29, %v409_v8  ;;  %v3306_v8 = vld [vmem:[%s6163_s1 + $0x290] sm:$0xf]  ;;  %v3474_v29 = vld [vmem:[%s6163_s1 + $0x294] sm:$0xf] }
 0x135   :  { %v1877_v51 = vadd.f32 %v1876_v39, %v1828_v48  ;;  %1976 = vmatmul.bf16.gmra.mxu2 %v4838_v14  ;;  %2074 = vmatmul.bf16.gmra.mxu0 %v4840_v34  ;;  %v332_v39 = vld [vmem:[%s6162_s0 + $0xa00] sm:$0xff]  ;;  %v972_v57 = vpack.c.bf16 %v758_v54, %v756_v12 }
 0x136   :  { %2025 = vmatmul.bf16.gmra.mxu3 %v4842_v27  ;;  %v724_v30 = vmax.f32 %v332_v39, 0.0  ;;  %2292 = vmatpush.bf16.msrb.mxu1 %v799_v35 }
 0x137   :  { %2123 = vmatmul.bf16.gmra.mxu1 %v4844_v2  ;;  %v4868_v47 = vadd.f32 %v1925_v61, %v1877_v51  ;;  %2195 = vmatpush.bf16.msrb.mxu3 %v972_v57  ;;  %v3298_v61 = vld [vmem:[%s6163_s1 + $0x288] sm:$0xf]  ;;  %v3479_v51 = vld [vmem:[%s6163_s1 + $0x2b8] sm:$0xf0] }
 0x138   :  { %v1781_v24 = vpop.f32.mrf.mxu2  ;;  %v956_v63 = vpack.c.bf16 %v726_v11, %v724_v30  ;;  %v3308_v30 = vld [vmem:[%s6163_s1 + $0x2c4] sm:$0xf0]  ;;  %v4898_v35 = vor.u32 %v3479_v51, %v3298_v61 }
 0x139   :  { %v1782_v48 = vadd.f32 %v1781_v24, %v4368_v10  ;;  %v1830_v13 = vpop.f32.mrf.mxu3  ;;  %v3473_v10 = vld [vmem:[%s6163_s1 + $0x28c] sm:$0xf] }
 0x13a   :  { %v1881_v39 = vpop.f32.mrf.mxu0  ;;  %2146 = vmatpush.bf16.msrb.mxu2 %v956_v63  ;;  %6286 = vst [vmem:[#allocation52_spill] sm:$0xff] %v4898_v35  ;;  %v13_v63 = vld [vmem:[%s6162_s0 + $0x8] sm:$0xff] }
 0x13b   :  { %v1831_v2 = vadd.f32 %v1830_v13, %v1782_v48  ;;  %v4904_v13 = vor.u32 %v3474_v29, %v3308_v30  ;;  %v405_v57 = vmax.f32 %v13_v63, 0.0  ;;  %v107_v30 = vld [vmem:[%s6162_s0 + $0x2f8] sm:$0xff] }
 0x13c   :  { %v1930_v34 = vpop.f32.mrf.mxu1  ;;  %v499_v63 = vmax.f32 %v107_v30, 0.0  ;;  %v3360_v30 = vld [vmem:[%s6163_s1 + $0x32c] sm:$0xf0] }
 0x13d   :  { %v1880_v14 = vadd.f32 %v1879_v45, %v1831_v2  ;;  %v3480_v45 = vld [vmem:[%s6163_s1 + $0x2c0] sm:$0xf0]  ;;  %v3300_v2 = vld [vmem:[%s6163_s1 + $0x2bc] sm:$0xf0]  ;;  %6289 = vst [vmem:[#allocation55_spill] sm:$0xff] %v4904_v13 }
 0x13e   :  { %v4900_v12 = vor.u32 %v3480_v45, %v3306_v8  ;;  %v4902_v48 = vor.u32 %v3473_v10, %v3300_v2  ;;  %v73_v8 = vld [vmem:[%s6162_s0 + $0x1e8] sm:$0xff]  ;;  %v75_v45 = vld [vmem:[%s6162_s0 + $0x1f8] sm:$0xff] }
 0x13f   :  { %v4895_v11 = vadd.f32 %v1928_v9, %v1880_v14  ;;  %v15_v14 = vld [vmem:[%s6162_s0 + $0x18] sm:$0xff]  ;;  %v465_v2 = vmax.f32 %v73_v8, 0.0  ;;  %v467_v29 = vmax.f32 %v75_v45, 0.0  ;;  %v137_v8 = vld [vmem:[%s6162_s0 + $0x3e8] sm:$0xff] }
 0x140   :  { %v1783_v53 = vpop.f32.mrf.mxu2  ;;  %6287 = vst [vmem:[#allocation53_spill] sm:$0xff] %v4900_v12  ;;  %v407_v61 = vmax.f32 %v15_v14, 0.0  ;;  %v139_v45 = vld [vmem:[%s6162_s0 + $0x3f8] sm:$0xff] }
 0x141   :  { %v1784_v44 = vadd.f32 %v1783_v53, %v4406_v33  ;;  %v1832_v24 = vpop.f32.mrf.mxu3  ;;  %6288 = vst [vmem:[#allocation54_spill] sm:$0xff] %v4902_v48 }
 0x142   :  { %v1884_v54 = vpop.f32.mrf.mxu0  ;;  %v797_v10 = vpack.c.bf16 %v407_v61, %v405_v57  ;;  %v827_v57 = vpack.c.bf16 %v467_v29, %v465_v2  ;;  %v3352_v2 = vld [vmem:[%s6163_s1 + $0x324] sm:$0xf0]  ;;  %v3487_v29 = vld [vmem:[%s6163_s1 + $0x2fc] sm:$0xf] }
 0x143   :  { %v1833_v9 = vadd.f32 %v1832_v24, %v1784_v44  ;;  %v4970_v27 = vor.u32 %v3487_v29, %v3360_v30 }
 0x144   :  { %v1933_v33 = vpop.f32.mrf.mxu1  ;;  %2293 = vmatpush.bf16.msrb.mxu1 %v797_v10  ;;  %2335 = vmatpush.bf16.msra.mxu2 %v827_v57  ;;  %v3350_v10 = vld [vmem:[%s6163_s1 + $0x2f0] sm:$0xf] }
 0x145   :  { %v1882_v51 = vadd.f32 %v1881_v39, %v1833_v9  ;;  %1981 = vmatmul.bf16.gmra.mxu2 %v4898_v35  ;;  %2079 = vmatmul.bf16.gmra.mxu0 %v4900_v12  ;;  %v105_v39 = vld [vmem:[%s6162_s0 + $0x2e8] sm:$0xff]  ;;  %6290 = vst [vmem:[#allocation56_spill] sm:$0xff] %v4970_v27 }
 0x146   :  { %2030 = vmatmul.bf16.gmra.mxu3 %v4902_v48  ;;  %v497_v53 = vmax.f32 %v105_v39, 0.0  ;;  %v3358_v39 = vld [vmem:[%s6163_s1 + $0x2f8] sm:$0xf] }
 0x147   :  { %2128 = vmatmul.bf16.gmra.mxu1 %v4904_v13  ;;  %v4928_v44 = vadd.f32 %v1930_v34, %v1882_v51  ;;  %v3492_v34 = vld [vmem:[%s6163_s1 + $0x320] sm:$0xf0] }
 0x148   :  { %v1786_v24 = vpop.f32.mrf.mxu2  ;;  %v843_v13 = vpack.c.bf16 %v499_v63, %v497_v53  ;;  %v4964_v57 = vor.u32 %v3492_v34, %v3350_v10 }
 0x149   :  { %v1787_v14 = vadd.f32 %v1786_v24, %v4436_v38  ;;  %v1835_v9 = vpop.f32.mrf.mxu3  ;;  %v3486_v38 = vld [vmem:[%s6163_s1 + $0x2f4] sm:$0xf] }
 0x14a   :  { %v1886_v61 = vpop.f32.mrf.mxu0  ;;  %2384 = vmatpush.bf16.msra.mxu3 %v843_v13  ;;  %v531_v13 = vmax.f32 %v139_v45, 0.0  ;;  %v4968_v48 = vor.u32 %v3486_v38, %v3352_v2 }
 0x14b   :  { %v1836_v12 = vadd.f32 %v1835_v9, %v1787_v14 }
 0x14c   :  { %v1935_v35 = vpop.f32.mrf.mxu1 }
 0x14d   :  { %v1885_v51 = vadd.f32 %v1884_v54, %v1836_v12  ;;  %v3493_v12 = vld [vmem:[%s6163_s1 + $0x328] sm:$0xf0]  ;;  %v529_v54 = vmax.f32 %v137_v8, 0.0 }
 0x14e   :  { %v4966_v8 = vor.u32 %v3493_v12, %v3358_v39  ;;  %v101_v39 = vld [vmem:[%s6162_s0 + $0x2c8] sm:$0xff]  ;;  %v103_v12 = vld [vmem:[%s6162_s0 + $0x2d8] sm:$0xff] }
 0x14f   :  { %v4961_v53 = vadd.f32 %v1933_v33, %v1885_v51  ;;  %v859_v63 = vpack.c.bf16 %v531_v13, %v529_v54  ;;  %v171_v33 = vld [vmem:[%s6162_s0 + $0x4f8] sm:$0xff]  ;;  %v493_v29 = vmax.f32 %v101_v39, 0.0  ;;  %v495_v30 = vmax.f32 %v103_v12, 0.0  ;;  %v3397_v39 = vld [vmem:[%s6163_s1 + $0x2c] sm:$0xf] }
 0x150   :  { %v1788_v24 = vpop.f32.mrf.mxu2  ;;  %v563_v34 = vmax.f32 %v171_v33, 0.0  ;;  %v3004_v12 = vld [vmem:[%s6163_s1 + $0x5c] sm:$0xf0] }
 0x151   :  { %v1789_v14 = vadd.f32 %v1788_v24, %v4474_v60  ;;  %v1837_v9 = vpop.f32.mrf.mxu3  ;;  %2433 = vmatpush.bf16.msra.mxu0 %v859_v63  ;;  %v169_v60 = vld [vmem:[%s6162_s0 + $0x4e8] sm:$0xff] }
 0x152   :  { %v1889_v45 = vpop.f32.mrf.mxu0  ;;  %v561_v10 = vmax.f32 %v169_v60, 0.0  ;;  %v841_v60 = vpack.c.bf16 %v495_v30, %v493_v29 }
 0x153   :  { %v1838_v15 = vadd.f32 %v1837_v9, %v1789_v14 }
 0x154   :  { %v1938_v32 = vpop.f32.mrf.mxu1  ;;  %v875_v2 = vpack.c.bf16 %v563_v34, %v561_v10  ;;  %2385 = vmatpush.bf16.msra.mxu3 %v841_v60  ;;  %v135_v10 = vld [vmem:[%s6162_s0 + $0x3d8] sm:$0xff]  ;;  %v3010_v34 = vld [vmem:[%s6163_s1 + $0x30] sm:$0xf] }
 0x155   :  { %v1887_v46 = vadd.f32 %v1886_v61, %v1838_v15  ;;  %1986 = vmatmul.bf16.gmra.mxu2 %v4964_v57  ;;  %2084 = vmatmul.bf16.gmra.mxu0 %v4966_v8  ;;  %v69_v15 = vld [vmem:[%s6162_s0 + $0x1c8] sm:$0xff]  ;;  %v71_v61 = vld [vmem:[%s6162_s0 + $0x1d8] sm:$0xff] }
 0x156   :  { %2035 = vmatmul.bf16.gmra.mxu3 %v4968_v48  ;;  %v461_v51 = vmax.f32 %v69_v15, 0.0  ;;  %v463_v38 = vmax.f32 %v71_v61, 0.0  ;;  %2482 = vmatpush.bf16.msra.mxu1 %v875_v2  ;;  %v3002_v61 = vld [vmem:[%s6163_s1 + $0x28] sm:$0xf] }
 0x157   :  { %2133 = vmatmul.bf16.gmra.mxu1 %v4970_v27  ;;  %v4994_v54 = vadd.f32 %v1935_v35, %v1887_v46  ;;  %v3403_v35 = vld [vmem:[%s6163_s1 + $0x58] sm:$0xf0] }
 0x158   :  { %v1791_v13 = vpop.f32.mrf.mxu2  ;;  %v825_v14 = vpack.c.bf16 %v463_v38, %v461_v51  ;;  %v527_v38 = vmax.f32 %v135_v10, 0.0 }
 0x159   :  { %v1792_v24 = vadd.f32 %v1791_v13, %v4504_v55  ;;  %v1840_v63 = vpop.f32.mrf.mxu3  ;;  %v133_v55 = vld [vmem:[%s6162_s0 + $0x3c8] sm:$0xff] }
 0x15a   :  { %v1891_v9 = vpop.f32.mrf.mxu0  ;;  %2336 = vmatpush.bf16.msra.mxu2 %v825_v14  ;;  %v525_v51 = vmax.f32 %v133_v55, 0.0 }
 0x15b   :  { %v1841_v33 = vadd.f32 %v1840_v63, %v1792_v24  ;;  %v5024_v63 = vor.u32 %v3403_v35, %v3002_v61  ;;  %v67_v35 = vld [vmem:[%s6162_s0 + $0x1b8] sm:$0xff] }
 0x15c   :  { %v1940_v15 = vpop.f32.mrf.mxu1  ;;  %v857_v29 = vpack.c.bf16 %v527_v38, %v525_v51  ;;  %v97_v51 = vld [vmem:[%s6162_s0 + $0x2a8] sm:$0xff] }
 0x15d   :  { %v1890_v46 = vadd.f32 %v1889_v45, %v1841_v33  ;;  %v3404_v45 = vld [vmem:[%s6163_s1 + $0x60] sm:$0xf0]  ;;  %6291 = vst [vmem:[#allocation57_spill] sm:$0xff] %v5024_v63  ;;  %v5028_v33 = vor.u32 %v3397_v39, %v3004_v12 }
 0x15e   :  { %v5026_v14 = vor.u32 %v3404_v45, %v3010_v34  ;;  %2434 = vmatpush.bf16.msra.mxu0 %v857_v29  ;;  %v459_v45 = vmax.f32 %v67_v35, 0.0 }
 0x15f   :  { %v5021_v13 = vadd.f32 %v1938_v32, %v1890_v46  ;;  %v167_v32 = vld [vmem:[%s6162_s0 + $0x4d8] sm:$0xff] }
 0x160   :  { %v1793_v2 = vpop.f32.mrf.mxu2  ;;  %6292 = vst [vmem:[#allocation58_spill] sm:$0xff] %v5026_v14  ;;  %v559_v46 = vmax.f32 %v167_v32, 0.0 }
 0x161   :  { %v1794_v30 = vadd.f32 %v1793_v2, %v4536_v7  ;;  %v1842_v24 = vpop.f32.mrf.mxu3  ;;  %v165_v7 = vld [vmem:[%s6162_s0 + $0x4c8] sm:$0xff]  ;;  %v489_v2 = vmax.f32 %v97_v51, 0.0  ;;  %v3410_v51 = vld [vmem:[%s6163_s1 + $0x94] sm:$0xf] }
 0x162   :  { %v2050_v60 = vpop.f32.mrf.mxu0  ;;  %v557_v61 = vmax.f32 %v165_v7, 0.0 }
 0x163   :  { %v1843_v55 = vadd.f32 %v1842_v24, %v1794_v30 }
 0x164   :  { %v2099_v10 = vpop.f32.mrf.mxu1  ;;  %v873_v12 = vpack.c.bf16 %v559_v46, %v557_v61  ;;  %v131_v61 = vld [vmem:[%s6162_s0 + $0x3b8] sm:$0xff] }
 0x165   :  { %v1892_v27 = vadd.f32 %v1891_v9, %v1843_v55  ;;  %2147 = vmatmul.bf16.vlgmr.msrb.gmra.mxu2 %v5024_v63  ;;  %3376 = vmatmul.msk.bf16.vlgmr.msrb.gmra.mxu0 %vm1624_vm0, %v5026_v14  ;;  %v65_v9 = vld [vmem:[%s6162_s0 + $0x1a8] sm:$0xff]  ;;  %v3054_v14 = vld [vmem:[%s6163_s1 + $0x90] sm:$0xf]  ;;  %v3062_v46 = vld [vmem:[%s6163_s1 + $0x98] sm:$0xf] }
 0x166   :  { %2196 = vmatmul.bf16.vlgmr.msrb.gmra.mxu3 %v5028_v33  ;;  %v457_v34 = vmax.f32 %v65_v9, 0.0  ;;  %2483 = vmatpush.bf16.msra.mxu1 %v873_v12 }
 0x167   :  { %2294 = vmatmul.bf16.vlgmr.msrb.gmra.mxu1 %v3708_v58  ;;  %v99_v58 = vld [vmem:[%s6162_s0 + $0x2b8] sm:$0xff]  ;;  %v5053_v38 = vadd.f32 %v1940_v15, %v1892_v27  ;;  %v3416_v15 = vld [vmem:[%s6163_s1 + $0xc0] sm:$0xf0] }
 0x168   :  { %v1952_v39 = vpop.f32.mrf.mxu2  ;;  %v491_v29 = vmax.f32 %v99_v58, 0.0  ;;  %v823_v55 = vpack.c.bf16 %v459_v45, %v457_v34  ;;  %v523_v45 = vmax.f32 %v131_v61, 0.0  ;;  %v3056_v58 = vld [vmem:[%s6163_s1 + $0xc4] sm:$0xf0] }
 0x169   :  { %v1953_v30 = vadd.f32 %v1952_v39, %v4589_v62  ;;  %v2001_v24 = vpop.f32.mrf.mxu3  ;;  %v129_v62 = vld [vmem:[%s6162_s0 + $0x3a8] sm:$0xff] }
 0x16a   :  { %v2052_v7 = vpop.f32.mrf.mxu0  ;;  %v839_v32 = vpack.c.bf16 %v491_v29, %v489_v2  ;;  %2337 = vmatpush.bf16.msra.mxu2 %v823_v55  ;;  %v521_v34 = vmax.f32 %v129_v62, 0.0 }
 0x16b   :  { %v2002_v9 = vadd.f32 %v2001_v24, %v1953_v30  ;;  %v5083_v24 = vor.u32 %v3416_v15, %v3054_v14  ;;  %v163_v14 = vld [vmem:[%s6162_s0 + $0x4b8] sm:$0xff] }
 0x16c   :  { %v2101_v35 = vpop.f32.mrf.mxu1  ;;  %2386 = vmatpush.bf16.msra.mxu3 %v839_v32  ;;  %v855_v2 = vpack.c.bf16 %v523_v45, %v521_v34  ;;  %v63_v15 = vld [vmem:[%s6162_s0 + $0x198] sm:$0xff]  ;;  %v93_v34 = vld [vmem:[%s6162_s0 + $0x288] sm:$0xff] }
 0x16d   :  { %v2051_v27 = vadd.f32 %v2050_v60, %v2002_v9  ;;  %v3417_v60 = vld [vmem:[%s6163_s1 + $0xc8] sm:$0xf0]  ;;  %6293 = vst [vmem:[#allocation59_spill] sm:$0xff] %v5083_v24  ;;  %v5087_v9 = vor.u32 %v3410_v51, %v3056_v58 }
 0x16e   :  { %v5085_v55 = vor.u32 %v3417_v60, %v3062_v46  ;;  %2435 = vmatpush.bf16.msra.mxu0 %v855_v2  ;;  %v455_v60 = vmax.f32 %v63_v15, 0.0 }
 0x16f   :  { %v5080_v39 = vadd.f32 %v2099_v10, %v2051_v27  ;;  %v555_v27 = vmax.f32 %v163_v14, 0.0 }
 0x170   :  { %v1954_v12 = vpop.f32.mrf.mxu2  ;;  %6294 = vst [vmem:[#allocation60_spill] sm:$0xff] %v5085_v55 }
 0x171   :  { %v1955_v29 = vadd.f32 %v1954_v12, %v4622_v28  ;;  %v2003_v30 = vpop.f32.mrf.mxu3  ;;  %v161_v28 = vld [vmem:[%s6162_s0 + $0x4a8] sm:$0xff]  ;;  %v485_v12 = vmax.f32 %v93_v34, 0.0  ;;  %v3423_v34 = vld [vmem:[%s6163_s1 + $0xfc] sm:$0xf] }
 0x172   :  { %v2055_v32 = vpop.f32.mrf.mxu0  ;;  %v553_v10 = vmax.f32 %v161_v28, 0.0 }
 0x173   :  { %v2004_v62 = vadd.f32 %v2003_v30, %v1955_v29 }
 0x174   :  { %v2104_v61 = vpop.f32.mrf.mxu1  ;;  %v871_v58 = vpack.c.bf16 %v555_v27, %v553_v10  ;;  %v127_v10 = vld [vmem:[%s6162_s0 + $0x398] sm:$0xff]  ;;  %v3114_v27 = vld [vmem:[%s6163_s1 + $0x100] sm:$0xf] }
 0x175   :  { %v2053_v63 = vadd.f32 %v2052_v7, %v2004_v62  ;;  %2152 = vmatmul.bf16.gmra.mxu2 %v5083_v24  ;;  %3377 = vmatmul.msk.bf16.gmra.mxu0 %vm1624_vm0, %v5085_v55  ;;  %v61_v7 = vld [vmem:[%s6162_s0 + $0x188] sm:$0xff]  ;;  %v3106_v55 = vld [vmem:[%s6163_s1 + $0xf8] sm:$0xf] }
 0x176   :  { %2201 = vmatmul.bf16.gmra.mxu3 %v5087_v9  ;;  %v453_v46 = vmax.f32 %v61_v7, 0.0  ;;  %2484 = vmatpush.bf16.msra.mxu1 %v871_v58 }
 0x177   :  { %2299 = vmatmul.bf16.gmra.mxu1 %v3820_v19  ;;  %v95_v19 = vld [vmem:[%s6162_s0 + $0x298] sm:$0xff]  ;;  %v5112_v45 = vadd.f32 %v2101_v35, %v2053_v63  ;;  %v3429_v35 = vld [vmem:[%s6163_s1 + $0x128] sm:$0xf0] }
 0x178   :  { %v1957_v51 = vpop.f32.mrf.mxu2  ;;  %v487_v2 = vmax.f32 %v95_v19, 0.0  ;;  %v821_v62 = vpack.c.bf16 %v455_v60, %v453_v46  ;;  %v519_v60 = vmax.f32 %v127_v10, 0.0  ;;  %v3108_v19 = vld [vmem:[%s6163_s1 + $0x12c] sm:$0xf0] }
 0x179   :  { %v1958_v29 = vadd.f32 %v1957_v51, %v4649_v37  ;;  %v2006_v30 = vpop.f32.mrf.mxu3  ;;  %v125_v37 = vld [vmem:[%s6162_s0 + $0x388] sm:$0xff] }
 0x17a   :  { %v2057_v28 = vpop.f32.mrf.mxu0  ;;  %v837_v14 = vpack.c.bf16 %v487_v2, %v485_v12  ;;  %2338 = vmatpush.bf16.msra.mxu2 %v821_v62  ;;  %v517_v46 = vmax.f32 %v125_v37, 0.0 }
 0x17b   :  { %v2007_v7 = vadd.f32 %v2006_v30, %v1958_v29  ;;  %v5142_v30 = vor.u32 %v3429_v35, %v3106_v55  ;;  %v159_v55 = vld [vmem:[%s6162_s0 + $0x498] sm:$0xff] }
 0x17c   :  { %v2106_v15 = vpop.f32.mrf.mxu1  ;;  %2387 = vmatpush.bf16.msra.mxu3 %v837_v14  ;;  %v853_v12 = vpack.c.bf16 %v519_v60, %v517_v46  ;;  %v59_v35 = vld [vmem:[%s6162_s0 + $0x178] sm:$0xff]  ;;  %v89_v46 = vld [vmem:[%s6162_s0 + $0x268] sm:$0xff] }
 0x17d   :  { %v2056_v63 = vadd.f32 %v2055_v32, %v2007_v7  ;;  %v3430_v32 = vld [vmem:[%s6163_s1 + $0x130] sm:$0xf0]  ;;  %6295 = vst [vmem:[#allocation61_spill] sm:$0xff] %v5142_v30  ;;  %v5146_v7 = vor.u32 %v3423_v34, %v3108_v19 }
 0x17e   :  { %v5144_v62 = vor.u32 %v3430_v32, %v3114_v27  ;;  %2436 = vmatpush.bf16.msra.mxu0 %v853_v12  ;;  %v451_v32 = vmax.f32 %v59_v35, 0.0 }
 0x17f   :  { %v5139_v51 = vadd.f32 %v2104_v61, %v2056_v63  ;;  %v551_v63 = vmax.f32 %v159_v55, 0.0 }
 0x180   :  { %v1959_v58 = vpop.f32.mrf.mxu2  ;;  %6296 = vst [vmem:[#allocation62_spill] sm:$0xff] %v5144_v62 }
 0x181   :  { %v1960_v2 = vadd.f32 %v1959_v58, %v4682_v31  ;;  %v2008_v29 = vpop.f32.mrf.mxu3  ;;  %v157_v31 = vld [vmem:[%s6162_s0 + $0x488] sm:$0xff]  ;;  %v481_v58 = vmax.f32 %v89_v46, 0.0  ;;  %v3436_v46 = vld [vmem:[%s6163_s1 + $0x164] sm:$0xf] }
 0x182   :  { %v2060_v14 = vpop.f32.mrf.mxu0  ;;  %v549_v61 = vmax.f32 %v157_v31, 0.0 }
 0x183   :  { %v2009_v37 = vadd.f32 %v2008_v29, %v1960_v2 }
 0x184   :  { %v2109_v10 = vpop.f32.mrf.mxu1  ;;  %v869_v19 = vpack.c.bf16 %v551_v63, %v549_v61  ;;  %v123_v61 = vld [vmem:[%s6162_s0 + $0x378] sm:$0xff]  ;;  %v3166_v63 = vld [vmem:[%s6163_s1 + $0x168] sm:$0xf] }
 0x185   :  { %v2058_v24 = vadd.f32 %v2057_v28, %v2009_v37  ;;  %2157 = vmatmul.bf16.gmra.mxu2 %v5142_v30  ;;  %3378 = vmatmul.msk.bf16.gmra.mxu0 %vm1624_vm0, %v5144_v62  ;;  %v57_v28 = vld [vmem:[%s6162_s0 + $0x168] sm:$0xff]  ;;  %v3158_v62 = vld [vmem:[%s6163_s1 + $0x160] sm:$0xf] }
 0x186   :  { %2206 = vmatmul.bf16.gmra.mxu3 %v5146_v7  ;;  %v449_v27 = vmax.f32 %v57_v28, 0.0  ;;  %2485 = vmatpush.bf16.msra.mxu1 %v869_v19 }
 0x187   :  { %2304 = vmatmul.bf16.gmra.mxu1 %v3910_v23  ;;  %v91_v23 = vld [vmem:[%s6162_s0 + $0x278] sm:$0xff]  ;;  %v5171_v60 = vadd.f32 %v2106_v15, %v2058_v24  ;;  %v3442_v15 = vld [vmem:[%s6163_s1 + $0x190] sm:$0xf0] }
 0x188   :  { %v1962_v34 = vpop.f32.mrf.mxu2  ;;  %v483_v12 = vmax.f32 %v91_v23, 0.0  ;;  %v819_v37 = vpack.c.bf16 %v451_v32, %v449_v27  ;;  %v515_v32 = vmax.f32 %v123_v61, 0.0  ;;  %v3160_v23 = vld [vmem:[%s6163_s1 + $0x194] sm:$0xf0] }
 0x189   :  { %v1963_v2 = vadd.f32 %v1962_v34, %v4715_v52  ;;  %v2011_v29 = vpop.f32.mrf.mxu3  ;;  %v121_v52 = vld [vmem:[%s6162_s0 + $0x368] sm:$0xff] }
 0x18a   :  { %v2062_v31 = vpop.f32.mrf.mxu0  ;;  %v835_v55 = vpack.c.bf16 %v483_v12, %v481_v58  ;;  %2339 = vmatpush.bf16.msra.mxu2 %v819_v37  ;;  %v513_v27 = vmax.f32 %v121_v52, 0.0 }
 0x18b   :  { %v2012_v28 = vadd.f32 %v2011_v29, %v1963_v2  ;;  %v5201_v29 = vor.u32 %v3442_v15, %v3158_v62  ;;  %v155_v62 = vld [vmem:[%s6162_s0 + $0x478] sm:$0xff] }
 0x18c   :  { %v2111_v35 = vpop.f32.mrf.mxu1  ;;  %2388 = vmatpush.bf16.msra.mxu3 %v835_v55  ;;  %v851_v58 = vpack.c.bf16 %v515_v32, %v513_v27  ;;  %v55_v15 = vld [vmem:[%s6162_s0 + $0x158] sm:$0xff]  ;;  %v85_v27 = vld [vmem:[%s6162_s0 + $0x248] sm:$0xff] }
 0x18d   :  { %v2061_v24 = vadd.f32 %v2060_v14, %v2012_v28  ;;  %v3443_v14 = vld [vmem:[%s6163_s1 + $0x198] sm:$0xf0]  ;;  %6297 = vst [vmem:[#allocation63_spill] sm:$0xff] %v5201_v29  ;;  %v5205_v28 = vor.u32 %v3436_v46, %v3160_v23 }
 0x18e   :  { %v5203_v37 = vor.u32 %v3443_v14, %v3166_v63  ;;  %2437 = vmatpush.bf16.msra.mxu0 %v851_v58  ;;  %v447_v14 = vmax.f32 %v55_v15, 0.0 }
 0x18f   :  { %v5198_v34 = vadd.f32 %v2109_v10, %v2061_v24  ;;  %v547_v24 = vmax.f32 %v155_v62, 0.0 }
 0x190   :  { %v1964_v19 = vpop.f32.mrf.mxu2  ;;  %6298 = vst [vmem:[#allocation64_spill] sm:$0xff] %v5203_v37 }
 0x191   :  { %v1965_v12 = vadd.f32 %v1964_v19, %v4748_v20  ;;  %v2013_v2 = vpop.f32.mrf.mxu3  ;;  %v153_v20 = vld [vmem:[%s6162_s0 + $0x468] sm:$0xff]  ;;  %v477_v19 = vmax.f32 %v85_v27, 0.0 }
 0x192   :  { %v2065_v55 = vpop.f32.mrf.mxu0  ;;  %v545_v10 = vmax.f32 %v153_v20, 0.0  ;;  %v3449_v27 = vld [vmem:[%s6163_s1 + $0x1cc] sm:$0xf] }
 0x193   :  { %v2014_v52 = vadd.f32 %v2013_v2, %v1965_v12 }
 0x194   :  { %v2114_v61 = vpop.f32.mrf.mxu1  ;;  %v867_v23 = vpack.c.bf16 %v547_v24, %v545_v10  ;;  %v119_v10 = vld [vmem:[%s6162_s0 + $0x358] sm:$0xff]  ;;  %v3218_v24 = vld [vmem:[%s6163_s1 + $0x1d0] sm:$0xf] }
 0x195   :  { %v2063_v30 = vadd.f32 %v2062_v31, %v2014_v52  ;;  %2162 = vmatmul.bf16.gmra.mxu2 %v5201_v29  ;;  %3379 = vmatmul.msk.bf16.gmra.mxu0 %vm1624_vm0, %v5203_v37  ;;  %v53_v31 = vld [vmem:[%s6162_s0 + $0x148] sm:$0xff] }
 0x196   :  { %2211 = vmatmul.bf16.gmra.mxu3 %v5205_v28  ;;  %v445_v63 = vmax.f32 %v53_v31, 0.0  ;;  %2486 = vmatpush.bf16.msra.mxu1 %v867_v23  ;;  %v3210_v37 = vld [vmem:[%s6163_s1 + $0x1c8] sm:$0xf] }
 0x197   :  { %2309 = vmatmul.bf16.gmra.mxu1 %v3976_v1  ;;  %v87_v1 = vld [vmem:[%s6162_s0 + $0x258] sm:$0xff]  ;;  %v5230_v32 = vadd.f32 %v2111_v35, %v2063_v30 }
 0x198   :  { %v1967_v46 = vpop.f32.mrf.mxu2  ;;  %v479_v58 = vmax.f32 %v87_v1, 0.0  ;;  %v817_v52 = vpack.c.bf16 %v447_v14, %v445_v63  ;;  %v3455_v35 = vld [vmem:[%s6163_s1 + $0x1f8] sm:$0xf0]  ;;  %v511_v14 = vmax.f32 %v119_v10, 0.0  ;;  %v3212_v1 = vld [vmem:[%s6163_s1 + $0x1fc] sm:$0xf0] }
 0x199   :  { %v1968_v12 = vadd.f32 %v1967_v46, %v4775_v36  ;;  %v2016_v2 = vpop.f32.mrf.mxu3  ;;  %v117_v36 = vld [vmem:[%s6162_s0 + $0x348] sm:$0xff] }
 0x19a   :  { %v2067_v20 = vpop.f32.mrf.mxu0  ;;  %v833_v62 = vpack.c.bf16 %v479_v58, %v477_v19  ;;  %2340 = vmatpush.bf16.msra.mxu2 %v817_v52  ;;  %v509_v63 = vmax.f32 %v117_v36, 0.0 }
 0x19b   :  { %v2017_v31 = vadd.f32 %v2016_v2, %v1968_v12  ;;  %v5260_v2 = vor.u32 %v3455_v35, %v3210_v37  ;;  %v151_v37 = vld [vmem:[%s6162_s0 + $0x458] sm:$0xff] }
 0x19c   :  { %v2116_v15 = vpop.f32.mrf.mxu1  ;;  %2389 = vmatpush.bf16.msra.mxu3 %v833_v62  ;;  %v849_v19 = vpack.c.bf16 %v511_v14, %v509_v63  ;;  %v51_v35 = vld [vmem:[%s6162_s0 + $0x138] sm:$0xff]  ;;  %v81_v63 = vld [vmem:[%s6162_s0 + $0x228] sm:$0xff] }
 0x19d   :  { %v2066_v30 = vadd.f32 %v2065_v55, %v2017_v31  ;;  %v3456_v55 = vld [vmem:[%s6163_s1 + $0x200] sm:$0xf0]  ;;  %6299 = vst [vmem:[#allocation65_spill] sm:$0xff] %v5260_v2  ;;  %v5264_v31 = vor.u32 %v3449_v27, %v3212_v1 }
 0x19e   :  { %v5262_v52 = vor.u32 %v3456_v55, %v3218_v24  ;;  %2438 = vmatpush.bf16.msra.mxu0 %v849_v19  ;;  %v443_v55 = vmax.f32 %v51_v35, 0.0 }
 0x19f   :  { %v5257_v46 = vadd.f32 %v2114_v61, %v2066_v30  ;;  %v543_v30 = vmax.f32 %v151_v37, 0.0 }
 0x1a0   :  { %v1969_v23 = vpop.f32.mrf.mxu2  ;;  %6300 = vst [vmem:[#allocation66_spill] sm:$0xff] %v5262_v52 }
 0x1a1   :  { %v1970_v58 = vadd.f32 %v1969_v23, %v4808_v43  ;;  %v2018_v12 = vpop.f32.mrf.mxu3  ;;  %v149_v43 = vld [vmem:[%s6162_s0 + $0x448] sm:$0xff]  ;;  %v473_v23 = vmax.f32 %v81_v63, 0.0  ;;  %v3462_v63 = vld [vmem:[%s6163_s1 + $0x234] sm:$0xf] }
 0x1a2   :  { %v2070_v62 = vpop.f32.mrf.mxu0  ;;  %v541_v61 = vmax.f32 %v149_v43, 0.0 }
 0x1a3   :  { %v2019_v36 = vadd.f32 %v2018_v12, %v1970_v58 }
 0x1a4   :  { %v2119_v10 = vpop.f32.mrf.mxu1  ;;  %v865_v1 = vpack.c.bf16 %v543_v30, %v541_v61  ;;  %v115_v61 = vld [vmem:[%s6162_s0 + $0x338] sm:$0xff] }
 0x1a5   :  { %v2068_v29 = vadd.f32 %v2067_v20, %v2019_v36  ;;  %2167 = vmatmul.bf16.gmra.mxu2 %v5260_v2  ;;  %3380 = vmatmul.msk.bf16.gmra.mxu0 %vm1624_vm0, %v5262_v52  ;;  %v49_v20 = vld [vmem:[%s6162_s0 + $0x128] sm:$0xff]  ;;  %v3262_v52 = vld [vmem:[%s6163_s1 + $0x230] sm:$0xf]  ;;  %v3270_v30 = vld [vmem:[%s6163_s1 + $0x238] sm:$0xf] }
 0x1a6   :  { %2216 = vmatmul.bf16.gmra.mxu3 %v5264_v31  ;;  %v441_v24 = vmax.f32 %v49_v20, 0.0  ;;  %2487 = vmatpush.bf16.msra.mxu1 %v865_v1 }
 0x1a7   :  { %2314 = vmatmul.bf16.gmra.mxu1 %v3704_v56  ;;  %v83_v56 = vld [vmem:[%s6162_s0 + $0x238] sm:$0xff]  ;;  %v5289_v14 = vadd.f32 %v2116_v15, %v2068_v29  ;;  %v3468_v15 = vld [vmem:[%s6163_s1 + $0x260] sm:$0xf0] }
 0x1a8   :  { %v1972_v27 = vpop.f32.mrf.mxu2  ;;  %v475_v19 = vmax.f32 %v83_v56, 0.0  ;;  %v815_v36 = vpack.c.bf16 %v443_v55, %v441_v24  ;;  %v507_v55 = vmax.f32 %v115_v61, 0.0  ;;  %v3264_v56 = vld [vmem:[%s6163_s1 + $0x264] sm:$0xf0] }
 0x1a9   :  { %v1973_v58 = vadd.f32 %v1972_v27, %v4835_v50  ;;  %v2021_v12 = vpop.f32.mrf.mxu3  ;;  %v113_v50 = vld [vmem:[%s6162_s0 + $0x328] sm:$0xff] }
 0x1aa   :  { %v2072_v43 = vpop.f32.mrf.mxu0  ;;  %v831_v37 = vpack.c.bf16 %v475_v19, %v473_v23  ;;  %2341 = vmatpush.bf16.msra.mxu2 %v815_v36  ;;  %v505_v24 = vmax.f32 %v113_v50, 0.0 }
 0x1ab   :  { %v2022_v20 = vadd.f32 %v2021_v12, %v1973_v58  ;;  %v5319_v12 = vor.u32 %v3468_v15, %v3262_v52  ;;  %v147_v52 = vld [vmem:[%s6162_s0 + $0x438] sm:$0xff] }
 0x1ac   :  { %v2121_v35 = vpop.f32.mrf.mxu1  ;;  %2390 = vmatpush.bf16.msra.mxu3 %v831_v37  ;;  %v847_v23 = vpack.c.bf16 %v507_v55, %v505_v24  ;;  %v47_v15 = vld [vmem:[%s6162_s0 + $0x118] sm:$0xff]  ;;  %v77_v24 = vld [vmem:[%s6162_s0 + $0x208] sm:$0xff] }
 0x1ad   :  { %v2071_v29 = vadd.f32 %v2070_v62, %v2022_v20  ;;  %v3469_v62 = vld [vmem:[%s6163_s1 + $0x268] sm:$0xf0]  ;;  %6301 = vst [vmem:[#allocation67_spill] sm:$0xff] %v5319_v12  ;;  %v5323_v20 = vor.u32 %v3462_v63, %v3264_v56 }
 0x1ae   :  { %v5321_v36 = vor.u32 %v3469_v62, %v3270_v30  ;;  %2439 = vmatpush.bf16.msra.mxu0 %v847_v23  ;;  %v439_v62 = vmax.f32 %v47_v15, 0.0 }
 0x1af   :  { %v5316_v27 = vadd.f32 %v2119_v10, %v2071_v29  ;;  %6303 = vst [vmem:[#allocation69_spill] sm:$0xff] %v5323_v20  ;;  %v539_v29 = vmax.f32 %v147_v52, 0.0 }
 0x1b0   :  { %v1974_v1 = vpop.f32.mrf.mxu2  ;;  %6302 = vst [vmem:[#allocation68_spill] sm:$0xff] %v5321_v36 }
 0x1b1   :  { %v1975_v19 = vadd.f32 %v1974_v1, %v4868_v47  ;;  %v2023_v58 = vpop.f32.mrf.mxu3  ;;  %v145_v47 = vld [vmem:[%s6162_s0 + $0x428] sm:$0xff]  ;;  %v469_v1 = vmax.f32 %v77_v24, 0.0  ;;  %v3475_v24 = vld [vmem:[%s6163_s1 + $0x29c] sm:$0xf] }
 0x1b2   :  { %v2075_v37 = vpop.f32.mrf.mxu0  ;;  %v537_v10 = vmax.f32 %v145_v47, 0.0 }
 0x1b3   :  { %v2024_v50 = vadd.f32 %v2023_v58, %v1975_v19 }
 0x1b4   :  { %v2124_v61 = vpop.f32.mrf.mxu1  ;;  %v863_v56 = vpack.c.bf16 %v539_v29, %v537_v10  ;;  %v111_v10 = vld [vmem:[%s6162_s0 + $0x318] sm:$0xff]  ;;  %v3322_v29 = vld [vmem:[%s6163_s1 + $0x2a0] sm:$0xf] }
 0x1b5   :  { %v2073_v2 = vadd.f32 %v2072_v43, %v2024_v50  ;;  %2172 = vmatmul.bf16.gmra.mxu2 %v5319_v12  ;;  %3381 = vmatmul.msk.bf16.gmra.mxu0 %vm1624_vm0, %v5321_v36  ;;  %v45_v43 = vld [vmem:[%s6162_s0 + $0x108] sm:$0xff]  ;;  %v3314_v36 = vld [vmem:[%s6163_s1 + $0x298] sm:$0xf] }
 0x1b6   :  { %2221 = vmatmul.bf16.gmra.mxu3 %v5323_v20  ;;  %v437_v30 = vmax.f32 %v45_v43, 0.0  ;;  %2488 = vmatpush.bf16.msra.mxu1 %v863_v56 }
 0x1b7   :  { %2319 = vmatmul.bf16.gmra.mxu1 %v3818_v18  ;;  %v79_v18 = vld [vmem:[%s6162_s0 + $0x218] sm:$0xff]  ;;  %v5348_v55 = vadd.f32 %v2121_v35, %v2073_v2  ;;  %v3481_v35 = vld [vmem:[%s6163_s1 + $0x2c8] sm:$0xf0] }
 0x1b8   :  { %v1977_v63 = vpop.f32.mrf.mxu2  ;;  %v471_v23 = vmax.f32 %v79_v18, 0.0  ;;  %v813_v50 = vpack.c.bf16 %v439_v62, %v437_v30  ;;  %v503_v62 = vmax.f32 %v111_v10, 0.0  ;;  %v3316_v18 = vld [vmem:[%s6163_s1 + $0x2cc] sm:$0xf0] }
 0x1b9   :  { %v1978_v19 = vadd.f32 %v1977_v63, %v4895_v11  ;;  %v2026_v58 = vpop.f32.mrf.mxu3  ;;  %v109_v11 = vld [vmem:[%s6162_s0 + $0x308] sm:$0xff] }
 0x1ba   :  { %v2077_v47 = vpop.f32.mrf.mxu0  ;;  %v829_v52 = vpack.c.bf16 %v471_v23, %v469_v1  ;;  %2342 = vmatpush.bf16.msra.mxu2 %v813_v50  ;;  %v501_v30 = vmax.f32 %v109_v11, 0.0  ;;  %v141_v11 = vld [vmem:[%s6162_s0 + $0x408] sm:$0xff] }
 0x1bb   :  { %v2027_v43 = vadd.f32 %v2026_v58, %v1978_v19  ;;  %v5378_v58 = vor.u32 %v3481_v35, %v3314_v36 }
 0x1bc   :  { %v2126_v15 = vpop.f32.mrf.mxu1  ;;  %2391 = vmatpush.bf16.msra.mxu3 %v829_v52  ;;  %v845_v1 = vpack.c.bf16 %v503_v62, %v501_v30 }
 0x1bd   :  { %v2076_v2 = vadd.f32 %v2075_v37, %v2027_v43  ;;  %v3482_v37 = vld [vmem:[%s6163_s1 + $0x2d0] sm:$0xf0]  ;;  %6304 = vst [vmem:[#allocation70_spill] sm:$0xff] %v5378_v58  ;;  %v5382_v43 = vor.u32 %v3475_v24, %v3316_v18  ;;  %v235_v18 = vld [vmem:[%s6162_s0 + $0x6f8] sm:$0xff] }
 0x1be   :  { %v5380_v50 = vor.u32 %v3482_v37, %v3322_v29  ;;  %2440 = vmatpush.bf16.msra.mxu0 %v845_v1  ;;  %v201_v29 = vld [vmem:[%s6162_s0 + $0x5e8] sm:$0xff]  ;;  %v203_v37 = vld [vmem:[%s6162_s0 + $0x5f8] sm:$0xff] }
 0x1bf   :  { %v5375_v63 = vadd.f32 %v2124_v61, %v2076_v2  ;;  %6306 = vst [vmem:[#allocation72_spill] sm:$0xff] %v5382_v43  ;;  %v143_v61 = vld [vmem:[%s6162_s0 + $0x418] sm:$0xff]  ;;  %v593_v62 = vmax.f32 %v201_v29, 0.0  ;;  %v595_v24 = vmax.f32 %v203_v37, 0.0  ;;  %v3366_v29 = vld [vmem:[%s6163_s1 + $0x300] sm:$0xf] }
 0x1c0   :  { %v1979_v56 = vpop.f32.mrf.mxu2  ;;  %6305 = vst [vmem:[#allocation71_spill] sm:$0xff] %v5380_v50  ;;  %v535_v30 = vmax.f32 %v143_v61, 0.0  ;;  %v3368_v37 = vld [vmem:[%s6163_s1 + $0x334] sm:$0xf0] }
 0x1c1   :  { %v1980_v23 = vadd.f32 %v1979_v56, %v4928_v44  ;;  %v2028_v19 = vpop.f32.mrf.mxu3  ;;  %v533_v44 = vmax.f32 %v141_v11, 0.0  ;;  %v891_v61 = vpack.c.bf16 %v595_v24, %v593_v62  ;;  %v267_v62 = vld [vmem:[%s6162_s0 + $0x7f8] sm:$0xff] }
 0x1c2   :  { %v2080_v52 = vpop.f32.mrf.mxu0 }
 0x1c3   :  { %v2029_v2 = vadd.f32 %v2028_v19, %v1980_v23  ;;  %v861_v35 = vpack.c.bf16 %v535_v30, %v533_v44  ;;  %v627_v23 = vmax.f32 %v235_v18, 0.0  ;;  %2531 = vmatpush.bf16.msrb.mxu2 %v891_v61 }
 0x1c4   :  { %v2129_v10 = vpop.f32.mrf.mxu1 }
 0x1c5   :  { %v2078_v36 = vadd.f32 %v2077_v47, %v2029_v2  ;;  %2177 = vmatmul.bf16.gmra.mxu2 %v5378_v58  ;;  %3382 = vmatmul.msk.bf16.gmra.mxu0 %vm1624_vm0, %v5380_v50  ;;  %v233_v47 = vld [vmem:[%s6162_s0 + $0x6e8] sm:$0xff] }
 0x1c6   :  { %2226 = vmatmul.bf16.gmra.mxu3 %v5382_v43  ;;  %2489 = vmatpush.bf16.msra.mxu1 %v861_v35 }
 0x1c7   :  { %2324 = vmatmul.bf16.gmra.mxu1 %v3908_v22  ;;  %v625_v22 = vmax.f32 %v233_v47, 0.0  ;;  %v5407_v56 = vadd.f32 %v2126_v15, %v2078_v36  ;;  %v3494_v15 = vld [vmem:[%s6163_s1 + $0x330] sm:$0xf0]  ;;  %v3374_v36 = vld [vmem:[%s6163_s1 + $0x308] sm:$0xf] }
 0x1c8   :  { %v1982_v1 = vpop.f32.mrf.mxu2  ;;  %v265_v47 = vld [vmem:[%s6162_s0 + $0x7e8] sm:$0xff] }
 0x1c9   :  { %v1983_v19 = vadd.f32 %v1982_v1, %v4961_v53  ;;  %v2031_v11 = vpop.f32.mrf.mxu3  ;;  %v907_v44 = vpack.c.bf16 %v627_v23, %v625_v22  ;;  %v3488_v53 = vld [vmem:[%s6163_s1 + $0x304] sm:$0xf]  ;;  %v657_v22 = vmax.f32 %v265_v47, 0.0  ;;  %v659_v1 = vmax.f32 %v267_v62, 0.0 }
 0x1ca   :  { %v2082_v2 = vpop.f32.mrf.mxu0 }
 0x1cb   :  { %v2032_v30 = vadd.f32 %v2031_v11, %v1983_v19  ;;  %2580 = vmatpush.bf16.msrb.mxu3 %v907_v44  ;;  %v5437_v11 = vor.u32 %v3494_v15, %v3366_v29  ;;  %v923_v58 = vpack.c.bf16 %v659_v1, %v657_v22 }
 0x1cc   :  { %v2131_v50 = vpop.f32.mrf.mxu1 }
 0x1cd   :  { %v2081_v35 = vadd.f32 %v2080_v52, %v2032_v30  ;;  %v3495_v52 = vld [vmem:[%s6163_s1 + $0x338] sm:$0xf0]  ;;  %v5441_v30 = vor.u32 %v3488_v53, %v3368_v37  ;;  %2629 = vmatpush.bf16.msrb.mxu0 %v923_v58  ;;  %v197_v58 = vld [vmem:[%s6162_s0 + $0x5c8] sm:$0xff] }
 0x1ce   :  { %v5439_v61 = vor.u32 %v3495_v52, %v3374_v36  ;;  %v589_v15 = vmax.f32 %v197_v58, 0.0  ;;  %v229_v53 = vld [vmem:[%s6162_s0 + $0x6c8] sm:$0xff]  ;;  %v231_v36 = vld [vmem:[%s6162_s0 + $0x6d8] sm:$0xff] }
 0x1cf   :  { %v5434_v24 = vadd.f32 %v2129_v10, %v2081_v35  ;;  %v299_v10 = vld [vmem:[%s6162_s0 + $0x8f8] sm:$0xff]  ;;  %v621_v37 = vmax.f32 %v229_v53, 0.0  ;;  %v623_v47 = vmax.f32 %v231_v36, 0.0 }
 0x1d0   :  { %v1984_v18 = vpop.f32.mrf.mxu2  ;;  %v691_v29 = vmax.f32 %v299_v10, 0.0  ;;  %v261_v10 = vld [vmem:[%s6162_s0 + $0x7c8] sm:$0xff] }
 0x1d1   :  { %v1985_v23 = vadd.f32 %v1984_v18, %v4994_v54  ;;  %v2033_v19 = vpop.f32.mrf.mxu3  ;;  %v297_v54 = vld [vmem:[%s6162_s0 + $0x8e8] sm:$0xff] }
 0x1d2   :  { %v2085_v44 = vpop.f32.mrf.mxu0  ;;  %v689_v35 = vmax.f32 %v297_v54, 0.0 }
 0x1d3   :  { %v2034_v43 = vadd.f32 %v2033_v19, %v1985_v23  ;;  %v905_v19 = vpack.c.bf16 %v623_v47, %v621_v37 }
 0x1d4   :  { %v2134_v12 = vpop.f32.mrf.mxu1  ;;  %v939_v18 = vpack.c.bf16 %v691_v29, %v689_v35  ;;  %v653_v35 = vmax.f32 %v261_v10, 0.0 }
 0x1d5   :  { %v2083_v20 = vadd.f32 %v2082_v2, %v2034_v43  ;;  %2182 = vmatmul.bf16.gmra.mxu2 %v5437_v11  ;;  %3383 = vmatmul.msk.bf16.gmra.mxu0 %vm1624_vm0, %v5439_v61 }
 0x1d6   :  { %2231 = vmatmul.bf16.gmra.mxu3 %v5441_v30  ;;  %2678 = vmatpush.bf16.msrb.mxu1 %v939_v18  ;;  %v227_v18 = vld [vmem:[%s6162_s0 + $0x6b8] sm:$0xff] }
 0x1d7   :  { %2329 = vmatmul.bf16.gmra.mxu1 %v3974_v0  ;;  %v5457_v43 = vadd.f32 %v2131_v50, %v2083_v20  ;;  %v199_v0 = vld [vmem:[%s6162_s0 + $0x5d8] sm:$0xff]  ;;  %2581 = vmatpush.bf16.msrb.mxu3 %v905_v19 }
 0x1d8   :  { %v1987_v2 = vpop.f32.mrf.mxu2  ;;  %v591_v50 = vmax.f32 %v199_v0, 0.0 }
 0x1d9   :  { %v1988_v52 = vadd.f32 %v1987_v2, %v5021_v13  ;;  %v2036_v20 = vpop.f32.mrf.mxu3  ;;  %v263_v13 = vld [vmem:[%s6162_s0 + $0x7d8] sm:$0xff] }
 0x1da   :  { %v2087_v62 = vpop.f32.mrf.mxu0  ;;  %v889_v23 = vpack.c.bf16 %v591_v50, %v589_v15  ;;  %v655_v29 = vmax.f32 %v263_v13, 0.0  ;;  %v193_v50 = vld [vmem:[%s6162_s0 + $0x5a8] sm:$0xff] }
 0x1db   :  { %v2037_v22 = vadd.f32 %v2036_v20, %v1988_v52 }
 0x1dc   :  { %v2136_v1 = vpop.f32.mrf.mxu1  ;;  %2532 = vmatpush.bf16.msrb.mxu2 %v889_v23 }
 0x1dd   :  { %v2086_v54 = vadd.f32 %v2085_v44, %v2037_v22  ;;  %v921_v44 = vpack.c.bf16 %v655_v29, %v653_v35 }
 0x1df   :  { %v5475_v58 = vadd.f32 %v2134_v12, %v2086_v54  ;;  %2630 = vmatpush.bf16.msrb.mxu0 %v921_v44  ;;  %v295_v12 = vld [vmem:[%s6162_s0 + $0x8d8] sm:$0xff]  ;;  %v619_v54 = vmax.f32 %v227_v18, 0.0 }
 0x1e0   :  { %v1989_v2 = vpop.f32.mrf.mxu2  ;;  %v687_v47 = vmax.f32 %v295_v12, 0.0  ;;  %v259_v44 = vld [vmem:[%s6162_s0 + $0x7b8] sm:$0xff] }
 0x1e1   :  { %v1990_v0 = vadd.f32 %v1989_v2, %v5053_v38  ;;  %v2038_v15 = vpop.f32.mrf.mxu3  ;;  %v293_v38 = vld [vmem:[%s6162_s0 + $0x8c8] sm:$0xff] }
 0x1e2   :  { %v2246_v53 = vpop.f32.mrf.mxu0 }
 0x1e3   :  { %v2039_v36 = vadd.f32 %v2038_v15, %v1990_v0 }
 0x1e4   :  { %v5478_v52 = vpop.f32.mrf.mxu1 }
 0x1e5   :  { %v2088_v20 = vadd.f32 %v2087_v62, %v2039_v36  ;;  %2343 = vmatmul.bf16.vlgmr.msra.gmra.mxu2 %v3710_v59  ;;  %2441 = vmatmul.bf16.vlgmr.msra.gmra.mxu0 %v4038_v42  ;;  %v685_v42 = vmax.f32 %v293_v38, 0.0  ;;  %v225_v62 = vld [vmem:[%s6162_s0 + $0x6a8] sm:$0xff]  ;;  %v651_v38 = vmax.f32 %v259_v44, 0.0 }
 0x1e6   :  { %2392 = vmatmul.bf16.vlgmr.msra.gmra.mxu3 %v4034_v40  ;;  %v195_v40 = vld [vmem:[%s6162_s0 + $0x5b8] sm:$0xff]  ;;  %v617_v19 = vmax.f32 %v225_v62, 0.0 }
 0x1e7   :  { %2490 = vmatmul.bf16.vlgmr.msra.gmra.mxu1 %v4036_v41  ;;  %v5493_v37 = vadd.f32 %v2136_v1, %v2088_v20  ;;  %v585_v41 = vmax.f32 %v193_v50, 0.0  ;;  %v587_v23 = vmax.f32 %v195_v40, 0.0  ;;  %v937_v13 = vpack.c.bf16 %v687_v47, %v685_v42 }
 0x1e8   :  { %v2148_v59 = vpop.f32.mrf.mxu2  ;;  %v903_v0 = vpack.c.bf16 %v619_v54, %v617_v19 }
 0x1e9   :  { %v2149_v22 = vadd.f32 %v2148_v59, %v5080_v39  ;;  %v2197_v1 = vpop.f32.mrf.mxu3  ;;  %v887_v29 = vpack.c.bf16 %v587_v23, %v585_v41  ;;  %2679 = vmatpush.bf16.msrb.mxu1 %v937_v13  ;;  %v257_v39 = vld [vmem:[%s6162_s0 + $0x7a8] sm:$0xff]  ;;  %v291_v41 = vld [vmem:[%s6162_s0 + $0x8b8] sm:$0xff] }
 0x1ea   :  { %v2248_v10 = vpop.f32.mrf.mxu0  ;;  %2582 = vmatpush.bf16.msrb.mxu3 %v903_v0  ;;  %v649_v20 = vmax.f32 %v257_v39, 0.0  ;;  %v683_v62 = vmax.f32 %v291_v41, 0.0 }
 0x1eb   :  { %v2198_v2 = vadd.f32 %v2197_v1, %v2149_v22  ;;  %2533 = vmatpush.bf16.msrb.mxu2 %v887_v29  ;;  %v221_v22 = vld [vmem:[%s6162_s0 + $0x688] sm:$0xff]  ;;  %v223_v1 = vld [vmem:[%s6162_s0 + $0x698] sm:$0xff] }
 0x1ec   :  { %v5505_v35 = vpop.f32.mrf.mxu1  ;;  %v919_v59 = vpack.c.bf16 %v651_v38, %v649_v20  ;;  %v615_v13 = vmax.f32 %v223_v1, 0.0  ;;  %v255_v20 = vld [vmem:[%s6162_s0 + $0x798] sm:$0xff] }
 0x1ed   :  { %v2247_v15 = vadd.f32 %v2246_v53, %v2198_v2 }
 0x1ee   :  { %2631 = vmatpush.bf16.msrb.mxu0 %v919_v59 }
 0x1ef   :  { %2923 = vst [vmem:[%s6164_s2] sm:$0xff] %v2247_v15 }
 0x1f0   :  { %v2150_v36 = vpop.f32.mrf.mxu2 }
 0x1f1   :  { %v2151_v12 = vadd.f32 %v2150_v36, %v5112_v45  ;;  %v2199_v53 = vpop.f32.mrf.mxu3  ;;  %v289_v45 = vld [vmem:[%s6162_s0 + $0x8a8] sm:$0xff] }
 0x1f2   :  { %v2251_v50 = vpop.f32.mrf.mxu0 }
 0x1f3   :  { %v2200_v42 = vadd.f32 %v2199_v53, %v2151_v12  ;;  %v647_v53 = vmax.f32 %v255_v20, 0.0 }
 0x1f4   :  { %v5517_v47 = vpop.f32.mrf.mxu1 }
 0x1f5   :  { %v2249_v40 = vadd.f32 %v2248_v10, %v2200_v42  ;;  %2348 = vmatmul.bf16.gmra.mxu2 %v3824_v21  ;;  %2446 = vmatmul.bf16.gmra.mxu0 %v4098_v26  ;;  %v189_v21 = vld [vmem:[%s6162_s0 + $0x588] sm:$0xff]  ;;  %v613_v10 = vmax.f32 %v221_v22, 0.0 }
 0x1f6   :  { %2397 = vmatmul.bf16.gmra.mxu3 %v4094_v16  ;;  %v681_v16 = vmax.f32 %v289_v45, 0.0  ;;  %v581_v18 = vmax.f32 %v189_v21, 0.0 }
 0x1f7   :  { %2495 = vmatmul.bf16.gmra.mxu1 %v4096_v17  ;;  %2926 = vst [vmem:[%s6164_s2 + $0x10] sm:$0xff] %v2249_v40  ;;  %v191_v17 = vld [vmem:[%s6162_s0 + $0x598] sm:$0xff]  ;;  %v901_v44 = vpack.c.bf16 %v615_v13, %v613_v10 }
 0x1f8   :  { %v2153_v26 = vpop.f32.mrf.mxu2  ;;  %v583_v54 = vmax.f32 %v191_v17, 0.0  ;;  %v935_v29 = vpack.c.bf16 %v683_v62, %v681_v16  ;;  %v217_v17 = vld [vmem:[%s6162_s0 + $0x668] sm:$0xff] }
 0x1f9   :  { %v2154_v23 = vadd.f32 %v2153_v26, %v5139_v51  ;;  %v2202_v19 = vpop.f32.mrf.mxu3  ;;  %2583 = vmatpush.bf16.msrb.mxu3 %v901_v44  ;;  %v253_v51 = vld [vmem:[%s6162_s0 + $0x788] sm:$0xff]  ;;  %v287_v26 = vld [vmem:[%s6162_s0 + $0x898] sm:$0xff] }
 0x1fa   :  { %v2253_v2 = vpop.f32.mrf.mxu0  ;;  %v885_v39 = vpack.c.bf16 %v583_v54, %v581_v18  ;;  %2680 = vmatpush.bf16.msrb.mxu1 %v935_v29  ;;  %v645_v12 = vmax.f32 %v253_v51, 0.0  ;;  %v679_v16 = vmax.f32 %v287_v26, 0.0  ;;  %v219_v18 = vld [vmem:[%s6162_s0 + $0x678] sm:$0xff] }
 0x1fb   :  { %v2203_v0 = vadd.f32 %v2202_v19, %v2154_v23  ;;  %v609_v19 = vmax.f32 %v217_v17, 0.0  ;;  %v611_v54 = vmax.f32 %v219_v18, 0.0  ;;  %v283_v26 = vld [vmem:[%s6162_s0 + $0x878] sm:$0xff] }
 0x1fc   :  { %v5545_v15 = vpop.f32.mrf.mxu1  ;;  %2534 = vmatpush.bf16.msrb.mxu2 %v885_v39  ;;  %v917_v40 = vpack.c.bf16 %v647_v53, %v645_v12 }
 0x1fd   :  { %v2252_v36 = vadd.f32 %v2251_v50, %v2203_v0  ;;  %v899_v39 = vpack.c.bf16 %v611_v54, %v609_v19 }
 0x1fe   :  { %2632 = vmatpush.bf16.msrb.mxu0 %v917_v40 }
 0x1ff   :  { %2928 = vst [vmem:[%s6164_s2 + $0x20] sm:$0xff] %v2252_v36  ;;  %2584 = vmatpush.bf16.msrb.mxu3 %v899_v39  ;;  %v251_v36 = vld [vmem:[%s6162_s0 + $0x778] sm:$0xff] }
 0x200   :  { %v2155_v38 = vpop.f32.mrf.mxu2 }
 0x201   :  { %v2156_v59 = vadd.f32 %v2155_v38, %v5171_v60  ;;  %v2204_v50 = vpop.f32.mrf.mxu3  ;;  %v285_v60 = vld [vmem:[%s6162_s0 + $0x888] sm:$0xff]  ;;  %v643_v38 = vmax.f32 %v251_v36, 0.0 }
 0x202   :  { %v2256_v42 = vpop.f32.mrf.mxu0 }
 0x203   :  { %v2205_v45 = vadd.f32 %v2204_v50, %v2156_v59 }
 0x204   :  { %v5557_v41 = vpop.f32.mrf.mxu1 }
 0x205   :  { %v2254_v21 = vadd.f32 %v2253_v2, %v2205_v45  ;;  %2353 = vmatmul.bf16.gmra.mxu2 %v3914_v25  ;;  %2451 = vmatmul.bf16.gmra.mxu0 %v4158_v6  ;;  %v185_v25 = vld [vmem:[%s6162_s0 + $0x568] sm:$0xff] }
 0x206   :  { %2402 = vmatmul.bf16.gmra.mxu3 %v4154_v4  ;;  %v677_v4 = vmax.f32 %v285_v60, 0.0  ;;  %v577_v62 = vmax.f32 %v185_v25, 0.0  ;;  %v6308_v60 = vld [vmem:[#allocation10_spill] sm:$0xff] }
 0x207   :  { %2500 = vmatmul.bf16.gmra.mxu1 %v4156_v5  ;;  %2930 = vst [vmem:[%s6164_s2 + $0x30] sm:$0xff] %v2254_v21  ;;  %v187_v5 = vld [vmem:[%s6162_s0 + $0x578] sm:$0xff] }
 0x208   :  { %v2158_v6 = vpop.f32.mrf.mxu2  ;;  %v579_v23 = vmax.f32 %v187_v5, 0.0  ;;  %v933_v13 = vpack.c.bf16 %v679_v16, %v677_v4  ;;  %v6307_v21 = vld [vmem:[#allocation9_spill] sm:$0xff]  ;;  %v213_v5 = vld [vmem:[%s6162_s0 + $0x648] sm:$0xff] }
 0x209   :  { %v2159_v22 = vadd.f32 %v2158_v6, %v5198_v34  ;;  %v2207_v1 = vpop.f32.mrf.mxu3  ;;  %v249_v34 = vld [vmem:[%s6162_s0 + $0x768] sm:$0xff]  ;;  %v675_v6 = vmax.f32 %v283_v26, 0.0  ;;  %v183_v4 = vld [vmem:[%s6162_s0 + $0x558] sm:$0xff] }
 0x20a   :  { %v2258_v10 = vpop.f32.mrf.mxu0  ;;  %v883_v0 = vpack.c.bf16 %v579_v23, %v577_v62  ;;  %2681 = vmatpush.bf16.msrb.mxu1 %v933_v13  ;;  %v641_v20 = vmax.f32 %v249_v34, 0.0  ;;  %v215_v62 = vld [vmem:[%s6162_s0 + $0x658] sm:$0xff] }
 0x20b   :  { %v2208_v2 = vadd.f32 %v2207_v1, %v2159_v22  ;;  %v575_v22 = vmax.f32 %v183_v4, 0.0  ;;  %v605_v1 = vmax.f32 %v213_v5, 0.0  ;;  %v607_v23 = vmax.f32 %v215_v62, 0.0  ;;  %v279_v26 = vld [vmem:[%s6162_s0 + $0x858] sm:$0xff]  ;;  %v209_v5 = vld [vmem:[%s6162_s0 + $0x628] sm:$0xff] }
 0x20c   :  { %v5585_v29 = vpop.f32.mrf.mxu1  ;;  %2535 = vmatpush.bf16.msrb.mxu2 %v883_v0  ;;  %v915_v50 = vpack.c.bf16 %v643_v38, %v641_v20  ;;  %v179_v4 = vld [vmem:[%s6162_s0 + $0x538] sm:$0xff] }
 0x20d   :  { %v2257_v44 = vadd.f32 %v2256_v42, %v2208_v2  ;;  %v897_v0 = vpack.c.bf16 %v607_v23, %v605_v1  ;;  %v211_v62 = vld [vmem:[%s6162_s0 + $0x638] sm:$0xff]  ;;  %v601_v1 = vmax.f32 %v209_v5, 0.0  ;;  %v205_v5 = vld [vmem:[%s6162_s0 + $0x608] sm:$0xff] }
 0x20e   :  { %2633 = vmatpush.bf16.msrb.mxu0 %v915_v50  ;;  %v603_v23 = vmax.f32 %v211_v62, 0.0  ;;  %v207_v62 = vld [vmem:[%s6162_s0 + $0x618] sm:$0xff] }
 0x20f   :  { %2932 = vst [vmem:[%s6164_s2 + $0x40] sm:$0xff] %v2257_v44  ;;  %2585 = vmatpush.bf16.msrb.mxu3 %v897_v0  ;;  %v247_v44 = vld [vmem:[%s6162_s0 + $0x758] sm:$0xff] }
 0x210   :  { %v2160_v51 = vpop.f32.mrf.mxu2 }
 0x211   :  { %v2161_v12 = vadd.f32 %v2160_v51, %v5230_v32  ;;  %v2209_v53 = vpop.f32.mrf.mxu3  ;;  %v281_v32 = vld [vmem:[%s6162_s0 + $0x868] sm:$0xff]  ;;  %v639_v51 = vmax.f32 %v247_v44, 0.0  ;;  %v243_v44 = vld [vmem:[%s6162_s0 + $0x738] sm:$0xff] }
 0x212   :  { %v2261_v59 = vpop.f32.mrf.mxu0  ;;  %v673_v25 = vmax.f32 %v281_v32, 0.0  ;;  %v6312_v32 = vld [vmem:[#allocation13_spill] sm:$0xff] }
 0x213   :  { %v2210_v42 = vadd.f32 %v2209_v53, %v2161_v12 }
 0x214   :  { %v5597_v40 = vpop.f32.mrf.mxu1  ;;  %v931_v54 = vpack.c.bf16 %v675_v6, %v673_v25  ;;  %v671_v6 = vmax.f32 %v279_v26, 0.0  ;;  %v275_v26 = vld [vmem:[%s6162_s0 + $0x838] sm:$0xff] }
 0x215   :  { %v2259_v45 = vadd.f32 %v2258_v10, %v2210_v42  ;;  %2358 = vmatmul.bf16.gmra.mxu2 %v3980_v3  ;;  %2456 = vmatmul.bf16.gmra.mxu0 %v4212_v49  ;;  %v181_v3 = vld [vmem:[%s6162_s0 + $0x548] sm:$0xff] }
 0x216   :  { %2407 = vmatmul.bf16.gmra.mxu3 %v6307_v21  ;;  %v573_v16 = vmax.f32 %v181_v3, 0.0  ;;  %2682 = vmatpush.bf16.msrb.mxu1 %v931_v54  ;;  %v6310_v21 = vld [vmem:[#allocation14_spill] sm:$0xff]  ;;  %v177_v3 = vld [vmem:[%s6162_s0 + $0x528] sm:$0xff] }
 0x217   :  { %2505 = vmatmul.bf16.gmra.mxu1 %v6308_v60  ;;  %2934 = vst [vmem:[%s6164_s2 + $0x50] sm:$0xff] %v2259_v45  ;;  %v6309_v45 = vld [vmem:[#allocation2_spill] sm:$0xff]  ;;  %v6311_v60 = vld [vmem:[#allocation12_spill] sm:$0xff] }
 0x218   :  { %v2163_v49 = vpop.f32.mrf.mxu2  ;;  %v881_v2 = vpack.c.bf16 %v575_v22, %v573_v16  ;;  %v569_v16 = vmax.f32 %v177_v3, 0.0  ;;  %v571_v22 = vmax.f32 %v179_v4, 0.0  ;;  %v173_v3 = vld [vmem:[%s6162_s0 + $0x508] sm:$0xff]  ;;  %v175_v4 = vld [vmem:[%s6162_s0 + $0x518] sm:$0xff] }
 0x219   :  { %v2164_v17 = vadd.f32 %v2163_v49, %v5257_v46  ;;  %v2212_v18 = vpop.f32.mrf.mxu3  ;;  %v245_v46 = vld [vmem:[%s6162_s0 + $0x748] sm:$0xff] }
 0x21a   :  { %v2263_v19 = vpop.f32.mrf.mxu0  ;;  %2536 = vmatpush.bf16.msrb.mxu2 %v881_v2  ;;  %v637_v36 = vmax.f32 %v245_v46, 0.0  ;;  %v879_v0 = vpack.c.bf16 %v571_v22, %v569_v16  ;;  %v565_v16 = vmax.f32 %v173_v3, 0.0  ;;  %v567_v22 = vmax.f32 %v175_v4, 0.0  ;;  %v331_v4 = vld [vmem:[%s6162_s0 + $0x9f8] sm:$0xff] }
 0x21b   :  { %v2213_v10 = vadd.f32 %v2212_v18, %v2164_v17 }
 0x21c   :  { %v5625_v13 = vpop.f32.mrf.mxu1  ;;  %v913_v53 = vpack.c.bf16 %v639_v51, %v637_v36  ;;  %v635_v51 = vmax.f32 %v243_v44, 0.0  ;;  %v239_v44 = vld [vmem:[%s6162_s0 + $0x718] sm:$0xff] }
 0x21d   :  { %v2262_v39 = vadd.f32 %v2261_v59, %v2213_v10 }
 0x21e   :  { %2634 = vmatpush.bf16.msrb.mxu0 %v913_v53  ;;  %2537 = vmatpush.bf16.msrb.mxu2 %v879_v0 }
 0x21f   :  { %2936 = vst [vmem:[%s6164_s2 + $0x60] sm:$0xff] %v2262_v39  ;;  %v895_v39 = vpack.c.bf16 %v603_v23, %v601_v1  ;;  %v597_v1 = vmax.f32 %v205_v5, 0.0  ;;  %v599_v23 = vmax.f32 %v207_v62, 0.0 }
 0x220   :  { %v2165_v34 = vpop.f32.mrf.mxu2 }
 0x221   :  { %v2166_v20 = vadd.f32 %v2165_v34, %v5289_v14  ;;  %v2214_v38 = vpop.f32.mrf.mxu3  ;;  %v277_v14 = vld [vmem:[%s6162_s0 + $0x848] sm:$0xff]  ;;  %2586 = vmatpush.bf16.msrb.mxu3 %v895_v39  ;;  %v877_v39 = vpack.c.bf16 %v567_v22, %v565_v16 }
 0x222   :  { %v2266_v12 = vpop.f32.mrf.mxu0  ;;  %v669_v25 = vmax.f32 %v277_v14, 0.0  ;;  %v6316_v14 = vld [vmem:[#allocation17_spill] sm:$0xff]  ;;  %v361_v16 = vld [vmem:[%s6162_s0 + $0xae8] sm:$0xff] }
 0x223   :  { %v2215_v59 = vadd.f32 %v2214_v38, %v2166_v20  ;;  %2538 = vmatpush.bf16.msrb.mxu2 %v877_v39  ;;  %v753_v22 = vmax.f32 %v361_v16, 0.0 }
 0x224   :  { %v5637_v50 = vpop.f32.mrf.mxu1  ;;  %v929_v54 = vpack.c.bf16 %v671_v6, %v669_v25  ;;  %v667_v6 = vmax.f32 %v275_v26, 0.0  ;;  %v6317_v26 = vld [vmem:[#allocation4_spill] sm:$0xff] }
 0x225   :  { %v2264_v42 = vadd.f32 %v2263_v19, %v2215_v59  ;;  %2363 = vmatmul.bf16.gmra.mxu2 %v6309_v45  ;;  %2461 = vmatmul.bf16.gmra.mxu0 %v6310_v21  ;;  %v6313_v21 = vld [vmem:[#allocation3_spill] sm:$0xff] }
 0x226   :  { %2412 = vmatmul.bf16.gmra.mxu3 %v6311_v60  ;;  %2683 = vmatpush.bf16.msrb.mxu1 %v929_v54  ;;  %v6314_v60 = vld [vmem:[#allocation18_spill] sm:$0xff] }
 0x227   :  { %2510 = vmatmul.bf16.gmra.mxu1 %v6312_v32  ;;  %2938 = vst [vmem:[%s6164_s2 + $0x70] sm:$0xff] %v2264_v42  ;;  %v6315_v32 = vld [vmem:[#allocation16_spill] sm:$0xff] }
 0x228   :  { %v2168_v49 = vpop.f32.mrf.mxu2 }
 0x229   :  { %v2169_v17 = vadd.f32 %v2168_v49, %v5316_v27  ;;  %v2217_v18 = vpop.f32.mrf.mxu3  ;;  %v241_v27 = vld [vmem:[%s6162_s0 + $0x728] sm:$0xff] }
 0x22a   :  { %v2268_v19 = vpop.f32.mrf.mxu0  ;;  %v633_v36 = vmax.f32 %v241_v27, 0.0 }
 0x22b   :  { %v2218_v10 = vadd.f32 %v2217_v18, %v2169_v17 }
 0x22c   :  { %v5665_v2 = vpop.f32.mrf.mxu1  ;;  %v911_v53 = vpack.c.bf16 %v635_v51, %v633_v36  ;;  %v631_v51 = vmax.f32 %v239_v44, 0.0  ;;  %v393_v44 = vld [vmem:[%s6162_s0 + $0xbe8] sm:$0xff] }
 0x22d   :  { %v2267_v46 = vadd.f32 %v2266_v12, %v2218_v10 }
 0x22e   :  { %2635 = vmatpush.bf16.msrb.mxu0 %v911_v53 }
 0x22f   :  { %2940 = vst [vmem:[%s6164_s2 + $0x80] sm:$0xff] %v2267_v46  ;;  %v893_v46 = vpack.c.bf16 %v599_v23, %v597_v1 }
 0x230   :  { %v2170_v34 = vpop.f32.mrf.mxu2 }
 0x231   :  { %v2171_v20 = vadd.f32 %v2170_v34, %v5348_v55  ;;  %v2219_v38 = vpop.f32.mrf.mxu3  ;;  %v273_v55 = vld [vmem:[%s6162_s0 + $0x828] sm:$0xff]  ;;  %2587 = vmatpush.bf16.msrb.mxu3 %v893_v46 }
 0x232   :  { %v2271_v12 = vpop.f32.mrf.mxu0  ;;  %v665_v25 = vmax.f32 %v273_v55, 0.0 }
 0x233   :  { %v2220_v59 = vadd.f32 %v2219_v38, %v2171_v20 }
 0x234   :  { %v5677_v42 = vpop.f32.mrf.mxu1  ;;  %v927_v54 = vpack.c.bf16 %v667_v6, %v665_v25  ;;  %v6320_v25 = vld [vmem:[#allocation21_spill] sm:$0xff]  ;;  %v329_v6 = vld [vmem:[%s6162_s0 + $0x9e8] sm:$0xff] }
 0x235   :  { %v2269_v45 = vadd.f32 %v2268_v19, %v2220_v59  ;;  %2368 = vmatmul.bf16.gmra.mxu2 %v6313_v21  ;;  %2466 = vmatmul.bf16.gmra.mxu0 %v6314_v60  ;;  %v269_v59 = vld [vmem:[%s6162_s0 + $0x808] sm:$0xff]  ;;  %v721_v62 = vmax.f32 %v329_v6, 0.0  ;;  %v327_v6 = vld [vmem:[%s6162_s0 + $0x9d8] sm:$0xff] }
 0x236   :  { %2417 = vmatmul.bf16.gmra.mxu3 %v6315_v32  ;;  %2684 = vmatpush.bf16.msrb.mxu1 %v927_v54  ;;  %v661_v32 = vmax.f32 %v269_v59, 0.0 }
 0x237   :  { %2515 = vmatmul.bf16.gmra.mxu1 %v6316_v14  ;;  %2942 = vst [vmem:[%s6164_s2 + $0x90] sm:$0xff] %v2269_v45  ;;  %v271_v45 = vld [vmem:[%s6162_s0 + $0x818] sm:$0xff] }
 0x238   :  { %v2173_v49 = vpop.f32.mrf.mxu2  ;;  %v663_v14 = vmax.f32 %v271_v45, 0.0 }
 0x239   :  { %v2174_v17 = vadd.f32 %v2173_v49, %v5375_v63  ;;  %v2222_v18 = vpop.f32.mrf.mxu3  ;;  %v237_v63 = vld [vmem:[%s6162_s0 + $0x708] sm:$0xff]  ;;  %v6319_v49 = vld [vmem:[#allocation20_spill] sm:$0xff] }
 0x23a   :  { %v2273_v19 = vpop.f32.mrf.mxu0  ;;  %v629_v36 = vmax.f32 %v237_v63, 0.0  ;;  %v925_v3 = vpack.c.bf16 %v663_v14, %v661_v32  ;;  %v6321_v32 = vld [vmem:[#allocation5_spill] sm:$0xff]  ;;  %v6322_v14 = vld [vmem:[#allocation26_spill] sm:$0xff] }
 0x23b   :  { %v2223_v10 = vadd.f32 %v2222_v18, %v2174_v17  ;;  %v723_v17 = vmax.f32 %v331_v4, 0.0  ;;  %v363_v18 = vld [vmem:[%s6162_s0 + $0xaf8] sm:$0xff]  ;;  %v357_v4 = vld [vmem:[%s6162_s0 + $0xac8] sm:$0xff] }
 0x23c   :  { %v5705_v0 = vpop.f32.mrf.mxu1  ;;  %v909_v53 = vpack.c.bf16 %v631_v51, %v629_v36  ;;  %2685 = vmatpush.bf16.msrb.mxu1 %v925_v3 }
 0x23d   :  { %v2272_v27 = vadd.f32 %v2271_v12, %v2223_v10  ;;  %v955_v10 = vpack.c.bf16 %v723_v17, %v721_v62  ;;  %v359_v62 = vld [vmem:[%s6162_s0 + $0xad8] sm:$0xff]  ;;  %v749_v17 = vmax.f32 %v357_v4, 0.0 }
 0x23e   :  { %2636 = vmatpush.bf16.msrb.mxu0 %v909_v53 }
 0x23f   :  { %2944 = vst [vmem:[%s6164_s2 + $0xa0] sm:$0xff] %v2272_v27  ;;  %2727 = vmatpush.bf16.msra.mxu2 %v955_v10 }
 0x240   :  { %v2175_v34 = vpop.f32.mrf.mxu2 }
 0x241   :  { %v2176_v20 = vadd.f32 %v2175_v34, %v5407_v56  ;;  %v2224_v38 = vpop.f32.mrf.mxu3  ;;  %v6318_v56 = vld [vmem:[#allocation22_spill] sm:$0xff]  ;;  %v395_v34 = vld [vmem:[%s6162_s0 + $0xbf8] sm:$0xff] }
 0x242   :  { %v2276_v12 = vpop.f32.mrf.mxu0  ;;  %v787_v36 = vmax.f32 %v395_v34, 0.0  ;;  %v389_v34 = vld [vmem:[%s6162_s0 + $0xbc8] sm:$0xff] }
 0x243   :  { %v2225_v21 = vadd.f32 %v2224_v38, %v2176_v20 }
 0x244   :  { %v5723_v60 = vpop.f32.mrf.mxu1 }
 0x245   :  { %v2274_v55 = vadd.f32 %v2273_v19, %v2225_v21  ;;  %2373 = vmatmul.bf16.gmra.mxu2 %v6317_v26  ;;  %2471 = vmatmul.bf16.gmra.mxu0 %v6318_v56  ;;  %v755_v19 = vmax.f32 %v363_v18, 0.0  ;;  %v403_v26 = vld [vmem:[%s6162_s0 + $0xc38] sm:$0xff] }
 0x246   :  { %2422 = vmatmul.bf16.gmra.mxu3 %v6319_v49  ;;  %v6324_v56 = vld [vmem:[#allocation25_spill] sm:$0xff]  ;;  %v795_v49 = vmax.f32 %v403_v26, 0.0  ;;  %v6327_v26 = vld [vmem:[#allocation28_spill] sm:$0xff] }
 0x247   :  { %2520 = vmatmul.bf16.gmra.mxu1 %v6320_v25  ;;  %2946 = vst [vmem:[%s6164_s2 + $0xb0] sm:$0xff] %v2274_v55  ;;  %v971_v27 = vpack.c.bf16 %v755_v19, %v753_v22  ;;  %v401_v55 = vld [vmem:[%s6162_s0 + $0xc28] sm:$0xff] }
 0x248   :  { %v2178_v5 = vpop.f32.mrf.mxu2  ;;  %v793_v3 = vmax.f32 %v401_v55, 0.0  ;;  %v325_v25 = vld [vmem:[%s6162_s0 + $0x9c8] sm:$0xff]  ;;  %v6326_v55 = vld [vmem:[#allocation30_spill] sm:$0xff] }
 0x249   :  { %v2179_v1 = vadd.f32 %v2178_v5, %v5434_v24  ;;  %v2227_v23 = vpop.f32.mrf.mxu3  ;;  %2776 = vmatpush.bf16.msra.mxu3 %v971_v27  ;;  %v785_v24 = vmax.f32 %v393_v44, 0.0  ;;  %v717_v16 = vmax.f32 %v325_v25, 0.0  ;;  %v719_v5 = vmax.f32 %v327_v6, 0.0  ;;  %v355_v6 = vld [vmem:[%s6162_s0 + $0xab8] sm:$0xff] }
 0x24a   :  { %v2278_v54 = vpop.f32.mrf.mxu0  ;;  %v991_v22 = vpack.c.bf16 %v795_v49, %v793_v3  ;;  %v353_v3 = vld [vmem:[%s6162_s0 + $0xaa8] sm:$0xff] }
 0x24b   :  { %v2228_v39 = vadd.f32 %v2227_v23, %v2179_v1  ;;  %v987_v20 = vpack.c.bf16 %v787_v36, %v785_v24  ;;  %v751_v1 = vmax.f32 %v359_v62, 0.0  ;;  %v391_v24 = vld [vmem:[%s6162_s0 + $0xbd8] sm:$0xff]  ;;  %v745_v4 = vmax.f32 %v353_v3, 0.0 }
 0x24c   :  { %v5745_v46 = vpop.f32.mrf.mxu1  ;;  %2880 = vmatpush.bf16.msra.mxu1 %v991_v22  ;;  %v783_v36 = vmax.f32 %v391_v24, 0.0 }
 0x24d   :  { %v2277_v63 = vadd.f32 %v2276_v12, %v2228_v39  ;;  %2825 = vmatpush.bf16.msra.mxu0 %v987_v20  ;;  %v969_v39 = vpack.c.bf16 %v751_v1, %v749_v17 }
 0x24f   :  { %2948 = vst [vmem:[%s6164_s2 + $0xc0] sm:$0xff] %v2277_v63  ;;  %2777 = vmatpush.bf16.msra.mxu3 %v969_v39  ;;  %v387_v39 = vld [vmem:[%s6162_s0 + $0xbb8] sm:$0xff] }
 0x250   :  { %v2180_v51 = vpop.f32.mrf.mxu2 }
 0x251   :  { %v2181_v38 = vadd.f32 %v2180_v51, %v5457_v43  ;;  %v2229_v12 = vpop.f32.mrf.mxu3  ;;  %v6323_v43 = vld [vmem:[#allocation24_spill] sm:$0xff] }
 0x252   :  { %v2281_v53 = vpop.f32.mrf.mxu0 }
 0x253   :  { %v2230_v59 = vadd.f32 %v2229_v12, %v2181_v38 }
 0x254   :  { %v5757_v45 = vpop.f32.mrf.mxu1 }
 0x255   :  { %v2279_v21 = vadd.f32 %v2278_v54, %v2230_v59  ;;  %2378 = vmatmul.bf16.gmra.mxu2 %v6321_v32  ;;  %2476 = vmatmul.bf16.gmra.mxu0 %v6322_v14  ;;  %v953_v54 = vpack.c.bf16 %v719_v5, %v717_v16  ;;  %v6325_v14 = vld [vmem:[#allocation6_spill] sm:$0xff]  ;;  %v747_v5 = vmax.f32 %v355_v6, 0.0 }
 0x256   :  { %2427 = vmatmul.bf16.gmra.mxu3 %v6323_v43  ;;  %v6328_v43 = vld [vmem:[#allocation29_spill] sm:$0xff] }
 0x257   :  { %2525 = vmatmul.bf16.gmra.mxu1 %v6324_v56  ;;  %2950 = vst [vmem:[%s6164_s2 + $0xd0] sm:$0xff] %v2279_v21  ;;  %2728 = vmatpush.bf16.msra.mxu2 %v953_v54  ;;  %v321_v56 = vld [vmem:[%s6162_s0 + $0x9a8] sm:$0xff]  ;;  %v967_v1 = vpack.c.bf16 %v747_v5, %v745_v4 }
 0x258   :  { %v2183_v18 = vpop.f32.mrf.mxu2  ;;  %v713_v49 = vmax.f32 %v321_v56, 0.0  ;;  %v351_v56 = vld [vmem:[%s6162_s0 + $0xa98] sm:$0xff] }
 0x259   :  { %v2184_v23 = vadd.f32 %v2183_v18, %v5475_v58  ;;  %v2232_v19 = vpop.f32.mrf.mxu3  ;;  %v781_v58 = vmax.f32 %v389_v34, 0.0  ;;  %2778 = vmatpush.bf16.msra.mxu3 %v967_v1  ;;  %v381_v1 = vld [vmem:[%s6162_s0 + $0xb88] sm:$0xff] }
 0x25a   :  { %v2283_v10 = vpop.f32.mrf.mxu0 }
 0x25b   :  { %v2233_v27 = vadd.f32 %v2232_v19, %v2184_v23  ;;  %v985_v20 = vpack.c.bf16 %v783_v36, %v781_v58 }
 0x25c   :  { %v5785_v63 = vpop.f32.mrf.mxu1 }
 0x25d   :  { %v2282_v44 = vadd.f32 %v2281_v53, %v2233_v27  ;;  %2826 = vmatpush.bf16.msra.mxu0 %v985_v20 }
 0x25f   :  { %2952 = vst [vmem:[%s6164_s2 + $0xe0] sm:$0xff] %v2282_v44  ;;  %v779_v44 = vmax.f32 %v387_v39, 0.0 }
 0x260   :  { %v2185_v51 = vpop.f32.mrf.mxu2 }
 0x261   :  { %v2186_v38 = vadd.f32 %v2185_v51, %v5493_v37  ;;  %v2234_v12 = vpop.f32.mrf.mxu3  ;;  %v323_v37 = vld [vmem:[%s6162_s0 + $0x9b8] sm:$0xff] }
 0x262   :  { %v2442_v53 = vpop.f32.mrf.mxu0  ;;  %v715_v25 = vmax.f32 %v323_v37, 0.0 }
 0x263   :  { %v2235_v59 = vadd.f32 %v2234_v12, %v2186_v38 }
 0x264   :  { %v2491_v21 = vpop.f32.mrf.mxu1  ;;  %v951_v18 = vpack.c.bf16 %v715_v25, %v713_v49  ;;  %v743_v25 = vmax.f32 %v351_v56, 0.0 }
 0x265   :  { %v2284_v32 = vadd.f32 %v2283_v10, %v2235_v59  ;;  %2539 = vmatmul.bf16.vlgmr.msrb.gmra.mxu2 %v6325_v14  ;;  %2637 = vmatmul.bf16.vlgmr.msrb.gmra.mxu0 %v6326_v55  ;;  %v385_v10 = vld [vmem:[%s6162_s0 + $0xba8] sm:$0xff]  ;;  %v6330_v59 = vld [vmem:[#allocation34_spill] sm:$0xff]  ;;  %v6332_v14 = vld [vmem:[#allocation33_spill] sm:$0xff] }
 0x266   :  { %2588 = vmatmul.bf16.vlgmr.msrb.gmra.mxu3 %v6327_v26  ;;  %2729 = vmatpush.bf16.msra.mxu2 %v951_v18  ;;  %v777_v27 = vmax.f32 %v385_v10, 0.0  ;;  %v349_v55 = vld [vmem:[%s6162_s0 + $0xa88] sm:$0xff] }
 0x267   :  { %2686 = vmatmul.bf16.vlgmr.msrb.gmra.mxu1 %v6328_v43  ;;  %2954 = vst [vmem:[%s6164_s2 + $0xf0] sm:$0xff] %v2284_v32  ;;  %v6331_v32 = vld [vmem:[#allocation32_spill] sm:$0xff]  ;;  %v741_v37 = vmax.f32 %v349_v55, 0.0 }
 0x268   :  { %v2344_v16 = vpop.f32.mrf.mxu2  ;;  %v983_v24 = vpack.c.bf16 %v779_v44, %v777_v27 }
 0x269   :  { %v2345_v62 = vadd.f32 %v2344_v16, %v5478_v52  ;;  %v2393_v17 = vpop.f32.mrf.mxu3 }
 0x26a   :  { %v2444_v22 = vpop.f32.mrf.mxu0  ;;  %2827 = vmatpush.bf16.msra.mxu0 %v983_v24 }
 0x26b   :  { %v2394_v23 = vadd.f32 %v2393_v17, %v2345_v62  ;;  %v965_v62 = vpack.c.bf16 %v743_v25, %v741_v37 }
 0x26c   :  { %v2493_v19 = vpop.f32.mrf.mxu1 }
 0x26d   :  { %v2443_v54 = vadd.f32 %v2442_v53, %v2394_v23  ;;  %v6329_v53 = vld [vmem:[#allocation7_spill] sm:$0xff]  ;;  %2779 = vmatpush.bf16.msra.mxu3 %v965_v62  ;;  %v383_v23 = vld [vmem:[%s6162_s0 + $0xb98] sm:$0xff] }
 0x26e   :  { %v377_v62 = vld [vmem:[%s6162_s0 + $0xb68] sm:$0xff] }
 0x26f   :  { %v5823_v52 = vadd.f32 %v2491_v21, %v2443_v54  ;;  %v317_v21 = vld [vmem:[%s6162_s0 + $0x988] sm:$0xff]  ;;  %v775_v54 = vmax.f32 %v383_v23, 0.0 }
 0x270   :  { %v2346_v34 = vpop.f32.mrf.mxu2  ;;  %v709_v26 = vmax.f32 %v317_v21, 0.0  ;;  %v347_v21 = vld [vmem:[%s6162_s0 + $0xa78] sm:$0xff] }
 0x271   :  { %v2347_v58 = vadd.f32 %v2346_v34, %v5505_v35  ;;  %v2395_v36 = vpop.f32.mrf.mxu3  ;;  %v319_v35 = vld [vmem:[%s6162_s0 + $0x998] sm:$0xff] }
 0x272   :  { %v2447_v51 = vpop.f32.mrf.mxu0  ;;  %v711_v43 = vmax.f32 %v319_v35, 0.0 }
 0x273   :  { %v2396_v20 = vadd.f32 %v2395_v36, %v2347_v58 }
 0x274   :  { %v2496_v38 = vpop.f32.mrf.mxu1  ;;  %v949_v16 = vpack.c.bf16 %v711_v43, %v709_v26  ;;  %v739_v43 = vmax.f32 %v347_v21, 0.0 }
 0x275   :  { %v2445_v12 = vadd.f32 %v2444_v22, %v2396_v20  ;;  %2544 = vmatmul.bf16.gmra.mxu2 %v6329_v53  ;;  %2642 = vmatmul.bf16.gmra.mxu0 %v6330_v59  ;;  %v6334_v20 = vld [vmem:[#allocation38_spill] sm:$0xff]  ;;  %v6336_v53 = vld [vmem:[#allocation37_spill] sm:$0xff]  ;;  %v345_v59 = vld [vmem:[%s6162_s0 + $0xa68] sm:$0xff] }
 0x276   :  { %2593 = vmatmul.bf16.gmra.mxu3 %v6331_v32  ;;  %2730 = vmatpush.bf16.msra.mxu2 %v949_v16  ;;  %v737_v35 = vmax.f32 %v345_v59, 0.0 }
 0x277   :  { %2691 = vmatmul.bf16.gmra.mxu1 %v6332_v14  ;;  %v5842_v3 = vadd.f32 %v2493_v19, %v2445_v12  ;;  %v773_v19 = vmax.f32 %v381_v1, 0.0  ;;  %v6335_v12 = vld [vmem:[#allocation36_spill] sm:$0xff] }
 0x278   :  { %v2349_v49 = vpop.f32.mrf.mxu2 }
 0x279   :  { %v2350_v6 = vadd.f32 %v2349_v49, %v5517_v47  ;;  %v2398_v4 = vpop.f32.mrf.mxu3  ;;  %v981_v39 = vpack.c.bf16 %v775_v54, %v773_v19 }
 0x27a   :  { %v2449_v5 = vpop.f32.mrf.mxu0 }
 0x27b   :  { %v2399_v17 = vadd.f32 %v2398_v4, %v2350_v6  ;;  %2828 = vmatpush.bf16.msra.mxu0 %v981_v39  ;;  %v963_v6 = vpack.c.bf16 %v739_v43, %v737_v35 }
 0x27c   :  { %v2498_v18 = vpop.f32.mrf.mxu1 }
 0x27d   :  { %v2448_v22 = vadd.f32 %v2447_v51, %v2399_v17  ;;  %v6333_v51 = vld [vmem:[#allocation8_spill] sm:$0xff]  ;;  %2780 = vmatpush.bf16.msra.mxu3 %v963_v6  ;;  %v379_v17 = vld [vmem:[%s6162_s0 + $0xb78] sm:$0xff] }
 0x27f   :  { %v5851_v47 = vadd.f32 %v2496_v38, %v2448_v22  ;;  %v313_v38 = vld [vmem:[%s6162_s0 + $0x968] sm:$0xff]  ;;  %v771_v22 = vmax.f32 %v379_v17, 0.0 }
 0x280   :  { %v2351_v10 = vpop.f32.mrf.mxu2  ;;  %v705_v32 = vmax.f32 %v313_v38, 0.0  ;;  %v311_v38 = vld [vmem:[%s6162_s0 + $0x958] sm:$0xff] }
 0x281   :  { %v2352_v27 = vadd.f32 %v2351_v10, %v5545_v15  ;;  %v2400_v44 = vpop.f32.mrf.mxu3  ;;  %v315_v15 = vld [vmem:[%s6162_s0 + $0x978] sm:$0xff] }
 0x282   :  { %v2452_v34 = vpop.f32.mrf.mxu0  ;;  %v707_v14 = vmax.f32 %v315_v15, 0.0  ;;  %v341_v15 = vld [vmem:[%s6162_s0 + $0xa48] sm:$0xff] }
 0x283   :  { %v2401_v24 = vadd.f32 %v2400_v44, %v2352_v27  ;;  %v733_v21 = vmax.f32 %v341_v15, 0.0 }
 0x284   :  { %v2501_v58 = vpop.f32.mrf.mxu1  ;;  %v947_v49 = vpack.c.bf16 %v707_v14, %v705_v32  ;;  %v703_v32 = vmax.f32 %v311_v38, 0.0  ;;  %v343_v14 = vld [vmem:[%s6162_s0 + $0xa58] sm:$0xff] }
 0x285   :  { %v2450_v36 = vadd.f32 %v2449_v5, %v2401_v24  ;;  %2549 = vmatmul.bf16.gmra.mxu2 %v6333_v51  ;;  %2647 = vmatmul.bf16.gmra.mxu0 %v6334_v20  ;;  %v6338_v24 = vld [vmem:[#allocation42_spill] sm:$0xff]  ;;  %v6339_v51 = vld [vmem:[#allocation40_spill] sm:$0xff]  ;;  %v339_v38 = vld [vmem:[%s6162_s0 + $0xa38] sm:$0xff] }
 0x286   :  { %2598 = vmatmul.bf16.gmra.mxu3 %v6335_v12  ;;  %2731 = vmatpush.bf16.msra.mxu2 %v947_v49 }
 0x287   :  { %2696 = vmatmul.bf16.gmra.mxu1 %v6336_v53  ;;  %v5870_v55 = vadd.f32 %v2498_v18, %v2450_v36  ;;  %v769_v18 = vmax.f32 %v377_v62, 0.0  ;;  %v397_v36 = vld [vmem:[%s6162_s0 + $0xc08] sm:$0xff] }
 0x288   :  { %v2354_v26 = vpop.f32.mrf.mxu2  ;;  %v789_v20 = vmax.f32 %v397_v36, 0.0  ;;  %v309_v53 = vld [vmem:[%s6162_s0 + $0x948] sm:$0xff] }
 0x289   :  { %v2355_v56 = vadd.f32 %v2354_v26, %v5557_v41  ;;  %v2403_v37 = vpop.f32.mrf.mxu3  ;;  %v979_v23 = vpack.c.bf16 %v771_v22, %v769_v18  ;;  %v701_v59 = vmax.f32 %v309_v53, 0.0  ;;  %v375_v18 = vld [vmem:[%s6162_s0 + $0xb58] sm:$0xff]  ;;  %v6341_v36 = vld [vmem:[#allocation15_spill] sm:$0xff] }
 0x28a   :  { %v2454_v25 = vpop.f32.mrf.mxu0 }
 0x28b   :  { %v2404_v4 = vadd.f32 %v2403_v37, %v2355_v56  ;;  %2829 = vmatpush.bf16.msra.mxu0 %v979_v23  ;;  %v735_v56 = vmax.f32 %v343_v14, 0.0  ;;  %v731_v14 = vmax.f32 %v339_v38, 0.0 }
 0x28c   :  { %v2503_v16 = vpop.f32.mrf.mxu1 }
 0x28d   :  { %v2453_v5 = vadd.f32 %v2452_v34, %v2404_v4  ;;  %v6337_v34 = vld [vmem:[#allocation11_spill] sm:$0xff]  ;;  %v961_v4 = vpack.c.bf16 %v735_v56, %v733_v21 }
 0x28f   :  { %v5879_v41 = vadd.f32 %v2501_v58, %v2453_v5  ;;  %v399_v58 = vld [vmem:[%s6162_s0 + $0xc18] sm:$0xff]  ;;  %2781 = vmatpush.bf16.msra.mxu3 %v961_v4  ;;  %v369_v4 = vld [vmem:[%s6162_s0 + $0xb28] sm:$0xff] }
 0x290   :  { %v2356_v1 = vpop.f32.mrf.mxu2  ;;  %v791_v12 = vmax.f32 %v399_v58, 0.0  ;;  %v6342_v58 = vld [vmem:[#allocation46_spill] sm:$0xff] }
 0x291   :  { %v2357_v19 = vadd.f32 %v2356_v1, %v5585_v29  ;;  %v2405_v54 = vpop.f32.mrf.mxu3  ;;  %v6340_v29 = vld [vmem:[#allocation41_spill] sm:$0xff] }
 0x292   :  { %v2457_v10 = vpop.f32.mrf.mxu0  ;;  %v989_v43 = vpack.c.bf16 %v791_v12, %v789_v20  ;;  %v337_v20 = vld [vmem:[%s6162_s0 + $0xa28] sm:$0xff] }
 0x293   :  { %v2406_v39 = vadd.f32 %v2405_v54, %v2357_v19  ;;  %v729_v15 = vmax.f32 %v337_v20, 0.0 }
 0x294   :  { %v2506_v27 = vpop.f32.mrf.mxu1  ;;  %2881 = vmatpush.bf16.msra.mxu1 %v989_v43 }
 0x295   :  { %v2455_v44 = vadd.f32 %v2454_v25, %v2406_v39  ;;  %2554 = vmatmul.bf16.gmra.mxu2 %v6337_v34  ;;  %2652 = vmatmul.bf16.gmra.mxu0 %v6338_v24  ;;  %v945_v25 = vpack.c.bf16 %v703_v32, %v701_v59 }
 0x296   :  { %2603 = vmatmul.bf16.gmra.mxu3 %v6339_v51  ;;  %v6343_v51 = vld [vmem:[#allocation44_spill] sm:$0xff] }
 0x297   :  { %2701 = vmatmul.bf16.gmra.mxu1 %v6340_v29  ;;  %v5904_v35 = vadd.f32 %v2503_v16, %v2455_v44  ;;  %2732 = vmatpush.bf16.msra.mxu2 %v945_v25  ;;  %v373_v16 = vld [vmem:[%s6162_s0 + $0xb48] sm:$0xff]  ;;  %v6344_v29 = vld [vmem:[#allocation45_spill] sm:$0xff] }
 0x298   :  { %v2359_v26 = vpop.f32.mrf.mxu2  ;;  %v765_v22 = vmax.f32 %v373_v16, 0.0 }
 0x299   :  { %v2360_v37 = vadd.f32 %v2359_v26, %v5597_v40  ;;  %v2408_v49 = vpop.f32.mrf.mxu3  ;;  %v767_v40 = vmax.f32 %v375_v18, 0.0 }
 0x29a   :  { %v2459_v6 = vpop.f32.mrf.mxu0 }
 0x29b   :  { %v2409_v5 = vadd.f32 %v2408_v49, %v2360_v37  ;;  %v977_v19 = vpack.c.bf16 %v767_v40, %v765_v22  ;;  %v959_v37 = vpack.c.bf16 %v731_v14, %v729_v15 }
 0x29c   :  { %v2508_v62 = vpop.f32.mrf.mxu1 }
 0x29d   :  { %v2458_v17 = vadd.f32 %v2457_v10, %v2409_v5  ;;  %2830 = vmatpush.bf16.msra.mxu0 %v977_v19  ;;  %2782 = vmatpush.bf16.msra.mxu3 %v959_v37  ;;  %v371_v5 = vld [vmem:[%s6162_s0 + $0xb38] sm:$0xff]  ;;  %v365_v37 = vld [vmem:[%s6162_s0 + $0xb08] sm:$0xff] }
 0x29f   :  { %v5913_v1 = vadd.f32 %v2506_v27, %v2458_v17  ;;  %v305_v27 = vld [vmem:[%s6162_s0 + $0x928] sm:$0xff]  ;;  %v763_v17 = vmax.f32 %v371_v5, 0.0 }
 0x2a0   :  { %v2361_v23 = vpop.f32.mrf.mxu2  ;;  %v697_v12 = vmax.f32 %v305_v27, 0.0  ;;  %v335_v27 = vld [vmem:[%s6162_s0 + $0xa18] sm:$0xff] }
 0x2a1   :  { %v2362_v54 = vadd.f32 %v2361_v23, %v5625_v13  ;;  %v2410_v39 = vpop.f32.mrf.mxu3  ;;  %v307_v13 = vld [vmem:[%s6162_s0 + $0x938] sm:$0xff] }
 0x2a2   :  { %v2462_v44 = vpop.f32.mrf.mxu0  ;;  %v699_v53 = vmax.f32 %v307_v13, 0.0 }
 0x2a3   :  { %v2411_v10 = vadd.f32 %v2410_v39, %v2362_v54 }
 0x2a4   :  { %v2511_v34 = vpop.f32.mrf.mxu1  ;;  %v943_v43 = vpack.c.bf16 %v699_v53, %v697_v12  ;;  %v727_v53 = vmax.f32 %v335_v27, 0.0 }
 0x2a5   :  { %v2460_v24 = vadd.f32 %v2459_v6, %v2411_v10  ;;  %2559 = vmatmul.bf16.gmra.mxu2 %v6341_v36  ;;  %2657 = vmatmul.bf16.gmra.mxu0 %v6342_v58  ;;  %v6346_v10 = vld [vmem:[#allocation50_spill] sm:$0xff]  ;;  %v6348_v36 = vld [vmem:[#allocation49_spill] sm:$0xff]  ;;  %v333_v58 = vld [vmem:[%s6162_s0 + $0xa08] sm:$0xff] }
 0x2a6   :  { %2608 = vmatmul.bf16.gmra.mxu3 %v6343_v51  ;;  %2733 = vmatpush.bf16.msra.mxu2 %v943_v43  ;;  %v725_v13 = vmax.f32 %v333_v58, 0.0 }
 0x2a7   :  { %2706 = vmatmul.bf16.gmra.mxu1 %v6344_v29  ;;  %v5932_v59 = vadd.f32 %v2508_v62, %v2460_v24  ;;  %v761_v62 = vmax.f32 %v369_v4, 0.0  ;;  %v6347_v24 = vld [vmem:[#allocation48_spill] sm:$0xff] }
 0x2a8   :  { %v2364_v32 = vpop.f32.mrf.mxu2 }
 0x2a9   :  { %v2365_v21 = vadd.f32 %v2364_v32, %v5637_v50  ;;  %v2413_v26 = vpop.f32.mrf.mxu3  ;;  %v975_v18 = vpack.c.bf16 %v763_v17, %v761_v62 }
 0x2aa   :  { %v2464_v56 = vpop.f32.mrf.mxu0 }
 0x2ab   :  { %v2414_v49 = vadd.f32 %v2413_v26, %v2365_v21  ;;  %2831 = vmatpush.bf16.msra.mxu0 %v975_v18  ;;  %v957_v21 = vpack.c.bf16 %v727_v53, %v725_v13 }
 0x2ac   :  { %v2513_v25 = vpop.f32.mrf.mxu1 }
 0x2ad   :  { %v2463_v6 = vadd.f32 %v2462_v44, %v2414_v49  ;;  %v6345_v44 = vld [vmem:[#allocation19_spill] sm:$0xff]  ;;  %2783 = vmatpush.bf16.msra.mxu3 %v957_v21  ;;  %v367_v49 = vld [vmem:[%s6162_s0 + $0xb18] sm:$0xff] }
 0x2af   :  { %v5941_v50 = vadd.f32 %v2511_v34, %v2463_v6  ;;  %v301_v34 = vld [vmem:[%s6162_s0 + $0x908] sm:$0xff]  ;;  %v759_v6 = vmax.f32 %v367_v49, 0.0 }
 0x2b0   :  { %v2366_v16 = vpop.f32.mrf.mxu2  ;;  %v693_v51 = vmax.f32 %v301_v34, 0.0 }
 0x2b1   :  { %v2367_v22 = vadd.f32 %v2366_v16, %v5665_v2  ;;  %v2415_v40 = vpop.f32.mrf.mxu3  ;;  %v303_v2 = vld [vmem:[%s6162_s0 + $0x918] sm:$0xff] }
 0x2b2   :  { %v2467_v23 = vpop.f32.mrf.mxu0  ;;  %v695_v29 = vmax.f32 %v303_v2, 0.0 }
 0x2b3   :  { %v2416_v19 = vadd.f32 %v2415_v40, %v2367_v22 }
 0x2b4   :  { %v2516_v54 = vpop.f32.mrf.mxu1  ;;  %v941_v32 = vpack.c.bf16 %v695_v29, %v693_v51 }
 0x2b5   :  { %v2465_v39 = vadd.f32 %v2464_v56, %v2416_v19  ;;  %2564 = vmatmul.bf16.gmra.mxu2 %v6345_v44  ;;  %2662 = vmatmul.bf16.gmra.mxu0 %v6346_v10  ;;  %v6350_v19 = vld [vmem:[#allocation54_spill] sm:$0xff]  ;;  %v6352_v44 = vld [vmem:[#allocation53_spill] sm:$0xff] }
 0x2b6   :  { %2613 = vmatmul.bf16.gmra.mxu3 %v6347_v24  ;;  %2734 = vmatpush.bf16.msra.mxu2 %v941_v32  ;;  %v6353_v32 = vld [vmem:[#allocation27_spill] sm:$0xff] }
 0x2b7   :  { %2711 = vmatmul.bf16.gmra.mxu1 %v6348_v36  ;;  %v5960_v20 = vadd.f32 %v2513_v25, %v2465_v39  ;;  %v757_v25 = vmax.f32 %v365_v37, 0.0  ;;  %v6351_v39 = vld [vmem:[#allocation52_spill] sm:$0xff] }
 0x2b8   :  { %v2369_v12 = vpop.f32.mrf.mxu2 }
 0x2b9   :  { %v2370_v38 = vadd.f32 %v2369_v12, %v5677_v42  ;;  %v2418_v15 = vpop.f32.mrf.mxu3  ;;  %v973_v5 = vpack.c.bf16 %v759_v6, %v757_v25 }
 0x2ba   :  { %v2469_v14 = vpop.f32.mrf.mxu0 }
 0x2bb   :  { %v2419_v26 = vadd.f32 %v2418_v15, %v2370_v38  ;;  %2832 = vmatpush.bf16.msra.mxu0 %v973_v5 }
 0x2bc   :  { %v2518_v43 = vpop.f32.mrf.mxu1 }
 0x2bd   :  { %v2468_v56 = vadd.f32 %v2467_v23, %v2419_v26  ;;  %v6349_v23 = vld [vmem:[#allocation23_spill] sm:$0xff] }
 0x2bf   :  { %v5969_v42 = vadd.f32 %v2516_v54, %v2468_v56 }
 0x2c0   :  { %v2371_v4 = vpop.f32.mrf.mxu2 }
 0x2c1   :  { %v2372_v62 = vadd.f32 %v2371_v4, %v5705_v0  ;;  %v2420_v17 = vpop.f32.mrf.mxu3 }
 0x2c2   :  { %v2472_v16 = vpop.f32.mrf.mxu0 }
 0x2c3   :  { %v2421_v18 = vadd.f32 %v2420_v17, %v2372_v62  ;;  %v6354_v62 = vld [vmem:[#allocation31_spill] sm:$0xff]  ;;  %v6356_v17 = vld [vmem:[#allocation58_spill] sm:$0xff] }
 0x2c4   :  { %v2521_v22 = vpop.f32.mrf.mxu1 }
 0x2c5   :  { %v2470_v40 = vadd.f32 %v2469_v14, %v2421_v18  ;;  %2569 = vmatmul.bf16.gmra.mxu2 %v6349_v23  ;;  %2667 = vmatmul.bf16.gmra.mxu0 %v6350_v19 }
 0x2c6   :  { %2618 = vmatmul.bf16.gmra.mxu3 %v6351_v39 }
 0x2c7   :  { %2716 = vmatmul.bf16.gmra.mxu1 %v6352_v44  ;;  %v5976_v54 = vadd.f32 %v2518_v43, %v2470_v40 }
 0x2c8   :  { %v2374_v10 = vpop.f32.mrf.mxu2 }
 0x2c9   :  { %v2375_v24 = vadd.f32 %v2374_v10, %v5723_v60  ;;  %v2423_v0 = vpop.f32.mrf.mxu3 }
 0x2ca   :  { %v2474_v36 = vpop.f32.mrf.mxu0 }
 0x2cb   :  { %v2424_v34 = vadd.f32 %v2423_v0, %v2375_v24 }
 0x2cc   :  { %v2523_v2 = vpop.f32.mrf.mxu1 }
 0x2cd   :  { %v2473_v58 = vadd.f32 %v2472_v16, %v2424_v34 }
 0x2cf   :  { %v5979_v51 = vadd.f32 %v2521_v22, %v2473_v58  ;;  %v6357_v58 = vld [vmem:[#allocation35_spill] sm:$0xff] }
 0x2d0   :  { %v2376_v29 = vpop.f32.mrf.mxu2 }
 0x2d1   :  { %v2377_v27 = vadd.f32 %v2376_v29, %v5745_v46  ;;  %v2425_v13 = vpop.f32.mrf.mxu3  ;;  %v6359_v29 = vld [vmem:[#allocation60_spill] sm:$0xff] }
 0x2d2   :  { %v2477_v12 = vpop.f32.mrf.mxu0 }
 0x2d3   :  { %v2426_v53 = vadd.f32 %v2425_v13, %v2377_v27 }
 0x2d4   :  { %v2526_v38 = vpop.f32.mrf.mxu1 }
 0x2d5   :  { %v2475_v15 = vadd.f32 %v2474_v36, %v2426_v53  ;;  %2574 = vmatmul.bf16.gmra.mxu2 %v6353_v32  ;;  %2672 = vmatmul.bf16.gmra.mxu0 %v4968_v48 }
 0x2d6   :  { %2623 = vmatmul.bf16.gmra.mxu3 %v4964_v57 }
 0x2d7   :  { %2721 = vmatmul.bf16.gmra.mxu1 %v4966_v8  ;;  %v5986_v60 = vadd.f32 %v2523_v2, %v2475_v15 }
 0x2d8   :  { %v2379_v14 = vpop.f32.mrf.mxu2 }
 0x2d9   :  { %v2380_v21 = vadd.f32 %v2379_v14, %v5757_v45  ;;  %v2428_v26 = vpop.f32.mrf.mxu3  ;;  %v6355_v45 = vld [vmem:[#allocation57_spill] sm:$0xff] }
 0x2da   :  { %v2479_v46 = vpop.f32.mrf.mxu0 }
 0x2db   :  { %v2429_v43 = vadd.f32 %v2428_v26, %v2380_v21 }
 0x2dc   :  { %v2528_v56 = vpop.f32.mrf.mxu1 }
 0x2dd   :  { %v2478_v37 = vadd.f32 %v2477_v12, %v2429_v43 }
 0x2df   :  { %v5989_v49 = vadd.f32 %v2526_v38, %v2478_v37 }
 0x2e0   :  { %v2381_v25 = vpop.f32.mrf.mxu2 }
 0x2e1   :  { %v2382_v6 = vadd.f32 %v2381_v25, %v5785_v63  ;;  %v2430_v48 = vpop.f32.mrf.mxu3  ;;  %v6360_v25 = vld [vmem:[#allocation39_spill] sm:$0xff] }
 0x2e2   :  { %v2638_v4 = vpop.f32.mrf.mxu0 }
 0x2e3   :  { %v2431_v57 = vadd.f32 %v2430_v48, %v2382_v6  ;;  %v6362_v6 = vld [vmem:[#allocation62_spill] sm:$0xff] }
 0x2e4   :  { %v2687_v5 = vpop.f32.mrf.mxu1 }
 0x2e5   :  { %v2480_v8 = vadd.f32 %v2479_v46, %v2431_v57  ;;  %2735 = vmatmul.bf16.vlgmr.msra.gmra.mxu2 %v6354_v62  ;;  %2833 = vmatmul.bf16.vlgmr.msra.gmra.mxu0 %v5028_v33 }
 0x2e6   :  { %2784 = vmatmul.bf16.vlgmr.msra.gmra.mxu3 %v6355_v45 }
 0x2e7   :  { %3384 = vmatmul.msk.bf16.vlgmr.msra.gmra.mxu1 %vm1624_vm0, %v6356_v17  ;;  %v5997_v16 = vadd.f32 %v2528_v56, %v2480_v8 }
 0x2e8   :  { %v2540_v18 = vpop.f32.mrf.mxu2 }
 0x2e9   :  { %v2541_v22 = vadd.f32 %v2540_v18, %v5823_v52  ;;  %v2589_v63 = vpop.f32.mrf.mxu3  ;;  %v6358_v52 = vld [vmem:[#allocation59_spill] sm:$0xff] }
 0x2ea   :  { %v2640_v40 = vpop.f32.mrf.mxu0 }
 0x2eb   :  { %v2590_v23 = vadd.f32 %v2589_v63, %v2541_v22 }
 0x2ec   :  { %v2689_v19 = vpop.f32.mrf.mxu1 }
 0x2ed   :  { %v2639_v39 = vadd.f32 %v2638_v4, %v2590_v23 }
 0x2ef   :  { %v6000_v44 = vadd.f32 %v2687_v5, %v2639_v39  ;;  %v6363_v39 = vld [vmem:[#allocation43_spill] sm:$0xff] }
 0x2f0   :  { %v2542_v10 = vpop.f32.mrf.mxu2 }
 0x2f1   :  { %v2543_v33 = vadd.f32 %v2542_v10, %v5842_v3  ;;  %v2591_v24 = vpop.f32.mrf.mxu3  ;;  %v6365_v10 = vld [vmem:[#allocation64_spill] sm:$0xff] }
 0x2f2   :  { %v2643_v0 = vpop.f32.mrf.mxu0 }
 0x2f3   :  { %v2592_v36 = vadd.f32 %v2591_v24, %v2543_v33 }
 0x2f4   :  { %v2692_v34 = vpop.f32.mrf.mxu1 }
 0x2f5   :  { %v2641_v2 = vadd.f32 %v2640_v40, %v2592_v36  ;;  %2740 = vmatmul.bf16.gmra.mxu2 %v6357_v58  ;;  %2838 = vmatmul.bf16.gmra.mxu0 %v5087_v9 }
 0x2f6   :  { %2789 = vmatmul.bf16.gmra.mxu3 %v6358_v52 }
 0x2f7   :  { %3385 = vmatmul.msk.bf16.gmra.mxu1 %vm1624_vm0, %v6359_v29  ;;  %v6008_v27 = vadd.f32 %v2689_v19, %v2641_v2 }
 0x2f8   :  { %v2545_v13 = vpop.f32.mrf.mxu2 }
 0x2f9   :  { %v2546_v12 = vadd.f32 %v2545_v13, %v5851_v47  ;;  %v2594_v3 = vpop.f32.mrf.mxu3  ;;  %v6361_v47 = vld [vmem:[#allocation61_spill] sm:$0xff] }
 0x2fa   :  { %v2645_v53 = vpop.f32.mrf.mxu0 }
 0x2fb   :  { %v2595_v38 = vadd.f32 %v2594_v3, %v2546_v12 }
 0x2fc   :  { %v2694_v15 = vpop.f32.mrf.mxu1 }
 0x2fd   :  { %v2644_v32 = vadd.f32 %v2643_v0, %v2595_v38 }
 0x2ff   :  { %v6011_v14 = vadd.f32 %v2692_v34, %v2644_v32  ;;  %v6368_v32 = vld [vmem:[#allocation66_spill] sm:$0xff] }
 0x300   :  { %v2547_v21 = vpop.f32.mrf.mxu2 }
 0x301   :  { %v2548_v9 = vadd.f32 %v2547_v21, %v5870_v55  ;;  %v2596_v26 = vpop.f32.mrf.mxu3 }
 0x302   :  { %v2648_v46 = vpop.f32.mrf.mxu0 }
 0x303   :  { %v2597_v43 = vadd.f32 %v2596_v26, %v2548_v9 }
 0x304   :  { %v2697_v56 = vpop.f32.mrf.mxu1 }
 0x305   :  { %v2646_v37 = vadd.f32 %v2645_v53, %v2597_v43  ;;  %2745 = vmatmul.bf16.gmra.mxu2 %v6360_v25  ;;  %2843 = vmatmul.bf16.gmra.mxu0 %v5146_v7 }
 0x306   :  { %2794 = vmatmul.bf16.gmra.mxu3 %v6361_v47 }
 0x307   :  { %3386 = vmatmul.msk.bf16.gmra.mxu1 %vm1624_vm0, %v6362_v6  ;;  %v6019_v48 = vadd.f32 %v2694_v15, %v2646_v37  ;;  %v6366_v15 = vld [vmem:[#allocation47_spill] sm:$0xff] }
 0x308   :  { %v2550_v4 = vpop.f32.mrf.mxu2 }
 0x309   :  { %v2551_v57 = vadd.f32 %v2550_v4, %v5879_v41  ;;  %v2599_v55 = vpop.f32.mrf.mxu3  ;;  %v6364_v41 = vld [vmem:[#allocation63_spill] sm:$0xff] }
 0x30a   :  { %v2650_v5 = vpop.f32.mrf.mxu0 }
 0x30b   :  { %v2600_v8 = vadd.f32 %v2599_v55, %v2551_v57 }
 0x30c   :  { %v2699_v62 = vpop.f32.mrf.mxu1 }
 0x30d   :  { %v2649_v45 = vadd.f32 %v2648_v46, %v2600_v8  ;;  %v6369_v8 = vld [vmem:[#allocation51_spill] sm:$0xff] }
 0x30f   :  { %v6022_v17 = vadd.f32 %v2697_v56, %v2649_v45  ;;  %v6372_v45 = vld [vmem:[#allocation68_spill] sm:$0xff] }
 0x310   :  { %v2552_v18 = vpop.f32.mrf.mxu2 }
 0x311   :  { %v2553_v7 = vadd.f32 %v2552_v18, %v5904_v35  ;;  %v2601_v22 = vpop.f32.mrf.mxu3 }
 0x312   :  { %v2653_v63 = vpop.f32.mrf.mxu0 }
 0x313   :  { %v2602_v40 = vadd.f32 %v2601_v22, %v2553_v7 }
 0x314   :  { %v2702_v23 = vpop.f32.mrf.mxu1 }
 0x315   :  { %v2651_v19 = vadd.f32 %v2650_v5, %v2602_v40  ;;  %2750 = vmatmul.bf16.gmra.mxu2 %v6363_v39  ;;  %2848 = vmatmul.bf16.gmra.mxu0 %v5205_v28 }
 0x316   :  { %2799 = vmatmul.bf16.gmra.mxu3 %v6364_v41 }
 0x317   :  { %3387 = vmatmul.msk.bf16.gmra.mxu1 %vm1624_vm0, %v6365_v10  ;;  %v6030_v33 = vadd.f32 %v2699_v62, %v2651_v19  ;;  %v6370_v62 = vld [vmem:[#allocation69_spill] sm:$0xff] }
 0x318   :  { %v2555_v24 = vpop.f32.mrf.mxu2 }
 0x319   :  { %v2556_v0 = vadd.f32 %v2555_v24, %v5913_v1  ;;  %v2604_v35 = vpop.f32.mrf.mxu3  ;;  %v6367_v1 = vld [vmem:[#allocation65_spill] sm:$0xff] }
 0x31a   :  { %v2655_v36 = vpop.f32.mrf.mxu0 }
 0x31b   :  { %v2605_v34 = vadd.f32 %v2604_v35, %v2556_v0 }
 0x31c   :  { %v2704_v2 = vpop.f32.mrf.mxu1 }
 0x31d   :  { %v2654_v58 = vadd.f32 %v2653_v63, %v2605_v34 }
 0x31f   :  { %v6033_v52 = vadd.f32 %v2702_v23, %v2654_v58  ;;  %v6374_v58 = vld [vmem:[#allocation72_spill] sm:$0xff] }
 0x320   :  { %v2557_v29 = vpop.f32.mrf.mxu2 }
 0x321   :  { %v2558_v28 = vadd.f32 %v2557_v29, %v5932_v59  ;;  %v2606_v13 = vpop.f32.mrf.mxu3  ;;  %v6376_v29 = vld [vmem:[#allocation71_spill] sm:$0xff] }
 0x322   :  { %v2658_v12 = vpop.f32.mrf.mxu0 }
 0x323   :  { %v2607_v3 = vadd.f32 %v2606_v13, %v2558_v28 }
 0x324   :  { %v2707_v53 = vpop.f32.mrf.mxu1 }
 0x325   :  { %v2656_v38 = vadd.f32 %v2655_v36, %v2607_v3  ;;  %2755 = vmatmul.bf16.gmra.mxu2 %v6366_v15  ;;  %2853 = vmatmul.bf16.gmra.mxu0 %v5264_v31 }
 0x326   :  { %2804 = vmatmul.bf16.gmra.mxu3 %v6367_v1 }
 0x327   :  { %3388 = vmatmul.msk.bf16.gmra.mxu1 %vm1624_vm0, %v6368_v32  ;;  %v6041_v21 = vadd.f32 %v2704_v2, %v2656_v38  ;;  %v6373_v2 = vld [vmem:[#allocation55_spill] sm:$0xff] }
 0x328   :  { %v2560_v9 = vpop.f32.mrf.mxu2 }
 0x329   :  { %v2561_v26 = vadd.f32 %v2560_v9, %v5941_v50  ;;  %v2609_v59 = vpop.f32.mrf.mxu3  ;;  %v6371_v50 = vld [vmem:[#allocation67_spill] sm:$0xff] }
 0x32a   :  { %v2660_v46 = vpop.f32.mrf.mxu0 }
 0x32b   :  { %v2610_v43 = vadd.f32 %v2609_v59, %v2561_v26 }
 0x32c   :  { %v2709_v56 = vpop.f32.mrf.mxu1 }
 0x32d   :  { %v2659_v37 = vadd.f32 %v2658_v12, %v2610_v43 }
 0x32f   :  { %v6044_v25 = vadd.f32 %v2707_v53, %v2659_v37  ;;  %v6377_v37 = vld [vmem:[#allocation56_spill] sm:$0xff] }
 0x330   :  { %v2562_v47 = vpop.f32.mrf.mxu2 }
 0x331   :  { %v2563_v31 = vadd.f32 %v2562_v47, %v5960_v20  ;;  %v2611_v6 = vpop.f32.mrf.mxu3 }
 0x332   :  { %v2663_v4 = vpop.f32.mrf.mxu0 }
 0x333   :  { %v2612_v57 = vadd.f32 %v2611_v6, %v2563_v31 }
 0x334   :  { %v2712_v55 = vpop.f32.mrf.mxu1 }
 0x335   :  { %v2661_v5 = vadd.f32 %v2660_v46, %v2612_v57  ;;  %2760 = vmatmul.bf16.gmra.mxu2 %v6369_v8  ;;  %2858 = vmatmul.bf16.gmra.mxu0 %v6370_v62 }
 0x336   :  { %2809 = vmatmul.bf16.gmra.mxu3 %v6371_v50 }
 0x337   :  { %3389 = vmatmul.msk.bf16.gmra.mxu1 %vm1624_vm0, %v6372_v45  ;;  %v6052_v18 = vadd.f32 %v2709_v56, %v2661_v5 }
 0x338   :  { %v2565_v7 = vpop.f32.mrf.mxu2 }
 0x339   :  { %v2566_v22 = vadd.f32 %v2565_v7, %v5969_v42  ;;  %v2614_v20 = vpop.f32.mrf.mxu3  ;;  %v6375_v42 = vld [vmem:[#allocation70_spill] sm:$0xff] }
 0x33a   :  { %v2665_v63 = vpop.f32.mrf.mxu0 }
 0x33b   :  { %v2615_v40 = vadd.f32 %v2614_v20, %v2566_v22 }
 0x33c   :  { %v2714_v23 = vpop.f32.mrf.mxu1 }
 0x33d   :  { %v2664_v19 = vadd.f32 %v2663_v4, %v2615_v40 }
 0x33f   :  { %v6055_v39 = vadd.f32 %v2712_v55, %v2664_v19 }
 0x340   :  { %v2567_v41 = vpop.f32.mrf.mxu2 }
 0x341   :  { %v2568_v10 = vadd.f32 %v2567_v41, %v5976_v54  ;;  %v2616_v24 = vpop.f32.mrf.mxu3 }
 0x342   :  { %v2668_v0 = vpop.f32.mrf.mxu0 }
 0x343   :  { %v2617_v35 = vadd.f32 %v2616_v24, %v2568_v10 }
 0x344   :  { %v2717_v36 = vpop.f32.mrf.mxu1 }
 0x345   :  { %v2666_v34 = vadd.f32 %v2665_v63, %v2617_v35  ;;  %2765 = vmatmul.bf16.gmra.mxu2 %v6373_v2  ;;  %2863 = vmatmul.bf16.gmra.mxu0 %v6374_v58 }
 0x346   :  { %2814 = vmatmul.bf16.gmra.mxu3 %v6375_v42 }
 0x347   :  { %3390 = vmatmul.msk.bf16.gmra.mxu1 %vm1624_vm0, %v6376_v29  ;;  %v6063_v28 = vadd.f32 %v2714_v23, %v2666_v34 }
 0x348   :  { %v2570_v13 = vpop.f32.mrf.mxu2 }
 0x349   :  { %v2571_v12 = vadd.f32 %v2570_v13, %v5979_v51  ;;  %v2619_v54 = vpop.f32.mrf.mxu3 }
 0x34a   :  { %v2670_v3 = vpop.f32.mrf.mxu0 }
 0x34b   :  { %v2620_v53 = vadd.f32 %v2619_v54, %v2571_v12 }
 0x34c   :  { %v2719_v38 = vpop.f32.mrf.mxu1 }
 0x34d   :  { %v2669_v15 = vadd.f32 %v2668_v0, %v2620_v53 }
 0x34f   :  { %v6066_v1 = vadd.f32 %v2717_v36, %v2669_v15 }
 0x350   :  { %v2572_v32 = vpop.f32.mrf.mxu2 }
 0x351   :  { %v2573_v9 = vadd.f32 %v2572_v32, %v5986_v60  ;;  %v2621_v26 = vpop.f32.mrf.mxu3 }
 0x352   :  { %v2673_v59 = vpop.f32.mrf.mxu0 }
 0x353   :  { %v2622_v46 = vadd.f32 %v2621_v26, %v2573_v9 }
 0x354   :  { %v2722_v43 = vpop.f32.mrf.mxu1 }
 0x355   :  { %v2671_v56 = vadd.f32 %v2670_v3, %v2622_v46  ;;  %2770 = vmatmul.bf16.gmra.mxu2 %v6377_v37  ;;  %2868 = vmatmul.bf16.gmra.mxu0 %v5441_v30 }
 0x356   :  { %2819 = vmatmul.bf16.gmra.mxu3 %v5437_v11 }
 0x357   :  { %3391 = vmatmul.msk.bf16.gmra.mxu1 %vm1624_vm0, %v5439_v61  ;;  %v6074_v51 = vadd.f32 %v2719_v38, %v2671_v56 }
 0x358   :  { %v2575_v47 = vpop.f32.mrf.mxu2 }
 0x359   :  { %v2576_v31 = vadd.f32 %v2575_v47, %v5989_v49  ;;  %v2624_v60 = vpop.f32.mrf.mxu3 }
 0x35a   :  { %v2675_v6 = vpop.f32.mrf.mxu0 }
 0x35b   :  { %v2625_v4 = vadd.f32 %v2624_v60, %v2576_v31 }
 0x35c   :  { %v2724_v57 = vpop.f32.mrf.mxu1 }
 0x35d   :  { %v2674_v55 = vadd.f32 %v2673_v59, %v2625_v4 }
 0x35f   :  { %v6077_v5 = vadd.f32 %v2722_v43, %v2674_v55 }
 0x360   :  { %v2577_v8 = vpop.f32.mrf.mxu2 }
 0x361   :  { %v2578_v30 = vadd.f32 %v2577_v8, %v5997_v16  ;;  %v2626_v62 = vpop.f32.mrf.mxu3 }
 0x362   :  { %v2834_v11 = vpop.f32.mrf.mxu0 }
 0x363   :  { %v2627_v50 = vadd.f32 %v2626_v62, %v2578_v30 }
 0x364   :  { %v2883_v45 = vpop.f32.mrf.mxu1 }
 0x365   :  { %v2676_v61 = vadd.f32 %v2675_v6, %v2627_v50 }
 0x367   :  { %v6080_v7 = vadd.f32 %v2724_v57, %v2676_v61 }
 0x368   :  { %v2736_v22 = vpop.f32.mrf.mxu2 }
 0x369   :  { %v2737_v49 = vadd.f32 %v2736_v22, %v6000_v44  ;;  %v2785_v20 = vpop.f32.mrf.mxu3 }
 0x36a   :  { %v2836_v63 = vpop.f32.mrf.mxu0 }
 0x36b   :  { %v2786_v40 = vadd.f32 %v2785_v20, %v2737_v49 }
 0x36c   :  { %v2885_v23 = vpop.f32.mrf.mxu1 }
 0x36d   :  { %v2835_v19 = vadd.f32 %v2834_v11, %v2786_v40 }
 0x36f   :  { %v2884_v41 = vadd.f32 %v2883_v45, %v2835_v19 }
 0x370   :  { %v2738_v10 = vpop.f32.mrf.mxu2 }
 0x371   :  { %2925 = vst.msk [vmem:[%s6164_s2 + $0x8] sm:$0xff] %vm2924_vm1, %v2884_v41  ;;  %v2739_v16 = vadd.f32 %v2738_v10, %v6008_v27  ;;  %v2787_v24 = vpop.f32.mrf.mxu3 }
 0x372   :  { %v2839_v0 = vpop.f32.mrf.mxu0 }
 0x373   :  { %v2788_v35 = vadd.f32 %v2787_v24, %v2739_v16 }
 0x374   :  { %v2888_v36 = vpop.f32.mrf.mxu1 }
 0x375   :  { %v2837_v44 = vadd.f32 %v2836_v63, %v2788_v35 }
 0x377   :  { %v2886_v34 = vadd.f32 %v2885_v23, %v2837_v44 }
 0x378   :  { %v2741_v2 = vpop.f32.mrf.mxu2 }
 0x379   :  { %2927 = vst.msk [vmem:[%s6164_s2 + $0x18] sm:$0xff] %vm2924_vm1, %v2886_v34  ;;  %v2742_v58 = vadd.f32 %v2741_v2, %v6011_v14  ;;  %v2790_v42 = vpop.f32.mrf.mxu3 }
 0x37a   :  { %v2841_v29 = vpop.f32.mrf.mxu0 }
 0x37b   :  { %v2791_v13 = vadd.f32 %v2790_v42, %v2742_v58 }
 0x37c   :  { %v2890_v12 = vpop.f32.mrf.mxu1 }
 0x37d   :  { %v2840_v54 = vadd.f32 %v2839_v0, %v2791_v13 }
 0x37f   :  { %v2889_v27 = vadd.f32 %v2888_v36, %v2840_v54 }
 0x380   :  { %v2743_v3 = vpop.f32.mrf.mxu2 }
 0x381   :  { %2929 = vst.msk [vmem:[%s6164_s2 + $0x28] sm:$0xff] %vm2924_vm1, %v2889_v27  ;;  %v2744_v53 = vadd.f32 %v2743_v3, %v6019_v48  ;;  %v2792_v38 = vpop.f32.mrf.mxu3 }
 0x382   :  { %v2844_v15 = vpop.f32.mrf.mxu0 }
 0x383   :  { %v2793_v32 = vadd.f32 %v2792_v38, %v2744_v53 }
 0x384   :  { %v2893_v9 = vpop.f32.mrf.mxu1 }
 0x385   :  { %v2842_v26 = vadd.f32 %v2841_v29, %v2793_v32 }
 0x387   :  { %v2891_v14 = vadd.f32 %v2890_v12, %v2842_v26 }
 0x388   :  { %v2746_v59 = vpop.f32.mrf.mxu2 }
 0x389   :  { %2931 = vst.msk [vmem:[%s6164_s2 + $0x38] sm:$0xff] %vm2924_vm1, %v2891_v14  ;;  %v2747_v46 = vadd.f32 %v2746_v59, %v6022_v17  ;;  %v2795_v43 = vpop.f32.mrf.mxu3 }
 0x38a   :  { %v2846_v56 = vpop.f32.mrf.mxu0 }
 0x38b   :  { %v2796_v37 = vadd.f32 %v2795_v43, %v2747_v46 }
 0x38c   :  { %v2895_v47 = vpop.f32.mrf.mxu1 }
 0x38d   :  { %v2845_v31 = vadd.f32 %v2844_v15, %v2796_v37 }
 0x38f   :  { %v2894_v48 = vadd.f32 %v2893_v9, %v2845_v31 }
 0x390   :  { %v2748_v60 = vpop.f32.mrf.mxu2 }
 0x391   :  { %2933 = vst.msk [vmem:[%s6164_s2 + $0x48] sm:$0xff] %vm2924_vm1, %v2894_v48  ;;  %v2749_v6 = vadd.f32 %v2748_v60, %v6030_v33  ;;  %v2797_v4 = vpop.f32.mrf.mxu3 }
 0x392   :  { %v2849_v57 = vpop.f32.mrf.mxu0 }
 0x393   :  { %v2798_v55 = vadd.f32 %v2797_v4, %v2749_v6 }
 0x394   :  { %v2898_v8 = vpop.f32.mrf.mxu1 }
 0x395   :  { %v2847_v30 = vadd.f32 %v2846_v56, %v2798_v55 }
 0x397   :  { %v2896_v17 = vadd.f32 %v2895_v47, %v2847_v30 }
 0x398   :  { %v2751_v62 = vpop.f32.mrf.mxu2 }
 0x399   :  { %2935 = vst.msk [vmem:[%s6164_s2 + $0x58] sm:$0xff] %vm2924_vm1, %v2896_v17  ;;  %v2752_v11 = vadd.f32 %v2751_v62, %v6033_v52  ;;  %v2800_v50 = vpop.f32.mrf.mxu3 }
 0x39a   :  { %v2851_v45 = vpop.f32.mrf.mxu0 }
 0x39b   :  { %v2801_v61 = vadd.f32 %v2800_v50, %v2752_v11 }
 0x39c   :  { %v2900_v22 = vpop.f32.mrf.mxu1 }
 0x39d   :  { %v2850_v49 = vadd.f32 %v2849_v57, %v2801_v61 }
 0x39f   :  { %v2899_v33 = vadd.f32 %v2898_v8, %v2850_v49 }
 0x3a0   :  { %v2753_v20 = vpop.f32.mrf.mxu2 }
 0x3a1   :  { %2937 = vst.msk [vmem:[%s6164_s2 + $0x68] sm:$0xff] %vm2924_vm1, %v2899_v33  ;;  %v2754_v63 = vadd.f32 %v2753_v20, %v6041_v21  ;;  %v2802_v40 = vpop.f32.mrf.mxu3 }
 0x3a2   :  { %v2854_v23 = vpop.f32.mrf.mxu0 }
 0x3a3   :  { %v2803_v19 = vadd.f32 %v2802_v40, %v2754_v63 }
 0x3a4   :  { %v2903_v41 = vpop.f32.mrf.mxu1 }
 0x3a5   :  { %v2852_v10 = vadd.f32 %v2851_v45, %v2803_v19 }
 0x3a7   :  { %v2901_v52 = vadd.f32 %v2900_v22, %v2852_v10 }
 0x3a8   :  { %v2756_v16 = vpop.f32.mrf.mxu2 }
 0x3a9   :  { %2939 = vst.msk [vmem:[%s6164_s2 + $0x78] sm:$0xff] %vm2924_vm1, %v2901_v52  ;;  %v2757_v24 = vadd.f32 %v2756_v16, %v6044_v25  ;;  %v2805_v0 = vpop.f32.mrf.mxu3 }
 0x3aa   :  { %v2856_v35 = vpop.f32.mrf.mxu0 }
 0x3ab   :  { %v2806_v36 = vadd.f32 %v2805_v0, %v2757_v24 }
 0x3ac   :  { %v2905_v44 = vpop.f32.mrf.mxu1 }
 0x3ad   :  { %v2855_v34 = vadd.f32 %v2854_v23, %v2806_v36 }
 0x3af   :  { %v2904_v21 = vadd.f32 %v2903_v41, %v2855_v34 }
 0x3b0   :  { %v2758_v2 = vpop.f32.mrf.mxu2 }
 0x3b1   :  { %2941 = vst.msk [vmem:[%s6164_s2 + $0x88] sm:$0xff] %vm2924_vm1, %v2904_v21  ;;  %v2759_v58 = vadd.f32 %v2758_v2, %v6052_v18  ;;  %v2807_v42 = vpop.f32.mrf.mxu3 }
 0x3b2   :  { %v2859_v29 = vpop.f32.mrf.mxu0 }
 0x3b3   :  { %v2808_v13 = vadd.f32 %v2807_v42, %v2759_v58 }
 0x3b4   :  { %v2908_v12 = vpop.f32.mrf.mxu1 }
 0x3b5   :  { %v2857_v54 = vadd.f32 %v2856_v35, %v2808_v13 }
 0x3b7   :  { %v2906_v25 = vadd.f32 %v2905_v44, %v2857_v54 }
 0x3b8   :  { %v2761_v27 = vpop.f32.mrf.mxu2 }
 0x3b9   :  { %2943 = vst.msk [vmem:[%s6164_s2 + $0x98] sm:$0xff] %vm2924_vm1, %v2906_v25  ;;  %v2762_v3 = vadd.f32 %v2761_v27, %v6055_v39  ;;  %v2810_v53 = vpop.f32.mrf.mxu3 }
 0x3ba   :  { %v2861_v15 = vpop.f32.mrf.mxu0 }
 0x3bb   :  { %v2811_v38 = vadd.f32 %v2810_v53, %v2762_v3 }
 0x3bc   :  { %v2910_v9 = vpop.f32.mrf.mxu1 }
 0x3bd   :  { %v2860_v32 = vadd.f32 %v2859_v29, %v2811_v38 }
 0x3bf   :  { %v2909_v18 = vadd.f32 %v2908_v12, %v2860_v32 }
 0x3c0   :  { %v2763_v26 = vpop.f32.mrf.mxu2 }
 0x3c1   :  { %2945 = vst.msk [vmem:[%s6164_s2 + $0xa8] sm:$0xff] %vm2924_vm1, %v2909_v18  ;;  %v2764_v14 = vadd.f32 %v2763_v26, %v6063_v28  ;;  %v2812_v59 = vpop.f32.mrf.mxu3 }
 0x3c2   :  { %v2864_v56 = vpop.f32.mrf.mxu0 }
 0x3c3   :  { %v2813_v46 = vadd.f32 %v2812_v59, %v2764_v14 }
 0x3c4   :  { %v2913_v39 = vpop.f32.mrf.mxu1 }
 0x3c5   :  { %v2862_v43 = vadd.f32 %v2861_v15, %v2813_v46 }
 0x3c7   :  { %v2911_v37 = vadd.f32 %v2910_v9, %v2862_v43 }
 0x3c8   :  { %v2766_v47 = vpop.f32.mrf.mxu2 }
 0x3c9   :  { %2947 = vst.msk [vmem:[%s6164_s2 + $0xb8] sm:$0xff] %vm2924_vm1, %v2911_v37  ;;  %v2767_v31 = vadd.f32 %v2766_v47, %v6066_v1  ;;  %v2815_v48 = vpop.f32.mrf.mxu3 }
 0x3ca   :  { %v2866_v57 = vpop.f32.mrf.mxu0 }
 0x3cb   :  { %v2816_v60 = vadd.f32 %v2815_v48, %v2767_v31 }
 0x3cc   :  { %v2915_v30 = vpop.f32.mrf.mxu1 }
 0x3cd   :  { %v2865_v6 = vadd.f32 %v2864_v56, %v2816_v60 }
 0x3cf   :  { %v2914_v4 = vadd.f32 %v2913_v39, %v2865_v6 }
 0x3d0   :  { %v2768_v28 = vpop.f32.mrf.mxu2 }
 0x3d1   :  { %2949 = vst.msk [vmem:[%s6164_s2 + $0xc8] sm:$0xff] %vm2924_vm1, %v2914_v4  ;;  %v2769_v55 = vadd.f32 %v2768_v28, %v6074_v51  ;;  %v2817_v8 = vpop.f32.mrf.mxu3 }
 0x3d2   :  { %v2869_v61 = vpop.f32.mrf.mxu0 }
 0x3d3   :  { %v2818_v17 = vadd.f32 %v2817_v8, %v2769_v55 }
 0x3d4   :  { %v2918_v49 = vpop.f32.mrf.mxu1 }
 0x3d5   :  { %v2867_v62 = vadd.f32 %v2866_v57, %v2818_v17 }
 0x3d7   :  { %v2916_v11 = vadd.f32 %v2915_v30, %v2867_v62 }
 0x3d8   :  { %v2771_v50 = vpop.f32.mrf.mxu2 }
 0x3d9   :  { %2951 = vst.msk [vmem:[%s6164_s2 + $0xd8] sm:$0xff] %vm2924_vm1, %v2916_v11  ;;  %v2772_v1 = vadd.f32 %v2771_v50, %v6077_v5  ;;  %v2820_v45 = vpop.f32.mrf.mxu3 }
 0x3da   :  { %v2871_v19 = vpop.f32.mrf.mxu0 }
 0x3db   :  { %v2821_v22 = vadd.f32 %v2820_v45, %v2772_v1 }
 0x3dc   :  { %v2920_v10 = vpop.f32.mrf.mxu1 }
 0x3dd   :  { %v2870_v33 = vadd.f32 %v2869_v61, %v2821_v22 }
 0x3df   :  { %v2919_v20 = vadd.f32 %v2918_v49, %v2870_v33 }
 0x3e0   :  { %v2773_v51 = vpop.f32.mrf.mxu2 }
 0x3e1   :  { %2953 = vst.msk [vmem:[%s6164_s2 + $0xe8] sm:$0xff] %vm2924_vm1, %v2919_v20  ;;  %v2774_v63 = vadd.f32 %v2773_v51, %v6080_v7  ;;  %v2822_v40 = vpop.f32.mrf.mxu3 }
 0x3e3   :  { %v2823_v23 = vadd.f32 %v2822_v40, %v2774_v63 }
 0x3e5   :  { %v2872_v41 = vadd.f32 %v2871_v19, %v2823_v23 }
 0x3e7   :  { %v2921_v5 = vadd.f32 %v2920_v10, %v2872_v41 }
 0x3e9   :  { %2955 = vst.msk [vmem:[%s6164_s2 + $0xf8] sm:$0xff] %vm2924_vm1, %v2921_v5 }

</bundles_post_ra>
